<compile_context>
chip_gen: v7x
topology: tpu7x:2x2x1
jax: 0.10.0
libtpu: 0.0.40
codegen_flags: <defaults>
</compile_context>

<pallas_src>
import functools

import jax
import jax.numpy as jnp
import numpy as np
from jax.experimental import pallas as pl
from jax.experimental.pallas import tpu as pltpu

F32 = jnp.float32

# Geometry implied by Net (1x32x32 input -> 16*6*6 flat features).
H0, W0 = 32, 32
C1, C2 = 6, 16
FC1, FC2, FC3 = 120, 84, 10
LANE = 128            # padded lane width used for every block
ROWS_PER_IMG = 8      # every activation keeps 8 sublane rows per image


# ---------------------------------------------------------------------------
# Host-side parameter preprocessing (numpy, done once; hoisted out of jit).
# ---------------------------------------------------------------------------
def prepare_params(params):
    c1w, c1b, c2w, c2b, f1w, f1b, f2w, f2b, f3w, f3b = [
        np.asarray(p, np.float32) for p in params]

    # conv1 packed block-Toeplitz taps.  LHS row r of an image holds input
    # rows 4r..4r+5 (6 x 32 lanes).  Output lane block (d, parity) -- 8 blocks
    # of 128 lanes, 90 valid -- holds conv row 4r+d at columns of that parity,
    # lane = q*6 + co with ow = 2q+parity.  So the 2x2 pool is a lane-block max.
    t1 = np.zeros((6 * W0, 8 * LANE), np.float32)
    b1 = np.zeros((1, 8 * LANE), np.float32)
    for d in range(4):
        for par in range(2):
            blk = 2 * d + par
            b1[0, blk * LANE: blk * LANE + 15 * C1] = np.tile(c1b, 15)
            for kh in range(3):
                for kw in range(3):
                    for q in range(15):
                        ow = 2 * q + par
                        row = W0 * (d + kh) + ow + kw
                        col = blk * LANE + q * C1
                        t1[row, col: col + C1] += c1w[:, 0, kh, kw]

    # conv2 packed taps.  LHS row p holds pool1 rows 2p..2p+3 (4 x 128-lane
    # blocks, 90 valid, lane = col*6 + ci).  Output blocks (s, parity) hold
    # conv2 row 2p+s at columns of that parity (even: 7 cols, odd: 6 cols,
    # x16 channels), lane = q*16 + co.
    t2 = np.zeros((4 * LANE, 4 * LANE), np.float32)
    b2 = np.zeros((1, 4 * LANE), np.float32)
    for s in range(2):
        for par in range(2):
            blk = 2 * s + par
            ncols = 7 if par == 0 else 6
            b2[0, blk * LANE: blk * LANE + ncols * C2] = np.tile(c2b, ncols)
            for kh in range(3):
                for kw in range(3):
                    for ci in range(C1):
                        for q in range(ncols):
                            ow = 2 * q + par
                            row = (s + kh) * LANE + (ow + kw) * C1 + ci
                            col = blk * LANE + q * C2
                            t2[row, col: col + C2] += c2w[:, ci, kh, kw]

    # fc1 as one (6*128, 128) matrix: row block j holds the weights for the
    # pool2 spatial row h=j with input lane = w*16 + c (remapped from
    # PyTorch's (C,H,W) flatten order); outputs padded 120 -> 128.
    w1k = np.zeros((6 * LANE, LANE), np.float32)
    for j in range(6):
        for q in range(6):
            for co in range(C2):
                w1k[j * LANE + q * C2 + co, :FC1] = f1w[:, co * 36 + j * 6 + q]
    b1f = np.zeros((1, LANE), np.float32); b1f[0, :FC1] = f1b
    w2f = np.zeros((LANE, LANE), np.float32); w2f[:FC1, :FC2] = f2w.T
    b2f = np.zeros((1, LANE), np.float32); b2f[0, :FC2] = f2b
    w3f = np.zeros((LANE, LANE), np.float32); w3f[:FC2, :FC3] = f3w.T
    b3f = np.zeros((1, LANE), np.float32); b3f[0, :FC3] = f3b

    return tuple(jnp.asarray(a) for a in
                 (t1, b1, t2, b2, w1k, b1f, w2f, b2f, w3f, b3f))


# ---------------------------------------------------------------------------
# Fused kernel: TB images per grid step, whole forward pass in VMEM/vregs.
# ---------------------------------------------------------------------------
def _net_kernel(x_ref, t1_ref, b1_ref, t2_ref, b2_ref, w1k_ref, b1f_ref,
                w2f_ref, b2f_ref, w3f_ref, b3f_ref, m6_ref, srow_ref,
                o_ref, y_ref):
    def mm(a, b):
        return jnp.dot(a, b, preferred_element_type=F32)

    def lane_block(a, i):                      # 128-aligned lane block i
        return a[:, i * LANE:(i + 1) * LANE]

    nrow = x_ref.shape[0]                      # TB * 8

    # conv1 (+bias, ReLU): one packed Toeplitz matmul, M = TB*8.
    a1 = jnp.maximum(mm(x_ref[...], t1_ref[...]) + b1_ref[...], 0.0)   # (TB*8,1024)

    # pool1: elementwise max over the 4 packed 2x2-pool corner blocks (VPU).
    y_even = jnp.maximum(jnp.maximum(lane_block(a1, 0), lane_block(a1, 1)),
                         jnp.maximum(lane_block(a1, 2), lane_block(a1, 3)))
    y_odd = jnp.maximum(jnp.maximum(lane_block(a1, 4), lane_block(a1, 5)),
                        jnp.maximum(lane_block(a1, 6), lane_block(a1, 7)))
    y = jnp.concatenate([y_even, y_odd], axis=1)                       # (TB*8,256)

    # Row-shifted copy (y_next[r] = y[r+1]) via a scratch ref + offset read;
    # the 8 pad rows are zeroed so no stale VMEM (NaN/Inf) can leak in.
    y_ref[pl.ds(0, nrow), :] = y
    y_ref[pl.ds(nrow, ROWS_PER_IMG), :] = jnp.zeros((ROWS_PER_IMG, 2 * LANE), F32)
    y_next = y_ref[pl.ds(1, nrow), :]
    lhs2 = jnp.concatenate([y, y_next], axis=1)                        # (TB*8,512)

    # conv2 (+bias, ReLU): one packed Toeplitz matmul; pool2 = lane-block max.
    a2 = jnp.maximum(mm(lhs2, t2_ref[...]) + b2_ref[...], 0.0)         # (TB*8,512)
    z = jnp.maximum(jnp.maximum(lane_block(a2, 0), lane_block(a2, 1)),
                    jnp.maximum(lane_block(a2, 2), lane_block(a2, 3)))  # (TB*8,128)

    # fc1: route per-image row j (0..5) to its 128-wide weight block with a
    # 0/1 mask, contract once over 768 features, then sum each image's 8 rows
    # with a tiny 0/1 matmul -> (TB, 128).
    m6 = m6_ref[...]
    zcat = jnp.concatenate([z * m6[:, j:j + 1] for j in range(6)], axis=1)
    t = mm(zcat, w1k_ref[...])                                         # (TB*8,128)
    h = jnp.maximum(mm(srow_ref[...], t) + b1f_ref[...], 0.0)          # (TB,128)
    h = jnp.maximum(mm(h, w2f_ref[...]) + b2f_ref[...], 0.0)
    o_ref[...] = mm(h, w3f_ref[...]) + b3f_ref[...]                    # unmasked


# ---------------------------------------------------------------------------
# Jitted wrapper (params preprocessed outside and passed in).
# ---------------------------------------------------------------------------
@functools.partial(jax.jit, static_argnames=("block_batch",))
def net_forward(x_nchw, prepped, block_batch=8):
    assert x_nchw.shape[1:] == (1, H0, W0), x_nchw.shape
    (t1, b1, t2, b2, w1k, b1f, w2f, b2f, w3f, b3f) = prepped
    n = x_nchw.shape[0]
    tb = int(block_batch)
    assert tb % 8 == 0, "block_batch must be a multiple of 8"
    npad = ((n + tb - 1) // tb) * tb
    grid = (npad // tb,)

    # Input packing (free contiguous reshapes + tiny pad/slice): per image,
    # sublane row r holds input rows 4r..4r+5 (192 lanes) so conv1 can emit
    # 4 output rows per sublane row without any in-kernel row shifts.
    x = x_nchw.reshape(n, H0, W0).astype(F32)
    x = jnp.pad(x, ((0, npad - n), (0, 0), (0, 0)))
    xq = x.reshape(npad, 8, 4 * W0)
    xs = jnp.pad(x, ((0, 0), (0, 4), (0, 0)))[:, 4:, :]
    xs = xs.reshape(npad, 8, 4, W0)[:, :, :2, :].reshape(npad, 8, 2 * W0)
    lhs1 = jnp.concatenate([xq, xs], axis=2).reshape(npad * 8, 6 * W0)

    # Compile-time constants: fc1 row-routing mask and per-image row-sum.
    m6 = np.zeros((tb * 8, 6), np.float32)
    for j in range(6):
        m6[j::8, j] = 1.0
    srow = np.zeros((tb, tb * 8), np.float32)
    for b_ in range(tb):
        srow[b_, b_ * 8:(b_ + 1) * 8] = 1.0
    m6 = jnp.asarray(m6)
    srow = jnp.asarray(srow)

    weights = (t1, b1, t2, b2, w1k, b1f, w2f, b2f, w3f, b3f, m6, srow)
    in_specs = [pl.BlockSpec((tb * 8, 6 * W0), lambda i: (i, 0))]
    in_specs += [pl.BlockSpec(w.shape, lambda i: (0, 0)) for w in weights]

    out = pl.pallas_call(
        _net_kernel,
        out_shape=jax.ShapeDtypeStruct((npad, LANE), F32),
        grid=grid,
        in_specs=in_specs,
        out_specs=pl.BlockSpec((tb, LANE), lambda i: (i, 0)),
        scratch_shapes=[pltpu.VMEM((tb * 8 + ROWS_PER_IMG, 2 * LANE), F32)],
        compiler_params=pltpu.CompilerParams(
            dimension_semantics=("parallel",),
            vmem_limit_bytes=32 * 1024 * 1024),
    )(lhs1, *weights)
    return out[:n, :FC3]


# ---------------------------------------------------------------------------
# Pure-JAX reference for the correctness check.
# ---------------------------------------------------------------------------
def net_reference(x_nchw, params):
    (c1w, c1b, c2w, c2b, f1w, f1b, f2w, f2b, f3w, f3b) = params
    dn = ('NCHW', 'OIHW', 'NCHW')

    def conv_relu_pool(x, w, b):
        y = jax.lax.conv_general_dilated(x, w, (1, 1), 'VALID',
                                         dimension_numbers=dn)
        y = jnp.maximum(y + b.reshape(1, -1, 1, 1), 0.0)
        return jax.lax.reduce_window(y, -jnp.inf, jax.lax.max,
                                     (1, 1, 2, 2), (1, 1, 2, 2), 'VALID')

    a = conv_relu_pool(x_nchw, c1w, c1b)
    a = conv_relu_pool(a, c2w, c2b)
    a = a.reshape(a.shape[0], -1)
    a = jnp.maximum(a @ f1w.T + f1b, 0.0)
    a = jnp.maximum(a @ f2w.T + f2b, 0.0)
    return a @ f3w.T + f3b


if __name__ == "__main__":
    key = jax.random.PRNGKey(0)
    ks = jax.random.split(key, 11)

    def uni(k, shape, fan_in):
        bound = 1.0 / (fan_in ** 0.5)
        return jax.random.uniform(k, shape, F32, -bound, bound)

    params = (
        uni(ks[0], (6, 1, 3, 3), 9),       # conv1.weight (OIHW)
        uni(ks[1], (6,), 9),               # conv1.bias
        uni(ks[2], (16, 6, 3, 3), 54),     # conv2.weight
        uni(ks[3], (16,), 54),             # conv2.bias
        uni(ks[4], (120, 576), 576),       # fc1.weight (out, in)
        uni(ks[5], (120,), 576),           # fc1.bias
        uni(ks[6], (84, 120), 120),        # fc2.weight
        uni(ks[7], (84,), 120),            # fc2.bias
        uni(ks[8], (10, 84), 84),          # fc3.weight
        uni(ks[9], (10,), 84),             # fc3.bias
    )

    # Net's forward implies a 32x32 single-channel input; batch 12 exercises
    # batch padding (12 -> 16) and a 2-step grid.
    x = jax.random.normal(ks[10], (12, 1, 32, 32), F32)

    prepped = prepare_params(params)                 # hoisted out of jit
    out = jax.block_until_ready(net_forward(x, prepped))
    ref = jax.block_until_ready(net_reference(x, params))

    assert out.shape == (12, 10), out.shape
    err = float(jnp.max(jnp.abs(out - ref)))
    assert err < 1e-3, err
    print("KERNEL_OK")
</pallas_src>

<mosaic_0001>
module attributes {stable_mosaic.version = 11 : i64} {
  func.func @_net_kernel(%arg0: i32, %arg1: memref<64x192xf32, #tpu.memory_space<vmem>>, %arg2: memref<192x1024xf32, #tpu.memory_space<vmem>>, %arg3: memref<1x1024xf32, #tpu.memory_space<vmem>>, %arg4: memref<512x512xf32, #tpu.memory_space<vmem>>, %arg5: memref<1x512xf32, #tpu.memory_space<vmem>>, %arg6: memref<768x128xf32, #tpu.memory_space<vmem>>, %arg7: memref<1x128xf32, #tpu.memory_space<vmem>>, %arg8: memref<128x128xf32, #tpu.memory_space<vmem>>, %arg9: memref<1x128xf32, #tpu.memory_space<vmem>>, %arg10: memref<128x128xf32, #tpu.memory_space<vmem>>, %arg11: memref<1x128xf32, #tpu.memory_space<vmem>>, %arg12: memref<64x6xf32, #tpu.memory_space<vmem>>, %arg13: memref<8x64xf32, #tpu.memory_space<vmem>>, %arg14: memref<8x128xf32, #tpu.memory_space<vmem>>, %arg15: memref<72x256xf32, #tpu.memory_space<vmem>>) attributes {dimension_semantics = [#tpu.dimension_semantics<parallel>], iteration_bounds = array<i64: 2>, scalar_prefetch = 0 : i64, scratch_operands = 1 : i64, tpu.core_type = #tpu.core_type<tc>, window_params = [{transform_indices = @transform_0, window_bounds = array<i64: 64, 192>}, {pipeline_mode = #tpu.pipeline_mode<synchronous>, transform_indices = @transform_1, window_bounds = array<i64: 192, 1024>}, {pipeline_mode = #tpu.pipeline_mode<synchronous>, transform_indices = @transform_2, window_bounds = array<i64: 1, 1024>}, {pipeline_mode = #tpu.pipeline_mode<synchronous>, transform_indices = @transform_3, window_bounds = array<i64: 512, 512>}, {pipeline_mode = #tpu.pipeline_mode<synchronous>, transform_indices = @transform_4, window_bounds = array<i64: 1, 512>}, {pipeline_mode = #tpu.pipeline_mode<synchronous>, transform_indices = @transform_5, window_bounds = array<i64: 768, 128>}, {pipeline_mode = #tpu.pipeline_mode<synchronous>, transform_indices = @transform_6, window_bounds = array<i64: 1, 128>}, {pipeline_mode = #tpu.pipeline_mode<synchronous>, transform_indices = @transform_7, window_bounds = array<i64: 128, 128>}, {pipeline_mode = #tpu.pipeline_mode<synchronous>, transform_indices = @transform_8, window_bounds = array<i64: 1, 128>}, {pipeline_mode = #tpu.pipeline_mode<synchronous>, transform_indices = @transform_9, window_bounds = array<i64: 128, 128>}, {pipeline_mode = #tpu.pipeline_mode<synchronous>, transform_indices = @transform_10, window_bounds = array<i64: 1, 128>}, {pipeline_mode = #tpu.pipeline_mode<synchronous>, transform_indices = @transform_11, window_bounds = array<i64: 64, 6>}, {pipeline_mode = #tpu.pipeline_mode<synchronous>, transform_indices = @transform_12, window_bounds = array<i64: 8, 64>}, {transform_indices = @transform_13, window_bounds = array<i64: 8, 128>}]} {
    %c0 = arith.constant 0 : index
    %c0_0 = arith.constant 0 : index
    %0 = vector.load %arg1[%c0, %c0_0] : memref<64x192xf32, #tpu.memory_space<vmem>>, vector<64x192xf32>
    %c0_1 = arith.constant 0 : index
    %c0_2 = arith.constant 0 : index
    %1 = vector.load %arg2[%c0_1, %c0_2] : memref<192x1024xf32, #tpu.memory_space<vmem>>, vector<192x1024xf32>
    %cst = arith.constant dense<0.000000e+00> : vector<64x1024xf32>
    %2 = tpu.matmul %0, %1, %cst {dimension_numbers = #tpu.dot_dimension_numbers<[1], [0], [0], [1], [0, 0, 1, 1], [], []>} : vector<64x192xf32>, vector<192x1024xf32>, vector<64x1024xf32> -> vector<64x1024xf32>
    %c0_3 = arith.constant 0 : index
    %c0_4 = arith.constant 0 : index
    %3 = vector.load %arg3[%c0_3, %c0_4] : memref<1x1024xf32, #tpu.memory_space<vmem>>, vector<1x1024xf32>
    %4 = vector.broadcast %3 : vector<1x1024xf32> to vector<64x1024xf32>
    %5 = arith.addf %2, %4 : vector<64x1024xf32>
    %cst_5 = arith.constant 0.000000e+00 : f32
    %6 = vector.broadcast %cst_5 : f32 to vector<64x1024xf32>
    %7 = arith.maximumf %5, %6 : vector<64x1024xf32>
    %8 = vector.extract_strided_slice %7 {offsets = [0, 0], sizes = [64, 128], strides = [1, 1]} : vector<64x1024xf32> to vector<64x128xf32>
    %9 = vector.extract_strided_slice %7 {offsets = [0, 128], sizes = [64, 128], strides = [1, 1]} : vector<64x1024xf32> to vector<64x128xf32>
    %10 = arith.maximumf %8, %9 : vector<64x128xf32>
    %11 = vector.extract_strided_slice %7 {offsets = [0, 256], sizes = [64, 128], strides = [1, 1]} : vector<64x1024xf32> to vector<64x128xf32>
    %12 = vector.extract_strided_slice %7 {offsets = [0, 384], sizes = [64, 128], strides = [1, 1]} : vector<64x1024xf32> to vector<64x128xf32>
    %13 = arith.maximumf %11, %12 : vector<64x128xf32>
    %14 = arith.maximumf %10, %13 : vector<64x128xf32>
    %15 = vector.extract_strided_slice %7 {offsets = [0, 512], sizes = [64, 128], strides = [1, 1]} : vector<64x1024xf32> to vector<64x128xf32>
    %16 = vector.extract_strided_slice %7 {offsets = [0, 640], sizes = [64, 128], strides = [1, 1]} : vector<64x1024xf32> to vector<64x128xf32>
    %17 = arith.maximumf %15, %16 : vector<64x128xf32>
    %18 = vector.extract_strided_slice %7 {offsets = [0, 768], sizes = [64, 128], strides = [1, 1]} : vector<64x1024xf32> to vector<64x128xf32>
    %19 = vector.extract_strided_slice %7 {offsets = [0, 896], sizes = [64, 128], strides = [1, 1]} : vector<64x1024xf32> to vector<64x128xf32>
    %20 = arith.maximumf %18, %19 : vector<64x128xf32>
    %21 = arith.maximumf %17, %20 : vector<64x128xf32>
    %22 = tpu.concatenate %14, %21 in 1 : vector<64x128xf32>, vector<64x128xf32> -> vector<64x256xf32>
    %c0_6 = arith.constant 0 : index
    %c0_7 = arith.constant 0 : index
    %23 = vector.load %arg15[%c0_6, %c0_7] : memref<72x256xf32, #tpu.memory_space<vmem>>, vector<64x256xf32>
    tpu.vector_store %arg15[%c0_6, %c0_7], %22 {strides = array<i32>} : memref<72x256xf32, #tpu.memory_space<vmem>>, vector<64x256xf32>,
    %cst_8 = arith.constant 0.000000e+00 : f32
    %24 = vector.broadcast %cst_8 : f32 to vector<8x256xf32>
    %c64 = arith.constant 64 : index
    %c0_9 = arith.constant 0 : index
    %25 = vector.load %arg15[%c64, %c0_9] : memref<72x256xf32, #tpu.memory_space<vmem>>, vector<8x256xf32>
    tpu.vector_store %arg15[%c64, %c0_9], %24 {strides = array<i32>} : memref<72x256xf32, #tpu.memory_space<vmem>>, vector<8x256xf32>,
    %c1 = arith.constant 1 : index
    %c0_10 = arith.constant 0 : index
    %26 = vector.load %arg15[%c1, %c0_10] : memref<72x256xf32, #tpu.memory_space<vmem>>, vector<64x256xf32>
    %27 = tpu.concatenate %22, %26 in 1 : vector<64x256xf32>, vector<64x256xf32> -> vector<64x512xf32>
    %c0_11 = arith.constant 0 : index
    %c0_12 = arith.constant 0 : index
    %28 = vector.load %arg4[%c0_11, %c0_12] : memref<512x512xf32, #tpu.memory_space<vmem>>, vector<512x512xf32>
    %cst_13 = arith.constant dense<0.000000e+00> : vector<64x512xf32>
    %29 = tpu.matmul %27, %28, %cst_13 {dimension_numbers = #tpu.dot_dimension_numbers<[1], [0], [0], [1], [0, 0, 1, 1], [], []>} : vector<64x512xf32>, vector<512x512xf32>, vector<64x512xf32> -> vector<64x512xf32>
    %c0_14 = arith.constant 0 : index
    %c0_15 = arith.constant 0 : index
    %30 = vector.load %arg5[%c0_14, %c0_15] : memref<1x512xf32, #tpu.memory_space<vmem>>, vector<1x512xf32>
    %31 = vector.broadcast %30 : vector<1x512xf32> to vector<64x512xf32>
    %32 = arith.addf %29, %31 : vector<64x512xf32>
    %cst_16 = arith.constant 0.000000e+00 : f32
    %33 = vector.broadcast %cst_16 : f32 to vector<64x512xf32>
    %34 = arith.maximumf %32, %33 : vector<64x512xf32>
    %35 = vector.extract_strided_slice %34 {offsets = [0, 0], sizes = [64, 128], strides = [1, 1]} : vector<64x512xf32> to vector<64x128xf32>
    %36 = vector.extract_strided_slice %34 {offsets = [0, 128], sizes = [64, 128], strides = [1, 1]} : vector<64x512xf32> to vector<64x128xf32>
    %37 = arith.maximumf %35, %36 : vector<64x128xf32>
    %38 = vector.extract_strided_slice %34 {offsets = [0, 256], sizes = [64, 128], strides = [1, 1]} : vector<64x512xf32> to vector<64x128xf32>
    %39 = vector.extract_strided_slice %34 {offsets = [0, 384], sizes = [64, 128], strides = [1, 1]} : vector<64x512xf32> to vector<64x128xf32>
    %40 = arith.maximumf %38, %39 : vector<64x128xf32>
    %41 = arith.maximumf %37, %40 : vector<64x128xf32>
    %c0_17 = arith.constant 0 : index
    %c0_18 = arith.constant 0 : index
    %42 = vector.load %arg12[%c0_17, %c0_18] : memref<64x6xf32, #tpu.memory_space<vmem>>, vector<64x6xf32>
    %43 = vector.extract_strided_slice %42 {offsets = [0, 0], sizes = [64, 1], strides = [1, 1]} : vector<64x6xf32> to vector<64x1xf32>
    %44 = vector.broadcast %43 : vector<64x1xf32> to vector<64x128xf32>
    %45 = arith.mulf %41, %44 : vector<64x128xf32>
    %46 = vector.extract_strided_slice %42 {offsets = [0, 1], sizes = [64, 1], strides = [1, 1]} : vector<64x6xf32> to vector<64x1xf32>
    %47 = vector.broadcast %46 : vector<64x1xf32> to vector<64x128xf32>
    %48 = arith.mulf %41, %47 : vector<64x128xf32>
    %49 = vector.extract_strided_slice %42 {offsets = [0, 2], sizes = [64, 1], strides = [1, 1]} : vector<64x6xf32> to vector<64x1xf32>
    %50 = vector.broadcast %49 : vector<64x1xf32> to vector<64x128xf32>
    %51 = arith.mulf %41, %50 : vector<64x128xf32>
    %52 = vector.extract_strided_slice %42 {offsets = [0, 3], sizes = [64, 1], strides = [1, 1]} : vector<64x6xf32> to vector<64x1xf32>
    %53 = vector.broadcast %52 : vector<64x1xf32> to vector<64x128xf32>
    %54 = arith.mulf %41, %53 : vector<64x128xf32>
    %55 = vector.extract_strided_slice %42 {offsets = [0, 4], sizes = [64, 1], strides = [1, 1]} : vector<64x6xf32> to vector<64x1xf32>
    %56 = vector.broadcast %55 : vector<64x1xf32> to vector<64x128xf32>
    %57 = arith.mulf %41, %56 : vector<64x128xf32>
    %58 = vector.extract_strided_slice %42 {offsets = [0, 5], sizes = [64, 1], strides = [1, 1]} : vector<64x6xf32> to vector<64x1xf32>
    %59 = vector.broadcast %58 : vector<64x1xf32> to vector<64x128xf32>
    %60 = arith.mulf %41, %59 : vector<64x128xf32>
    %61 = tpu.concatenate %45, %48, %51, %54, %57, %60 in 1 : vector<64x128xf32>, vector<64x128xf32>, vector<64x128xf32>, vector<64x128xf32>, vector<64x128xf32>, vector<64x128xf32> -> vector<64x768xf32>
    %c0_19 = arith.constant 0 : index
    %c0_20 = arith.constant 0 : index
    %62 = vector.load %arg6[%c0_19, %c0_20] : memref<768x128xf32, #tpu.memory_space<vmem>>, vector<768x128xf32>
    %cst_21 = arith.constant dense<0.000000e+00> : vector<64x128xf32>
    %63 = tpu.matmul %61, %62, %cst_21 {dimension_numbers = #tpu.dot_dimension_numbers<[1], [0], [0], [1], [0, 0, 1, 1], [], []>} : vector<64x768xf32>, vector<768x128xf32>, vector<64x128xf32> -> vector<64x128xf32>
    %c0_22 = arith.constant 0 : index
    %c0_23 = arith.constant 0 : index
    %64 = vector.load %arg13[%c0_22, %c0_23] : memref<8x64xf32, #tpu.memory_space<vmem>>, vector<8x64xf32>
    %cst_24 = arith.constant dense<0.000000e+00> : vector<8x128xf32>
    %65 = tpu.matmul %64, %63, %cst_24 {dimension_numbers = #tpu.dot_dimension_numbers<[1], [0], [0], [1], [0, 0, 1, 1], [], []>} : vector<8x64xf32>, vector<64x128xf32>, vector<8x128xf32> -> vector<8x128xf32>
    %c0_25 = arith.constant 0 : index
    %c0_26 = arith.constant 0 : index
    %66 = vector.load %arg7[%c0_25, %c0_26] : memref<1x128xf32, #tpu.memory_space<vmem>>, vector<1x128xf32>
    %67 = vector.broadcast %66 : vector<1x128xf32> to vector<8x128xf32>
    %68 = arith.addf %65, %67 : vector<8x128xf32>
    %cst_27 = arith.constant 0.000000e+00 : f32
    %69 = vector.broadcast %cst_27 : f32 to vector<8x128xf32>
    %70 = arith.maximumf %68, %69 : vector<8x128xf32>
    %c0_28 = arith.constant 0 : index
    %c0_29 = arith.constant 0 : index
    %71 = vector.load %arg8[%c0_28, %c0_29] : memref<128x128xf32, #tpu.memory_space<vmem>>, vector<128x128xf32>
    %cst_30 = arith.constant dense<0.000000e+00> : vector<8x128xf32>
    %72 = tpu.matmul %70, %71, %cst_30 {dimension_numbers = #tpu.dot_dimension_numbers<[1], [0], [0], [1], [0, 0, 1, 1], [], []>} : vector<8x128xf32>, vector<128x128xf32>, vector<8x128xf32> -> vector<8x128xf32>
    %c0_31 = arith.constant 0 : index
    %c0_32 = arith.constant 0 : index
    %73 = vector.load %arg9[%c0_31, %c0_32] : memref<1x128xf32, #tpu.memory_space<vmem>>, vector<1x128xf32>
    %74 = vector.broadcast %73 : vector<1x128xf32> to vector<8x128xf32>
    %75 = arith.addf %72, %74 : vector<8x128xf32>
    %cst_33 = arith.constant 0.000000e+00 : f32
    %76 = vector.broadcast %cst_33 : f32 to vector<8x128xf32>
    %77 = arith.maximumf %75, %76 : vector<8x128xf32>
    %c0_34 = arith.constant 0 : index
    %c0_35 = arith.constant 0 : index
    %78 = vector.load %arg10[%c0_34, %c0_35] : memref<128x128xf32, #tpu.memory_space<vmem>>, vector<128x128xf32>
    %cst_36 = arith.constant dense<0.000000e+00> : vector<8x128xf32>
    %79 = tpu.matmul %77, %78, %cst_36 {dimension_numbers = #tpu.dot_dimension_numbers<[1], [0], [0], [1], [0, 0, 1, 1], [], []>} : vector<8x128xf32>, vector<128x128xf32>, vector<8x128xf32> -> vector<8x128xf32>
    %c0_37 = arith.constant 0 : index
    %c0_38 = arith.constant 0 : index
    %80 = vector.load %arg11[%c0_37, %c0_38] : memref<1x128xf32, #tpu.memory_space<vmem>>, vector<1x128xf32>
    %81 = vector.broadcast %80 : vector<1x128xf32> to vector<8x128xf32>
    %82 = arith.addf %79, %81 : vector<8x128xf32>
    %c0_39 = arith.constant 0 : index
    %c0_40 = arith.constant 0 : index
    %83 = vector.load %arg14[%c0_39, %c0_40] : memref<8x128xf32, #tpu.memory_space<vmem>>, vector<8x128xf32>
    tpu.vector_store %arg14[%c0_39, %c0_40], %82 {strides = array<i32>} : memref<8x128xf32, #tpu.memory_space<vmem>>, vector<8x128xf32>,
    return
  }
  func.func @transform_0(%arg0: i32) -> (i32, i32) {
    %c0_i32 = arith.constant 0 : i32
    %c0_i32_0 = arith.constant 0 : i32
    return %arg0, %c0_i32 : i32, i32
  }
  func.func @transform_1(%arg0: i32) -> (i32, i32) {
    %c0_i32 = arith.constant 0 : i32
    %c0_i32_0 = arith.constant 0 : i32
    %c0_i32_1 = arith.constant 0 : i32
    return %c0_i32, %c0_i32_0 : i32, i32
  }
  func.func @transform_2(%arg0: i32) -> (i32, i32) {
    %c0_i32 = arith.constant 0 : i32
    %c0_i32_0 = arith.constant 0 : i32
    %c0_i32_1 = arith.constant 0 : i32
    return %c0_i32, %c0_i32_0 : i32, i32
  }
  func.func @transform_3(%arg0: i32) -> (i32, i32) {
    %c0_i32 = arith.constant 0 : i32
    %c0_i32_0 = arith.constant 0 : i32
    %c0_i32_1 = arith.constant 0 : i32
    return %c0_i32, %c0_i32_0 : i32, i32
  }
  func.func @transform_4(%arg0: i32) -> (i32, i32) {
    %c0_i32 = arith.constant 0 : i32
    %c0_i32_0 = arith.constant 0 : i32
    %c0_i32_1 = arith.constant 0 : i32
    return %c0_i32, %c0_i32_0 : i32, i32
  }
  func.func @transform_5(%arg0: i32) -> (i32, i32) {
    %c0_i32 = arith.constant 0 : i32
    %c0_i32_0 = arith.constant 0 : i32
    %c0_i32_1 = arith.constant 0 : i32
    return %c0_i32, %c0_i32_0 : i32, i32
  }
  func.func @transform_6(%arg0: i32) -> (i32, i32) {
    %c0_i32 = arith.constant 0 : i32
    %c0_i32_0 = arith.constant 0 : i32
    %c0_i32_1 = arith.constant 0 : i32
    return %c0_i32, %c0_i32_0 : i32, i32
  }
  func.func @transform_7(%arg0: i32) -> (i32, i32) {
    %c0_i32 = arith.constant 0 : i32
    %c0_i32_0 = arith.constant 0 : i32
    %c0_i32_1 = arith.constant 0 : i32
    return %c0_i32, %c0_i32_0 : i32, i32
  }
  func.func @transform_8(%arg0: i32) -> (i32, i32) {
    %c0_i32 = arith.constant 0 : i32
    %c0_i32_0 = arith.constant 0 : i32
    %c0_i32_1 = arith.constant 0 : i32
    return %c0_i32, %c0_i32_0 : i32, i32
  }
  func.func @transform_9(%arg0: i32) -> (i32, i32) {
    %c0_i32 = arith.constant 0 : i32
    %c0_i32_0 = arith.constant 0 : i32
    %c0_i32_1 = arith.constant 0 : i32
    return %c0_i32, %c0_i32_0 : i32, i32
  }
  func.func @transform_10(%arg0: i32) -> (i32, i32) {
    %c0_i32 = arith.constant 0 : i32
    %c0_i32_0 = arith.constant 0 : i32
    %c0_i32_1 = arith.constant 0 : i32
    return %c0_i32, %c0_i32_0 : i32, i32
  }
  func.func @transform_11(%arg0: i32) -> (i32, i32) {
    %c0_i32 = arith.constant 0 : i32
    %c0_i32_0 = arith.constant 0 : i32
    %c0_i32_1 = arith.constant 0 : i32
    return %c0_i32, %c0_i32_0 : i32, i32
  }
  func.func @transform_12(%arg0: i32) -> (i32, i32) {
    %c0_i32 = arith.constant 0 : i32
    %c0_i32_0 = arith.constant 0 : i32
    %c0_i32_1 = arith.constant 0 : i32
    return %c0_i32, %c0_i32_0 : i32, i32
  }
  func.func @transform_13(%arg0: i32) -> (i32, i32) {
    %c0_i32 = arith.constant 0 : i32
    %c0_i32_0 = arith.constant 0 : i32
    return %arg0, %c0_i32 : i32, i32
  }
}

</mosaic_0001>

<bundles_post_ra>
// kernel: net_forward.1
= control target key start
LH: loop header
LB: loop body
LE: loop exit
PB: predicated region body
PF: predicated region fallthrough
CT: control target
= control target key end

     0   :  { %s7228_s0 = inlined_call_operand.vmem [shape: f32[128,192], index: 0, kind: input, shape index: {}]   ;;  %s7229_s1 = inlined_call_operand.vmem [shape: f32[192,1024], index: 1, kind: input, shape index: {}]   ;;  %s7230_s2 = inlined_call_operand.vmem [shape: f32[1,1024], index: 2, kind: input, shape index: {}]   ;;  %s7231_s3 = inlined_call_operand.vmem [shape: f32[512,512], index: 3, kind: input, shape index: {}]   ;;  %s7232_s4 = inlined_call_operand.vmem [shape: f32[1,512], index: 4, kind: input, shape index: {}]   ;;  %s7233_s5 = inlined_call_operand.hbm [shape: f32[768,128], index: 5, kind: input, shape index: {}]   ;;  %s7234_s6 = inlined_call_operand.vmem [shape: f32[1,128], index: 6, kind: input, shape index: {}]   ;;  %s7235_s7 = inlined_call_operand.vmem [shape: f32[128,128], index: 7, kind: input, shape index: {}]   ;;  %s7236_s8 = inlined_call_operand.vmem [shape: f32[1,128], index: 8, kind: input, shape index: {}]   ;;  %s7237_s9 = inlined_call_operand.vmem [shape: f32[128,128], index: 9, kind: input, shape index: {}]   ;;  %s7238_s10 = inlined_call_operand.vmem [shape: f32[1,128], index: 10, kind: input, shape index: {}]   ;;  %s7239_s11 = inlined_call_operand.vmem [shape: f32[64,6], index: 11, kind: input, shape index: {}]   ;;  %s7240_s12 = inlined_call_operand.vmem [shape: f32[8,64], index: 12, kind: input, shape index: {}]   ;;  %s7241_s13 = inlined_call_operand.hbm [shape: f32[16,128], index: 13, kind: output, shape index: {}]  }
   0x1   :  { %7263 = sst [smem:[#allocation30_spill]] %s7233_s5 }
   0x2   :  { %18 = vsyncpa [#allocation4], 0 }
   0x3   :  { %19 = vsyncpa [#allocation5], 0 }
   0x4   :  { %21 = vsyncpa [#allocation5 + $0x1], 0  ;;  %s4512_s25 = smov 0   ;;  %s4514_s26 = smov 0  }
   0x5   :  { %s4516_s27 = smov 0   ;;  %s4518_s28 = smov 0  }
   0x6 LB: > { %7264 = sst [smem:[#allocation9_spill]] %s4423_s27  ;;  %s4533_s29 = sadd.s32 4294967295, %s4427_s28   ;;  %s4427_s28 = sphi %s4518_s28, %s7351_s28   ;;  %s4423_s27 = sphi %s4516_s27, %s7353_s27   ;;  %s4419_s26 = sphi %s4514_s26, %s7355_s26   ;;  %s4415_s25 = sphi %s4512_s25, %s7354_s25  }
   0x7   : > { %s3211_s30 = sadd.s32 4294967294, %s4427_s28   ;;  %s4537_s14 = sadd.s32 1, %s4427_s28  }
   0x8   : > { %7265 = sst [smem:[#allocation10_spill]] %s4537_s14  ;;  %s312_s15 = sadd.s32 1, %s4423_s27 }
   0x9   : > { %s309_s16 = ssub.s32 %s4427_s28, %s4537_s14  ;;  %p322_p0 = scmp.ne.s32.totalorder %s4423_s27, %s4419_s26 }
   0xa   : > { %p310_p1 = scmp.eq.s32.totalorder %s309_s16, 0  ;;  %p323_p2 = scmp.eq.s32.totalorder %s4533_s29, 1 }
   0xb   : > { %p328_p3 = scmp.ne.s32.totalorder %s4419_s26, %s4415_s25  ;;  %p329_p4 = scmp.eq.s32.totalorder %s3211_s30, 1 }
   0xc   : > { %s4548_s17 = scalar_select %p310_p1, %s4423_s27, %s312_s15  }
   0xd   : > { %p4550_p5 = por %p323_p2, %p322_p0  ;;  %p4554_p6 = por %p329_p4, %p328_p3 }
   0xe   : > { %7266 = sst [smem:[#allocation11_spill]] %s4548_s17  ;;  %p3212_p7 = scmp.ge.s32.totalorder %s4427_s28, 1 }
   0xf   : > { %s7267_s18 = scalar_select %p4550_p5, 1, 0 }
  0x10   : > { %s7268_s19 = scalar_select %p4554_p6, 1, 0 }
  0x11   : > { %p336_p8 = scmp.lt.s32.totalorder %s4427_s28, 3  ;;  %p7245_p9 = scmp.eq.s32.totalorder %s4533_s29, 0 }
  0x12   : > { %s4429_s21 = smov [#allocation3]   ;;  %s7271_s5 = sld [smem:[#allocation30_spill]] }
  0x13   : > { %p4561_p10 = pnand %p3212_p7, %p336_p8  ;;  %s360_s22 = sshll.u32 %s4429_s21, 4  ;;  %s361_s22 = int_to_ptr.vmem [resolvable:$true] %s360_s22 }
  0x15   : > { %s7269_s20 = scalar_select %p4561_p10, 1, 0 }
  0x16   : > { %p4236_p11 = pneg %p4561_p10 }
  0x18   : > { %p4569_p12 = pnand %p7245_p9, %p4236_p11  ;;  %s4333_s15 = scalar_lea.hbm %s7271_s5, 12288 }
  0x19   : > { %p4334_p13 = scmp.ne.s32.totalorder %s7271_s5, %s4333_s15  ;;  %p4340_p3 = scmp.lt.u32.totalorder %s4333_s15, %s7271_s5 }
  0x1a   : > { %p4335_p0 = pneg %p4569_p12 }
  0x1c   : > { %p4336_p1 = pnand %p4335_p0, %p4334_p13 }
  0x1e   : > { %p4337_p2 = pneg %p4336_p1 }
  0x20   : > { %p4342_p4 = pnand %p4340_p3, %p4337_p2 }
  0x22   : > { %4345 = shalt.err (!%p4342_p4)
}
  0x23   : > { %s4346_s14 = scalar_lea.vmem %s361_s22, 12288  ;;  %p4354_p9 = scmp.lt.s32.totalorder %s361_s22, %s361_s22 }
  0x24   : > { %p4347_p7 = scmp.ne.s32.totalorder %s361_s22, %s4346_s14  ;;  %p4355_p6 = scmp.lt.s32.totalorder %s4346_s14, %s4346_s14 }
  0x26   : > { %p4349_p8 = pnand %p4347_p7, %p4335_p0  ;;  %p4356_p5 = por %p4355_p6, %p4354_p9 }
  0x28   : > { %p4350_p11 = pneg %p4349_p8 }
  0x2a   : > { %p4357_p10 = pnand %p4356_p5, %p4350_p11 }
  0x2c   : > { %4360 = shalt.err (!%p4357_p10)
}
  0x2d   : > { %s4430_s17 = smov 128   ;;  %s4431_s24 = smov 8  }
  0x2e   : > { %4239 = dma.hbm_to_vmem [thread:$0]  (!%p4569_p12), %s7271_s5, 12288, %s361_s22, [#allocation4], %s4430_s17, %s4430_s17, %s4431_s24  }
  0x2f   : > { %p7272_p13 = scmp.ne.s32.totalorder %s7269_s20, 0 }
  0x31   : > { %407 = sbr.rel (%p7272_p13) target bundleno = 1623 (0x657), region = 72 }
  0x38   : > { %p7273_p1 = scmp.eq.s32.totalorder %s4533_s29, 0 }
  0x3a   : > { %4406 = dma.done.wait (%p7273_p1), [#allocation4], 12288   ;;  %p7274_p0 = pmov %p7273_p1 }
  0x3b   : > { %v476_v0 = vld [vmem:[%s7229_s1 + $0x8] sm:$0xff]  ;;  %v478_v2 = vld [vmem:[%s7229_s1 + $0x18] sm:$0xff]  ;;  %v475_v5 = vld [vmem:[%s7229_s1] sm:$0xff]  ;;  %s3218_s24 = sshll.u32 %s4533_s29, 3  ;;  %vm709_vm0 = vcmask 523264   ;;  %vm1352_vm1 = vcmask 1046528  }
  0x3c   : > { %4408 = vsyncadd (%p7274_p0), [#allocation4], 4294955008  ;;  %v484_v1 = vld [vmem:[%s7229_s1 + $0x48] sm:$0xff]  ;;  %v486_v4 = vld [vmem:[%s7229_s1 + $0x58] sm:$0xff]  ;;  %p4748_p5 = scmp.lt.s32.totalorder %s3218_s24, 15  ;;  %vm4440_vm2 = vmmov 0  }
  0x3d   : > { %v3562_v3 = vpack.c.bf16 %v484_v1, %v476_v0  ;;  %v483_v6 = vld [vmem:[%s7229_s1 + $0x40] sm:$0xff]  ;;  %v3610_v7 = vpack.c.bf16 %v486_v4, %v478_v2  ;;  %v477_v9 = vld [vmem:[%s7229_s1 + $0x10] sm:$0xff]  ;;  %v492_v11 = vld [vmem:[%s7229_s1 + $0x88] sm:$0xff]  ;;  %s449_s5 = sand.u32 1, %s4419_s26   ;;  %s3258_s20 = sshll.u32 %s4533_s29, 7 }
  0x3e   : > { %v3564_v8 = vpack.c.bf16 %v483_v6, %v475_v5  ;;  %v485_v10 = vld [vmem:[%s7229_s1 + $0x50] sm:$0xff]  ;;  %v500_v13 = vld [vmem:[%s7229_s1 + $0xc8] sm:$0xff]  ;;  %v494_v14 = vld [vmem:[%s7229_s1 + $0x98] sm:$0xff]  ;;  %s7357_s24 = smov (!%p4748_p5, %s3218_s24), 15  ;;  %s3217_s21 = sshll.u32 %s449_s5, 3 }
  0x3f   : > { %3563 = vmatprep.subr.bf16.mxu0 %v3562_v3  ;;  %v3612_v12 = vpack.c.bf16 %v485_v10, %v477_v9  ;;  %v502_v15 = vld [vmem:[%s7229_s1 + $0xd8] sm:$0xff]  ;;  %3611 = vmatprep.subr.bf16.mxu1 %v3610_v7  ;;  %v3566_v16 = vpack.c.bf16 %v500_v13, %v492_v11  ;;  %v491_v18 = vld [vmem:[%s7229_s1 + $0x80] sm:$0xff]  ;;  %v493_v20 = vld [vmem:[%s7229_s1 + $0x90] sm:$0xff]  ;;  %s3261_s14 = sshll.u32 %s7357_s24, 4  ;;  %s451_s22 = scalar_lea.vmem [#allocation6], %s3217_s21 }
  0x40   : > { %3565 = vmatpush1.bf16.msra.mxu0 %v3564_v8  ;;  %v3614_v17 = vpack.c.bf16 %v502_v15, %v494_v14  ;;  %v499_v19 = vld [vmem:[%s7229_s1 + $0xc0] sm:$0xff]  ;;  %v501_v22 = vld [vmem:[%s7229_s1 + $0xd0] sm:$0xff]  ;;  %v508_v23 = vld [vmem:[%s7229_s1 + $0x108] sm:$0xff]  ;;  %s4825_s15 = scalar_lea.vmem %s7228_s0, %s3261_s14  ;;  %s7186_s16 = scalar_lea.hbm %s7241_s13, %s3258_s20 }
  0x41   : > { %3613 = vmatpush1.bf16.msra.mxu1 %v3612_v12  ;;  %v3568_v21 = vpack.c.bf16 %v499_v19, %v491_v18  ;;  %v516_v24 = vld [vmem:[%s7229_s1 + $0x148] sm:$0xff]  ;;  %3567 = vmatprep.subr.bf16.mxu0 %v3566_v16  ;;  %v3616_v25 = vpack.c.bf16 %v501_v22, %v493_v20  ;;  %v510_v27 = vld [vmem:[%s7229_s1 + $0x118] sm:$0xff]  ;;  %v507_v29 = vld [vmem:[%s7229_s1 + $0x100] sm:$0xff]  ;;  %s3127_s14 = scalar_lea.sflag [#allocation5], %s449_s5  ;;  %p7349_p9 = scmp.ne.s32.totalorder %s7267_s18, 0 }
  0x42   : > { %3615 = vmatprep.subr.bf16.mxu1 %v3614_v17  ;;  %v3570_v26 = vpack.c.bf16 %v516_v24, %v508_v23  ;;  %v518_v28 = vld [vmem:[%s7229_s1 + $0x158] sm:$0xff]  ;;  %v515_v31 = vld [vmem:[%s7229_s1 + $0x140] sm:$0xff]  ;;  %v509_v32 = vld [vmem:[%s7229_s1 + $0x110] sm:$0xff]  ;;  %s4441_s29 = smov [#allocation6]  }
  0x43   : > { %v3618_v30 = vpack.c.bf16 %v518_v28, %v510_v27  ;;  %v517_v33 = vld [vmem:[%s7229_s1 + $0x150] sm:$0xff]  ;;  %v3572_v34 = vpack.c.bf16 %v515_v31, %v507_v29  ;;  %v524_v35 = vld [vmem:[%s7229_s1 + $0x188] sm:$0xff]  ;;  %v526_v37 = vld [vmem:[%s7229_s1 + $0x198] sm:$0xff]  ;;  %s4365_s21 = sshll.u32 %s4441_s29, 4  ;;  %s4366_s21 = int_to_ptr.vmem [resolvable:$false] %s4365_s21 }
  0x44   : > { %3569 = vmatpush1.bf16.msra.mxu0 %v3568_v21  ;;  %v532_v36 = vld [vmem:[%s7229_s1 + $0x1c8] sm:$0xff]  ;;  %v3620_v38 = vpack.c.bf16 %v517_v33, %v509_v32  ;;  %v534_v40 = vld [vmem:[%s7229_s1 + $0x1d8] sm:$0xff]  ;;  %v523_v41 = vld [vmem:[%s7229_s1 + $0x180] sm:$0xff]  ;;  %s4367_s23 = scalar_lea.vmem %s4366_s21, 256 }
  0x45   : > { %3617 = vmatpush1.bf16.msra.mxu1 %v3616_v25  ;;  %3571 = vmatprep.subr.bf16.mxu0 %v3570_v26  ;;  %v3574_v39 = vpack.c.bf16 %v532_v36, %v524_v35  ;;  %v531_v42 = vld [vmem:[%s7229_s1 + $0x1c0] sm:$0xff]  ;;  %v3622_v43 = vpack.c.bf16 %v534_v40, %v526_v37  ;;  %v525_v44 = vld [vmem:[%s7229_s1 + $0x190] sm:$0xff]  ;;  %v540_v46 = vld [vmem:[%s7229_s1 + $0x208] sm:$0xff] }
  0x46   : > { %3619 = vmatprep.subr.bf16.mxu1 %v3618_v30  ;;  %v533_v45 = vld [vmem:[%s7229_s1 + $0x1d0] sm:$0xff]  ;;  %v548_v47 = vld [vmem:[%s7229_s1 + $0x248] sm:$0xff]  ;;  %v542_v48 = vld [vmem:[%s7229_s1 + $0x218] sm:$0xff]  ;;  %v3576_v50 = vpack.c.bf16 %v531_v42, %v523_v41 }
  0x47   : > { %v550_v49 = vld [vmem:[%s7229_s1 + $0x258] sm:$0xff]  ;;  %v3624_v51 = vpack.c.bf16 %v533_v45, %v525_v44  ;;  %v3578_v52 = vpack.c.bf16 %v548_v47, %v540_v46  ;;  %v539_v53 = vld [vmem:[%s7229_s1 + $0x200] sm:$0xff]  ;;  %v541_v55 = vld [vmem:[%s7229_s1 + $0x210] sm:$0xff] }
  0x48   : > { %3573 = vmatpush1.bf16.msra.mxu0 %v3572_v34  ;;  %v547_v54 = vld [vmem:[%s7229_s1 + $0x240] sm:$0xff]  ;;  %v3626_v56 = vpack.c.bf16 %v550_v49, %v542_v48  ;;  %v549_v57 = vld [vmem:[%s7229_s1 + $0x250] sm:$0xff]  ;;  %v556_v58 = vld [vmem:[%s7229_s1 + $0x288] sm:$0xff] }
  0x49   : > { %3621 = vmatpush1.bf16.msra.mxu1 %v3620_v38  ;;  %3575 = vmatprep.subr.bf16.mxu0 %v3574_v39  ;;  %v564_v59 = vld [vmem:[%s7229_s1 + $0x2c8] sm:$0xff]  ;;  %v558_v60 = vld [vmem:[%s7229_s1 + $0x298] sm:$0xff]  ;;  %v3580_v62 = vpack.c.bf16 %v547_v54, %v539_v53  ;;  %v3628_v63 = vpack.c.bf16 %v549_v57, %v541_v55  ;;  %v555_v1 = vld [vmem:[%s7229_s1 + $0x280] sm:$0xff] }
  0x4a   : > { %3623 = vmatprep.subr.bf16.mxu1 %v3622_v43  ;;  %v566_v61 = vld [vmem:[%s7229_s1 + $0x2d8] sm:$0xff]  ;;  %v3582_v0 = vpack.c.bf16 %v564_v59, %v556_v58  ;;  %v563_v2 = vld [vmem:[%s7229_s1 + $0x2c0] sm:$0xff]  ;;  %v557_v3 = vld [vmem:[%s7229_s1 + $0x290] sm:$0xff] }
  0x4b   : > { %v3630_v4 = vpack.c.bf16 %v566_v61, %v558_v60  ;;  %v565_v5 = vld [vmem:[%s7229_s1 + $0x2d0] sm:$0xff]  ;;  %v572_v6 = vld [vmem:[%s7229_s1 + $0x308] sm:$0xff]  ;;  %v574_v8 = vld [vmem:[%s7229_s1 + $0x318] sm:$0xff]  ;;  %v3584_v10 = vpack.c.bf16 %v563_v2, %v555_v1 }
  0x4c   : > { %3577 = vmatpush1.bf16.msra.mxu0 %v3576_v50  ;;  %v580_v7 = vld [vmem:[%s7229_s1 + $0x348] sm:$0xff]  ;;  %v582_v9 = vld [vmem:[%s7229_s1 + $0x358] sm:$0xff]  ;;  %v3632_v11 = vpack.c.bf16 %v565_v5, %v557_v3  ;;  %v571_v13 = vld [vmem:[%s7229_s1 + $0x300] sm:$0xff] }
  0x4d   : > { %3625 = vmatpush1.bf16.msra.mxu1 %v3624_v51  ;;  %3579 = vmatprep.subr.bf16.mxu0 %v3578_v52  ;;  %v3586_v12 = vpack.c.bf16 %v580_v7, %v572_v6  ;;  %v579_v14 = vld [vmem:[%s7229_s1 + $0x340] sm:$0xff]  ;;  %v573_v15 = vld [vmem:[%s7229_s1 + $0x310] sm:$0xff]  ;;  %v3634_v16 = vpack.c.bf16 %v582_v9, %v574_v8  ;;  %v588_v18 = vld [vmem:[%s7229_s1 + $0x388] sm:$0xff] }
  0x4e   : > { %3627 = vmatprep.subr.bf16.mxu1 %v3626_v56  ;;  %v581_v17 = vld [vmem:[%s7229_s1 + $0x350] sm:$0xff]  ;;  %v596_v19 = vld [vmem:[%s7229_s1 + $0x3c8] sm:$0xff]  ;;  %v590_v20 = vld [vmem:[%s7229_s1 + $0x398] sm:$0xff]  ;;  %v3588_v22 = vpack.c.bf16 %v579_v14, %v571_v13 }
  0x4f   : > { %v598_v21 = vld [vmem:[%s7229_s1 + $0x3d8] sm:$0xff]  ;;  %v3636_v23 = vpack.c.bf16 %v581_v17, %v573_v15  ;;  %v3590_v24 = vpack.c.bf16 %v596_v19, %v588_v18  ;;  %v587_v25 = vld [vmem:[%s7229_s1 + $0x380] sm:$0xff]  ;;  %v589_v27 = vld [vmem:[%s7229_s1 + $0x390] sm:$0xff] }
  0x50   : > { %3581 = vmatpush1.bf16.msra.mxu0 %v3580_v62  ;;  %v595_v26 = vld [vmem:[%s7229_s1 + $0x3c0] sm:$0xff]  ;;  %v3638_v28 = vpack.c.bf16 %v598_v21, %v590_v20  ;;  %v597_v29 = vld [vmem:[%s7229_s1 + $0x3d0] sm:$0xff]  ;;  %v604_v30 = vld [vmem:[%s7229_s1 + $0x408] sm:$0xff] }
  0x51   : > { %3629 = vmatpush1.bf16.msra.mxu1 %v3628_v63  ;;  %3583 = vmatprep.subr.bf16.mxu0 %v3582_v0  ;;  %v612_v31 = vld [vmem:[%s7229_s1 + $0x448] sm:$0xff]  ;;  %v606_v32 = vld [vmem:[%s7229_s1 + $0x418] sm:$0xff]  ;;  %v3592_v34 = vpack.c.bf16 %v595_v26, %v587_v25  ;;  %v3640_v35 = vpack.c.bf16 %v597_v29, %v589_v27  ;;  %v603_v37 = vld [vmem:[%s7229_s1 + $0x400] sm:$0xff] }
  0x52   : > { %3631 = vmatprep.subr.bf16.mxu1 %v3630_v4  ;;  %v614_v33 = vld [vmem:[%s7229_s1 + $0x458] sm:$0xff]  ;;  %v3594_v36 = vpack.c.bf16 %v612_v31, %v604_v30  ;;  %v611_v38 = vld [vmem:[%s7229_s1 + $0x440] sm:$0xff]  ;;  %v605_v39 = vld [vmem:[%s7229_s1 + $0x410] sm:$0xff] }
  0x53   : > { %v3642_v40 = vpack.c.bf16 %v614_v33, %v606_v32  ;;  %v613_v41 = vld [vmem:[%s7229_s1 + $0x450] sm:$0xff]  ;;  %v620_v42 = vld [vmem:[%s7229_s1 + $0x488] sm:$0xff]  ;;  %v622_v44 = vld [vmem:[%s7229_s1 + $0x498] sm:$0xff]  ;;  %v3596_v46 = vpack.c.bf16 %v611_v38, %v603_v37 }
  0x54   : > { %3585 = vmatpush1.bf16.msra.mxu0 %v3584_v10  ;;  %v628_v43 = vld [vmem:[%s7229_s1 + $0x4c8] sm:$0xff]  ;;  %v630_v45 = vld [vmem:[%s7229_s1 + $0x4d8] sm:$0xff]  ;;  %v3644_v48 = vpack.c.bf16 %v613_v41, %v605_v39  ;;  %v619_v50 = vld [vmem:[%s7229_s1 + $0x480] sm:$0xff] }
  0x55   : > { %3633 = vmatpush1.bf16.msra.mxu1 %v3632_v11  ;;  %3587 = vmatprep.subr.bf16.mxu0 %v3586_v12  ;;  %v4843_v47 = vld [vmem:[%s4825_s15 + $0x8] sm:$0xff]  ;;  %v3598_v49 = vpack.c.bf16 %v628_v43, %v620_v42  ;;  %v627_v51 = vld [vmem:[%s7229_s1 + $0x4c0] sm:$0xff]  ;;  %v621_v52 = vld [vmem:[%s7229_s1 + $0x490] sm:$0xff]  ;;  %v3646_v53 = vpack.c.bf16 %v630_v45, %v622_v44 }
  0x56   : > { %3635 = vmatprep.subr.bf16.mxu1 %v3634_v16  ;;  %v629_v54 = vld [vmem:[%s7229_s1 + $0x4d0] sm:$0xff]  ;;  %v636_v55 = vld [vmem:[%s7229_s1 + $0x508] sm:$0xff]  ;;  %3221 = vmatprep.mubr.msk.f32.mxu0 %vm709_vm0, %v4843_v47  ;;  %v638_v57 = vld [vmem:[%s7229_s1 + $0x518] sm:$0xff]  ;;  %v3600_v59 = vpack.c.bf16 %v627_v51, %v619_v50 }
  0x57   : > { %v644_v56 = vld [vmem:[%s7229_s1 + $0x548] sm:$0xff]  ;;  %v646_v58 = vld [vmem:[%s7229_s1 + $0x558] sm:$0xff]  ;;  %3229 = vmatprep.mubr.msk.f32.mxu1 %vm709_vm0, %v4843_v47  ;;  %v3648_v60 = vpack.c.bf16 %v629_v54, %v621_v52  ;;  %v635_v62 = vld [vmem:[%s7229_s1 + $0x500] sm:$0xff] }
  0x58   : > { %3589 = vmatpush1.bf16.msra.mxu0 %v3588_v22  ;;  %v3602_v61 = vpack.c.bf16 %v644_v56, %v636_v55  ;;  %v643_v63 = vld [vmem:[%s7229_s1 + $0x540] sm:$0xff]  ;;  %v637_v0 = vld [vmem:[%s7229_s1 + $0x510] sm:$0xff]  ;;  %v3650_v1 = vpack.c.bf16 %v646_v58, %v638_v57  ;;  %v652_v3 = vld [vmem:[%s7229_s1 + $0x588] sm:$0xff] }
  0x59   : > { %3637 = vmatpush1.bf16.msra.mxu1 %v3636_v23  ;;  %3591 = vmatprep.subr.bf16.mxu0 %v3590_v24  ;;  %v645_v2 = vld [vmem:[%s7229_s1 + $0x550] sm:$0xff]  ;;  %v660_v4 = vld [vmem:[%s7229_s1 + $0x5c8] sm:$0xff]  ;;  %v654_v5 = vld [vmem:[%s7229_s1 + $0x598] sm:$0xff]  ;;  %v3604_v7 = vpack.c.bf16 %v643_v63, %v635_v62 }
  0x5a   : > { %3639 = vmatprep.subr.bf16.mxu1 %v3638_v28  ;;  %v662_v6 = vld [vmem:[%s7229_s1 + $0x5d8] sm:$0xff]  ;;  %v3652_v8 = vpack.c.bf16 %v645_v2, %v637_v0  ;;  %v3606_v9 = vpack.c.bf16 %v660_v4, %v652_v3  ;;  %v651_v10 = vld [vmem:[%s7229_s1 + $0x580] sm:$0xff]  ;;  %v653_v12 = vld [vmem:[%s7229_s1 + $0x590] sm:$0xff] }
  0x5b   : > { %v659_v11 = vld [vmem:[%s7229_s1 + $0x5c0] sm:$0xff]  ;;  %v3654_v13 = vpack.c.bf16 %v662_v6, %v654_v5  ;;  %v661_v14 = vld [vmem:[%s7229_s1 + $0x5d0] sm:$0xff]  ;;  %v480_v15 = vld [vmem:[%s7229_s1 + $0x28] sm:$0xff] }
  0x5c   : > { %3593 = vmatpush1.bf16.msra.mxu0 %v3592_v34  ;;  %v488_v16 = vld [vmem:[%s7229_s1 + $0x68] sm:$0xff]  ;;  %v482_v17 = vld [vmem:[%s7229_s1 + $0x38] sm:$0xff]  ;;  %v3608_v19 = vpack.c.bf16 %v659_v11, %v651_v10  ;;  %v3656_v20 = vpack.c.bf16 %v661_v14, %v653_v12  ;;  %v479_v22 = vld [vmem:[%s7229_s1 + $0x20] sm:$0xff] }
  0x5d   : > { %3641 = vmatpush1.bf16.msra.mxu1 %v3640_v35  ;;  %3595 = vmatprep.subr.bf16.mxu0 %v3594_v36  ;;  %v490_v18 = vld [vmem:[%s7229_s1 + $0x78] sm:$0xff]  ;;  %v3658_v21 = vpack.c.bf16 %v488_v16, %v480_v15  ;;  %v487_v23 = vld [vmem:[%s7229_s1 + $0x60] sm:$0xff]  ;;  %v481_v25 = vld [vmem:[%s7229_s1 + $0x30] sm:$0xff] }
  0x5e   : > { %3643 = vmatprep.subr.bf16.mxu1 %v3642_v40  ;;  %v3706_v24 = vpack.c.bf16 %v490_v18, %v482_v17  ;;  %v489_v26 = vld [vmem:[%s7229_s1 + $0x70] sm:$0xff]  ;;  %v4934_v27 = vld [vmem:[%s4825_s15] sm:$0xff]  ;;  %v496_v28 = vld [vmem:[%s7229_s1 + $0xa8] sm:$0xff]  ;;  %v3660_v30 = vpack.c.bf16 %v487_v23, %v479_v22 }
  0x5f   : > { %v504_v29 = vld [vmem:[%s7229_s1 + $0xe8] sm:$0xff]  ;;  %v4943_v31 = vld [vmem:[%s4825_s15 + $0x18] sm:$0xff]  ;;  %v3708_v34 = vpack.c.bf16 %v489_v26, %v481_v25  ;;  %v495_v35 = vld [vmem:[%s7229_s1 + $0xa0] sm:$0xff] }
  0x60   : > { %3597 = vmatpush1.bf16.msra.mxu0 %v3596_v46  ;;  %v498_v32 = vld [vmem:[%s7229_s1 + $0xb8] sm:$0xff]  ;;  %v503_v36 = vld [vmem:[%s7229_s1 + $0xe0] sm:$0xff]  ;;  %v497_v37 = vld [vmem:[%s7229_s1 + $0xb0] sm:$0xff]  ;;  %v3662_v38 = vpack.c.bf16 %v504_v29, %v496_v28 }
  0x61   : > { %3645 = vmatpush1.bf16.msra.mxu1 %v3644_v48  ;;  %3599 = vmatprep.subr.bf16.mxu0 %v3598_v49  ;;  %v506_v33 = vld [vmem:[%s7229_s1 + $0xf8] sm:$0xff]  ;;  %v505_v39 = vld [vmem:[%s7229_s1 + $0xf0] sm:$0xff]  ;;  %v512_v40 = vld [vmem:[%s7229_s1 + $0x128] sm:$0xff]  ;;  %v3664_v46 = vpack.c.bf16 %v503_v36, %v495_v35 }
  0x62   : > { %3647 = vmatprep.subr.bf16.mxu1 %v3646_v53  ;;  %v520_v41 = vld [vmem:[%s7229_s1 + $0x168] sm:$0xff]  ;;  %v3710_v42 = vpack.c.bf16 %v506_v33, %v498_v32  ;;  %v514_v43 = vld [vmem:[%s7229_s1 + $0x138] sm:$0xff]  ;;  %v4978_v45 = vld [vmem:[%s4825_s15 + $0x10] sm:$0xff]  ;;  %v3712_v48 = vpack.c.bf16 %v505_v39, %v497_v37 }
  0x63   : > { %v522_v44 = vld [vmem:[%s7229_s1 + $0x178] sm:$0xff]  ;;  %v3666_v49 = vpack.c.bf16 %v520_v41, %v512_v40  ;;  %v511_v50 = vld [vmem:[%s7229_s1 + $0x120] sm:$0xff]  ;;  %v513_v52 = vld [vmem:[%s7229_s1 + $0x130] sm:$0xff] }
  0x64   : > { %3601 = vmatpush1.bf16.msra.mxu0 %v3600_v59  ;;  %v519_v51 = vld [vmem:[%s7229_s1 + $0x160] sm:$0xff]  ;;  %v3714_v53 = vpack.c.bf16 %v522_v44, %v514_v43  ;;  %v521_v54 = vld [vmem:[%s7229_s1 + $0x170] sm:$0xff]  ;;  %v528_v55 = vld [vmem:[%s7229_s1 + $0x1a8] sm:$0xff] }
  0x65   : > { %3649 = vmatpush1.bf16.msra.mxu1 %v3648_v60  ;;  %3603 = vmatprep.subr.bf16.mxu0 %v3602_v61  ;;  %v536_v56 = vld [vmem:[%s7229_s1 + $0x1e8] sm:$0xff]  ;;  %v530_v57 = vld [vmem:[%s7229_s1 + $0x1b8] sm:$0xff]  ;;  %v3668_v60 = vpack.c.bf16 %v519_v51, %v511_v50  ;;  %v5014_v61 = vld [vmem:[%s4825_s15 + $0x20] sm:$0xff]  ;;  %v3716_v62 = vpack.c.bf16 %v521_v54, %v513_v52 }
  0x66   : > { %3651 = vmatprep.subr.bf16.mxu1 %v3650_v1  ;;  %v538_v58 = vld [vmem:[%s7229_s1 + $0x1f8] sm:$0xff]  ;;  %v5010_v59 = vld [vmem:[%s4825_s15 + $0x28] sm:$0xff]  ;;  %v3670_v63 = vpack.c.bf16 %v536_v56, %v528_v55  ;;  %v527_v0 = vld [vmem:[%s7229_s1 + $0x1a0] sm:$0xff] }
  0x67   : > { %v535_v1 = vld [vmem:[%s7229_s1 + $0x1e0] sm:$0xff]  ;;  %v529_v2 = vld [vmem:[%s7229_s1 + $0x1b0] sm:$0xff]  ;;  %v3718_v3 = vpack.c.bf16 %v538_v58, %v530_v57  ;;  %v544_v5 = vld [vmem:[%s7229_s1 + $0x228] sm:$0xff] }
  0x68   : > { %3605 = vmatpush1.bf16.msra.mxu0 %v3604_v7  ;;  %v537_v4 = vld [vmem:[%s7229_s1 + $0x1f0] sm:$0xff]  ;;  %v552_v6 = vld [vmem:[%s7229_s1 + $0x268] sm:$0xff]  ;;  %v546_v7 = vld [vmem:[%s7229_s1 + $0x238] sm:$0xff]  ;;  %v3672_v10 = vpack.c.bf16 %v535_v1, %v527_v0 }
  0x69   : > { %3653 = vmatpush1.bf16.msra.mxu1 %v3652_v8  ;;  %3607 = vmatprep.subr.bf16.mxu0 %v3606_v9  ;;  %v554_v8 = vld [vmem:[%s7229_s1 + $0x278] sm:$0xff]  ;;  %v5050_v11 = vld [vmem:[%s4825_s15 + $0x30] sm:$0xff]  ;;  %v3720_v12 = vpack.c.bf16 %v537_v4, %v529_v2  ;;  %v543_v14 = vld [vmem:[%s7229_s1 + $0x220] sm:$0xff] }
  0x6a   : > { %3655 = vmatprep.subr.bf16.mxu1 %v3654_v13  ;;  %v5046_v9 = vld [vmem:[%s4825_s15 + $0x38] sm:$0xff]  ;;  %v3674_v13 = vpack.c.bf16 %v552_v6, %v544_v5  ;;  %v551_v15 = vld [vmem:[%s7229_s1 + $0x260] sm:$0xff]  ;;  %v545_v16 = vld [vmem:[%s7229_s1 + $0x230] sm:$0xff]  ;;  %v3722_v17 = vpack.c.bf16 %v554_v8, %v546_v7 }
  0x6b   : > { %v553_v18 = vld [vmem:[%s7229_s1 + $0x270] sm:$0xff]  ;;  %v570_v22 = vld [vmem:[%s7229_s1 + $0x2f8] sm:$0xff]  ;;  %v5082_v23 = vld [vmem:[%s4825_s15 + $0x48] sm:$0xff] }
  0x6c   : > { %3609 = vmatpush1.bf16.msra.mxu0 %v3608_v19  ;;  %v560_v19 = vld [vmem:[%s7229_s1 + $0x2a8] sm:$0xff]  ;;  %v5086_v25 = vld [vmem:[%s4825_s15 + $0x40] sm:$0xff]  ;;  %v3724_v26 = vpack.c.bf16 %v553_v18, %v545_v16  ;;  %v561_v32 = vld [vmem:[%s7229_s1 + $0x2b0] sm:$0xff] }
  0x6d   : > { %3657 = vmatpush1.bf16.msra.mxu1 %v3656_v20  ;;  %3659 = vmatprep.subr.bf16.mxu0 %v3658_v21  ;;  %v568_v20 = vld [vmem:[%s7229_s1 + $0x2e8] sm:$0xff]  ;;  %v562_v21 = vld [vmem:[%s7229_s1 + $0x2b8] sm:$0xff]  ;;  %v559_v29 = vld [vmem:[%s7229_s1 + $0x2a0] sm:$0xff] }
  0x6e   : > { %3707 = vmatprep.subr.bf16.mxu1 %v3706_v24  ;;  %v3676_v24 = vpack.c.bf16 %v551_v15, %v543_v14  ;;  %v3678_v28 = vpack.c.bf16 %v568_v20, %v560_v19  ;;  %v3726_v33 = vpack.c.bf16 %v570_v22, %v562_v21  ;;  %v576_v35 = vld [vmem:[%s7229_s1 + $0x328] sm:$0xff]  ;;  %v578_v37 = vld [vmem:[%s7229_s1 + $0x338] sm:$0xff]  ;;  %v5122_v41 = vld [vmem:[%s4825_s15 + $0x50] sm:$0xff] }
  0x6f   : > { %799 = vmatmul.mubr.f32.vlgmr.msra.gmra.mrb[0].mxu0 %v4934_v27  ;;  %v584_v36 = vld [vmem:[%s7229_s1 + $0x368] sm:$0xff]  ;;  %v5118_v39 = vld [vmem:[%s4825_s15 + $0x58] sm:$0xff]  ;;  %v575_v44 = vld [vmem:[%s7229_s1 + $0x320] sm:$0xff] }
  0x70   : > { %912 = vmatmul.mubr.f32.vlgmr.msra.gmra.mrb[0].mxu1 %v4934_v27  ;;  %3661 = vmatpush1.bf16.msra.mxu0 %v3660_v30  ;;  %v567_v30 = vld [vmem:[%s7229_s1 + $0x2e0] sm:$0xff]  ;;  %v3682_v43 = vpack.c.bf16 %v584_v36, %v576_v35  ;;  %v585_v50 = vld [vmem:[%s7229_s1 + $0x370] sm:$0xff]  ;;  %v592_v51 = vld [vmem:[%s7229_s1 + $0x3a8] sm:$0xff] }
  0x71   : > { %3709 = vmatpush1.bf16.msra.mxu1 %v3708_v34  ;;  %3222 = vmatprep.mubr.msk.f32.mxu0 %vm709_vm0, %v4943_v31  ;;  %v569_v34 = vld [vmem:[%s7229_s1 + $0x2f0] sm:$0xff]  ;;  %v3680_v40 = vpack.c.bf16 %v567_v30, %v559_v29  ;;  %v600_v52 = vld [vmem:[%s7229_s1 + $0x3e8] sm:$0xff]  ;;  %v602_v54 = vld [vmem:[%s7229_s1 + $0x3f8] sm:$0xff] }
  0x72   : > { %3230 = vmatprep.mubr.msk.f32.mxu1 %vm709_vm0, %v4943_v31  ;;  %3663 = vmatprep.subr.bf16.mxu0 %v3662_v38  ;;  %v586_v38 = vld [vmem:[%s7229_s1 + $0x378] sm:$0xff]  ;;  %v5154_v55 = vld [vmem:[%s4825_s15 + $0x68] sm:$0xff]  ;;  %v5158_v57 = vld [vmem:[%s4825_s15 + $0x60] sm:$0xff] }
  0x73   : > { %805 = vmatmul.mubr.f32.gmra.mrb[2].mxu0 %v4978_v45  ;;  %3711 = vmatprep.subr.bf16.mxu1 %v3710_v42  ;;  %v3728_v42 = vpack.c.bf16 %v569_v34, %v561_v32  ;;  %v593_v0 = vld [vmem:[%s7229_s1 + $0x3b0] sm:$0xff]  ;;  %v616_v4 = vld [vmem:[%s7229_s1 + $0x468] sm:$0xff]  ;;  %v610_v5 = vld [vmem:[%s7229_s1 + $0x438] sm:$0xff] }
  0x74   : > { %918 = vmatmul.mubr.f32.gmra.mrb[2].mxu1 %v4978_v45  ;;  %3665 = vmatpush1.bf16.msra.mxu0 %v3664_v46  ;;  %v583_v46 = vld [vmem:[%s7229_s1 + $0x360] sm:$0xff]  ;;  %v601_v2 = vld [vmem:[%s7229_s1 + $0x3f0] sm:$0xff]  ;;  %v618_v6 = vld [vmem:[%s7229_s1 + $0x478] sm:$0xff] }
  0x75   : > { %3713 = vmatpush1.bf16.msra.mxu1 %v3712_v48  ;;  %3667 = vmatprep.subr.bf16.mxu0 %v3666_v49  ;;  %v577_v48 = vld [vmem:[%s7229_s1 + $0x330] sm:$0xff]  ;;  %v3730_v49 = vpack.c.bf16 %v586_v38, %v578_v37  ;;  %v3684_v56 = vpack.c.bf16 %v583_v46, %v575_v44  ;;  %v5190_v7 = vld [vmem:[%s4825_s15 + $0x78] sm:$0xff]  ;;  %v607_v14 = vld [vmem:[%s7229_s1 + $0x420] sm:$0xff] }
  0x76   : > { %3715 = vmatprep.subr.bf16.mxu1 %v3714_v53  ;;  %3223 = vmatprep.mubr.msk.f32.mxu0 %vm709_vm0, %v5010_v59  ;;  %v594_v53 = vld [vmem:[%s7229_s1 + $0x3b8] sm:$0xff]  ;;  %v3732_v58 = vpack.c.bf16 %v585_v50, %v577_v48  ;;  %v615_v15 = vld [vmem:[%s7229_s1 + $0x460] sm:$0xff]  ;;  %v609_v16 = vld [vmem:[%s7229_s1 + $0x430] sm:$0xff] }
  0x77   : > { %3231 = vmatprep.mubr.msk.f32.mxu1 %vm709_vm0, %v5010_v59  ;;  %811 = vmatmul.mubr.f32.gmra.mrb[4].mxu0 %v5014_v61  ;;  %v3734_v1 = vpack.c.bf16 %v602_v54, %v594_v53  ;;  %v617_v18 = vld [vmem:[%s7229_s1 + $0x470] sm:$0xff]  ;;  %v624_v19 = vld [vmem:[%s7229_s1 + $0x4a8] sm:$0xff]  ;;  %v626_v21 = vld [vmem:[%s7229_s1 + $0x4b8] sm:$0xff] }
  0x78   : > { %3669 = vmatpush1.bf16.msra.mxu0 %v3668_v60  ;;  %924 = vmatmul.mubr.f32.gmra.mrb[4].mxu1 %v5014_v61  ;;  %v3686_v60 = vpack.c.bf16 %v600_v52, %v592_v51  ;;  %v632_v20 = vld [vmem:[%s7229_s1 + $0x4e8] sm:$0xff]  ;;  %v634_v22 = vld [vmem:[%s7229_s1 + $0x4f8] sm:$0xff]  ;;  %v623_v29 = vld [vmem:[%s7229_s1 + $0x4a0] sm:$0xff] }
  0x79   : > { %3717 = vmatpush1.bf16.msra.mxu1 %v3716_v62  ;;  %3671 = vmatprep.subr.bf16.mxu0 %v3670_v63  ;;  %v591_v62 = vld [vmem:[%s7229_s1 + $0x3a0] sm:$0xff]  ;;  %v625_v32 = vld [vmem:[%s7229_s1 + $0x4b0] sm:$0xff]  ;;  %v640_v35 = vld [vmem:[%s7229_s1 + $0x528] sm:$0xff] }
  0x7a   : > { %3719 = vmatprep.subr.bf16.mxu1 %v3718_v3  ;;  %3224 = vmatprep.mubr.msk.f32.mxu0 %vm709_vm0, %v5046_v9  ;;  %v599_v63 = vld [vmem:[%s7229_s1 + $0x3e0] sm:$0xff]  ;;  %v608_v3 = vld [vmem:[%s7229_s1 + $0x428] sm:$0xff]  ;;  %v633_v34 = vld [vmem:[%s7229_s1 + $0x4f0] sm:$0xff] }
  0x7b   : > { %3232 = vmatprep.mubr.msk.f32.mxu1 %vm709_vm0, %v5046_v9  ;;  %817 = vmatmul.mubr.f32.gmra.mrb[6].mxu0 %v5050_v11  ;;  %v3688_v8 = vpack.c.bf16 %v599_v63, %v591_v62  ;;  %v631_v30 = vld [vmem:[%s7229_s1 + $0x4e0] sm:$0xff]  ;;  %v648_v36 = vld [vmem:[%s7229_s1 + $0x568] sm:$0xff]  ;;  %v642_v37 = vld [vmem:[%s7229_s1 + $0x538] sm:$0xff] }
  0x7c   : > { %3673 = vmatpush1.bf16.msra.mxu0 %v3672_v10  ;;  %930 = vmatmul.mubr.f32.gmra.mrb[6].mxu1 %v5050_v11  ;;  %v5194_v10 = vld [vmem:[%s4825_s15 + $0x70] sm:$0xff]  ;;  %v650_v38 = vld [vmem:[%s7229_s1 + $0x578] sm:$0xff]  ;;  %v639_v44 = vld [vmem:[%s7229_s1 + $0x520] sm:$0xff]  ;;  %s3140_s15 = sshll.u32 %s451_s22, 4  ;;  %s7188_s15 = int_to_ptr.vmem [resolvable:$true] %s3140_s15 }
  0x7d   : > { %3721 = vmatpush1.bf16.msra.mxu1 %v3720_v12  ;;  %3675 = vmatprep.subr.bf16.mxu0 %v3674_v13  ;;  %v3736_v12 = vpack.c.bf16 %v601_v2, %v593_v0  ;;  %v3690_v13 = vpack.c.bf16 %v616_v4, %v608_v3  ;;  %v647_v46 = vld [vmem:[%s7229_s1 + $0x560] sm:$0xff]  ;;  %v641_v48 = vld [vmem:[%s7229_s1 + $0x530] sm:$0xff]  ;;  %v656_v50 = vld [vmem:[%s7229_s1 + $0x5a8] sm:$0xff]  ;;  %s4361_s27 = scalar_lea.vmem %s7188_s15, 128  ;;  %p4368_p2 = scmp.lt.s32.totalorder %s7188_s15, %s4366_s21 }
  0x7e   : > { %3723 = vmatprep.subr.bf16.mxu1 %v3722_v17  ;;  %3225 = vmatprep.mubr.msk.f32.mxu0 %vm709_vm0, %v5082_v23  ;;  %v3738_v17 = vpack.c.bf16 %v618_v6, %v610_v5  ;;  %v664_v51 = vld [vmem:[%s7229_s1 + $0x5e8] sm:$0xff]  ;;  %v658_v52 = vld [vmem:[%s7229_s1 + $0x5b8] sm:$0xff]  ;;  %v3700_v54 = vpack.c.bf16 %v647_v46, %v639_v44  ;;  %v663_v62 = vld [vmem:[%s7229_s1 + $0x5e0] sm:$0xff]  ;;  %p4362_p6 = scmp.ne.s32.totalorder %s7188_s15, %s4361_s27  ;;  %p4369_p3 = scmp.lt.s32.totalorder %s4367_s23, %s4361_s27 }
  0x7f   : > { %3233 = vmatprep.mubr.msk.f32.mxu1 %vm709_vm0, %v5082_v23  ;;  %823 = vmatmul.mubr.f32.gmra.mrb[8].mxu0 %v5086_v25  ;;  %v666_v53 = vld [vmem:[%s7229_s1 + $0x5f8] sm:$0xff]  ;;  %v657_v63 = vld [vmem:[%s7229_s1 + $0x5b0] sm:$0xff]  ;;  %v1404_v2 = vld [vmem:[%s7231_s3 + $0x8] sm:$0xff] }
  0x80   : > { %3677 = vmatpush1.bf16.msra.mxu0 %v3676_v24  ;;  %936 = vmatmul.mubr.f32.gmra.mrb[8].mxu1 %v5086_v25  ;;  %v3692_v24 = vpack.c.bf16 %v615_v15, %v607_v14  ;;  %v3750_v0 = vpack.c.bf16 %v666_v53, %v658_v52  ;;  %v1408_v3 = vld [vmem:[%s7231_s3 + $0x28] sm:$0xff]  ;;  %v1406_v4 = vld [vmem:[%s7231_s3 + $0x18] sm:$0xff]  ;;  %v1403_v14 = vld [vmem:[%s7231_s3] sm:$0xff]  ;;  %p4363_p10 = pnand %p4362_p6, %p7349_p9  ;;  %p4370_p4 = por %p4369_p3, %p4368_p2 }
  0x81   : > { %3725 = vmatpush1.bf16.msra.mxu1 %v3724_v26  ;;  %3679 = vmatprep.subr.bf16.mxu0 %v3678_v28  ;;  %v3740_v26 = vpack.c.bf16 %v617_v18, %v609_v16  ;;  %v3694_v28 = vpack.c.bf16 %v632_v20, %v624_v19  ;;  %v1410_v5 = vld [vmem:[%s7231_s3 + $0x38] sm:$0xff]  ;;  %v1407_v15 = vld [vmem:[%s7231_s3 + $0x20] sm:$0xff]  ;;  %v1405_v16 = vld [vmem:[%s7231_s3 + $0x10] sm:$0xff] }
  0x82   : > { %3727 = vmatprep.subr.bf16.mxu1 %v3726_v33  ;;  %3226 = vmatprep.mubr.msk.f32.mxu0 %vm709_vm0, %v5118_v39  ;;  %v3742_v33 = vpack.c.bf16 %v634_v22, %v626_v21  ;;  %v1412_v18 = vld [vmem:[%s7231_s3 + $0x48] sm:$0xff]  ;;  %v1414_v20 = vld [vmem:[%s7231_s3 + $0x58] sm:$0xff]  ;;  %v3756_v22 = vpack.c.bf16 %v1407_v15, %v1403_v14  ;;  %v1429_v44 = vld [vmem:[%s7231_s3 + $0xd0] sm:$0xff]  ;;  %p4364_p12 = pneg %p4363_p10 }
  0x83   : > { %3234 = vmatprep.mubr.msk.f32.mxu1 %vm709_vm0, %v5118_v39  ;;  %829 = vmatmul.mubr.f32.gmra.mrb[10].mxu0 %v5122_v41  ;;  %v1416_v19 = vld [vmem:[%s7231_s3 + $0x68] sm:$0xff]  ;;  %v1418_v21 = vld [vmem:[%s7231_s3 + $0x78] sm:$0xff]  ;;  %v1433_v46 = vld [vmem:[%s7231_s3 + $0xf0] sm:$0xff] }
  0x84   : > { %3681 = vmatpush1.bf16.msra.mxu0 %v3680_v40  ;;  %942 = vmatmul.mubr.f32.gmra.mrb[10].mxu1 %v5122_v41  ;;  %v3696_v40 = vpack.c.bf16 %v631_v30, %v623_v29  ;;  %v1415_v29 = vld [vmem:[%s7231_s3 + $0x60] sm:$0xff]  ;;  %v3886_v30 = vpack.c.bf16 %v1418_v21, %v1414_v20  ;;  %v1442_v52 = vld [vmem:[%s7231_s3 + $0x138] sm:$0xff]  ;;  %v1449_v14 = vld [vmem:[%s7231_s3 + $0x170] sm:$0xff]  ;;  %p4371_p7 = pnand %p4370_p4, %p4364_p12 }
  0x85   : > { %3729 = vmatpush1.bf16.msra.mxu1 %v3728_v42  ;;  %3683 = vmatprep.subr.bf16.mxu0 %v3682_v43  ;;  %v3744_v42 = vpack.c.bf16 %v633_v34, %v625_v32  ;;  %v3698_v43 = vpack.c.bf16 %v648_v36, %v640_v35  ;;  %v1413_v32 = vld [vmem:[%s7231_s3 + $0x50] sm:$0xff]  ;;  %v1435_v53 = vld [vmem:[%s7231_s3 + $0x100] sm:$0xff]  ;;  %v1452_v15 = vld [vmem:[%s7231_s3 + $0x188] sm:$0xff] }
  0x86   : > { %3731 = vmatprep.subr.bf16.mxu1 %v3730_v49  ;;  %3227 = vmatprep.mubr.msk.f32.mxu0 %vm709_vm0, %v5154_v55  ;;  %v649_v49 = vld [vmem:[%s7229_s1 + $0x570] sm:$0xff] }
  0x87   : > { %3235 = vmatprep.mubr.msk.f32.mxu1 %vm709_vm0, %v5154_v55  ;;  %835 = vmatmul.mubr.f32.gmra.mrb[12].mxu0 %v5158_v57 }
  0x88   : > { %3685 = vmatpush1.bf16.msra.mxu0 %v3684_v56  ;;  %948 = vmatmul.mubr.f32.gmra.mrb[12].mxu1 %v5158_v57  ;;  %v3748_v56 = vpack.c.bf16 %v649_v49, %v641_v48  ;;  %v3896_v48 = vpack.c.bf16 %v1433_v46, %v1429_v44  ;;  %v1440_v49 = vld [vmem:[%s7231_s3 + $0x128] sm:$0xff]  ;;  %v1482_v46 = vld [vmem:[%s7231_s3 + $0x278] sm:$0xff] }
  0x89   : > { %3733 = vmatpush1.bf16.msra.mxu1 %v3732_v58  ;;  %3687 = vmatprep.subr.bf16.mxu0 %v3686_v60  ;;  %v3702_v58 = vpack.c.bf16 %v664_v51, %v656_v50  ;;  %v655_v60 = vld [vmem:[%s7229_s1 + $0x5a0] sm:$0xff]  ;;  %v1438_v50 = vld [vmem:[%s7231_s3 + $0x118] sm:$0xff] }
  0x8a   : > { %3735 = vmatprep.subr.bf16.mxu1 %v3734_v1  ;;  %3228 = vmatprep.mubr.msk.f32.mxu0 %vm709_vm0, %v5190_v7  ;;  %v665_v1 = vld [vmem:[%s7229_s1 + $0x5f0] sm:$0xff]  ;;  %v3704_v6 = vpack.c.bf16 %v663_v62, %v655_v60 }
  0x8b   : > { %3236 = vmatprep.mubr.msk.f32.mxu1 %vm709_vm0, %v5190_v7  ;;  %841 = vmatmul.mubr.f32.gmra.mrb[14].mxu0 %v5194_v10  ;;  %v1437_v60 = vld [vmem:[%s7231_s3 + $0x110] sm:$0xff] }
  0x8c   : > { %3689 = vmatpush1.bf16.msra.mxu0 %v3688_v8  ;;  %954 = vmatmul.mubr.f32.gmra.mrb[14].mxu1 %v5194_v10  ;;  %v3752_v8 = vpack.c.bf16 %v665_v1, %v657_v63  ;;  %v1441_v62 = vld [vmem:[%s7231_s3 + $0x130] sm:$0xff]  ;;  %v1448_v1 = vld [vmem:[%s7231_s3 + $0x168] sm:$0xff] }
  0x8d   : > { %3737 = vmatpush1.bf16.msra.mxu1 %v3736_v12  ;;  %3691 = vmatprep.subr.bf16.mxu0 %v3690_v13  ;;  %v3754_v12 = vpack.c.bf16 %v1408_v3, %v1404_v2  ;;  %v3882_v13 = vpack.c.bf16 %v1410_v5, %v1406_v4  ;;  %v3900_v63 = vpack.c.bf16 %v1441_v62, %v1437_v60  ;;  %v1446_v2 = vld [vmem:[%s7231_s3 + $0x158] sm:$0xff]  ;;  %v1443_v5 = vld [vmem:[%s7231_s3 + $0x140] sm:$0xff] }
  0x8e   : > { %3739 = vmatprep.subr.bf16.mxu1 %v3738_v17  ;;  %3237 = vmatprep.mubr.msk.f32.mxu0 %vm709_vm0, %v4843_v47  ;;  %v1409_v17 = vld [vmem:[%s7231_s3 + $0x30] sm:$0xff]  ;;  %v1450_v4 = vld [vmem:[%s7231_s3 + $0x178] sm:$0xff] }
  0x8f   : > { %3245 = vmatprep.mubr.msk.f32.mxu1 %vm709_vm0, %v4843_v47  ;;  %v3746_v47 = vpack.c.bf16 %v650_v38, %v642_v37  ;;  %v1434_v37 = vld [vmem:[%s7231_s3 + $0xf8] sm:$0xff]  ;;  %v1427_v38 = vld [vmem:[%s7231_s3 + $0xc0] sm:$0xff] }
  0x90   : > { %3693 = vmatpush1.bf16.msra.mxu0 %v3692_v24  ;;  %v3884_v24 = vpack.c.bf16 %v1409_v17, %v1405_v16  ;;  %v1456_v17 = vld [vmem:[%s7231_s3 + $0x1a8] sm:$0xff]  ;;  %v1490_v62 = vld [vmem:[%s7231_s3 + $0x2b8] sm:$0xff] }
  0x91   : > { %3741 = vmatpush1.bf16.msra.mxu1 %v3740_v26  ;;  %3695 = vmatprep.subr.bf16.mxu0 %v3694_v28  ;;  %v3758_v26 = vpack.c.bf16 %v1416_v19, %v1412_v18  ;;  %v1411_v28 = vld [vmem:[%s7231_s3 + $0x40] sm:$0xff]  ;;  %v1454_v18 = vld [vmem:[%s7231_s3 + $0x198] sm:$0xff]  ;;  %v3778_v20 = vpack.c.bf16 %v1456_v17, %v1452_v15 }
  0x92   : > { %3743 = vmatprep.subr.bf16.mxu1 %v3742_v33  ;;  %v1417_v33 = vld [vmem:[%s7231_s3 + $0x70] sm:$0xff]  ;;  %v3760_v34 = vpack.c.bf16 %v1415_v29, %v1411_v28  ;;  %v1458_v19 = vld [vmem:[%s7231_s3 + $0x1b8] sm:$0xff]  ;;  %v1491_v17 = vld [vmem:[%s7231_s3 + $0x2c0] sm:$0xff] }
  0x93   : > { %v3888_v35 = vpack.c.bf16 %v1417_v33, %v1413_v32  ;;  %v3906_v21 = vpack.c.bf16 %v1458_v19, %v1454_v18  ;;  %v1457_v29 = vld [vmem:[%s7231_s3 + $0x1b0] sm:$0xff]  ;;  %v1464_v32 = vld [vmem:[%s7231_s3 + $0x1e8] sm:$0xff]  ;;  %v1495_v18 = vld [vmem:[%s7231_s3 + $0x2e0] sm:$0xff] }
  0x94   : > { %3697 = vmatpush1.bf16.msra.mxu0 %v3696_v40  ;;  %v1431_v40 = vld [vmem:[%s7231_s3 + $0xe0] sm:$0xff] }
  0x95   : > { %3745 = vmatpush1.bf16.msra.mxu1 %v3744_v42  ;;  %3699 = vmatprep.subr.bf16.mxu0 %v3698_v43  ;;  %v3768_v43 = vpack.c.bf16 %v1431_v40, %v1427_v38  ;;  %v1473_v38 = vld [vmem:[%s7231_s3 + $0x230] sm:$0xff]  ;;  %v1476_v40 = vld [vmem:[%s7231_s3 + $0x248] sm:$0xff] }
  0x96   : > { %3747 = vmatprep.subr.bf16.mxu1 %v3746_v47  ;;  %v1436_v47 = vld [vmem:[%s7231_s3 + $0x108] sm:$0xff] }
  0x97   : > { %v3770_v51 = vpack.c.bf16 %v1440_v49, %v1436_v47  ;;  %v1475_v49 = vld [vmem:[%s7231_s3 + $0x240] sm:$0xff] }
  0x98   : > { %3701 = vmatpush1.bf16.msra.mxu0 %v3700_v54  ;;  %v1439_v54 = vld [vmem:[%s7231_s3 + $0x120] sm:$0xff] }
  0x99   : > { %3749 = vmatpush1.bf16.msra.mxu1 %v3748_v56  ;;  %3703 = vmatprep.subr.bf16.mxu0 %v3702_v58  ;;  %v3898_v56 = vpack.c.bf16 %v1442_v52, %v1438_v50  ;;  %v3772_v58 = vpack.c.bf16 %v1439_v54, %v1435_v53  ;;  %v1479_v50 = vld [vmem:[%s7231_s3 + $0x260] sm:$0xff]  ;;  %v1477_v52 = vld [vmem:[%s7231_s3 + $0x250] sm:$0xff]  ;;  %v1484_v54 = vld [vmem:[%s7231_s3 + $0x288] sm:$0xff] }
  0x9a   : > { %3751 = vmatprep.subr.bf16.mxu1 %v3750_v0  ;;  %v1444_v0 = vld [vmem:[%s7231_s3 + $0x148] sm:$0xff]  ;;  %v1481_v53 = vld [vmem:[%s7231_s3 + $0x270] sm:$0xff]  ;;  %v3792_v60 = vpack.c.bf16 %v1479_v50, %v1475_v49 }
  0x9b   : > { %v3774_v3 = vpack.c.bf16 %v1448_v1, %v1444_v0  ;;  %v1483_v1 = vld [vmem:[%s7231_s3 + $0x280] sm:$0xff]  ;;  %v1517_v50 = vld [vmem:[%s7231_s3 + $0x390] sm:$0xff] }
  0x9c   : > { %3705 = vmatpush1.bf16.msra.mxu0 %v3704_v6  ;;  %v1447_v6 = vld [vmem:[%s7231_s3 + $0x160] sm:$0xff] }
  0x9d   : > { %3753 = vmatpush1.bf16.msra.mxu1 %v3752_v8  ;;  %3755 = vmatprep.subr.bf16.mxu0 %v3754_v12  ;;  %v3902_v8 = vpack.c.bf16 %v1450_v4, %v1446_v2  ;;  %v3776_v12 = vpack.c.bf16 %v1447_v6, %v1443_v5  ;;  %v1487_v2 = vld [vmem:[%s7231_s3 + $0x2a0] sm:$0xff]  ;;  %v1485_v4 = vld [vmem:[%s7231_s3 + $0x290] sm:$0xff]  ;;  %v1492_v6 = vld [vmem:[%s7231_s3 + $0x2c8] sm:$0xff] }
  0x9e   : > { %3883 = vmatprep.subr.bf16.mxu1 %v3882_v13  ;;  %v1445_v13 = vld [vmem:[%s7231_s3 + $0x150] sm:$0xff] }
  0x9f   : > { %1025 = vmatmul.mubr.f32.vlgmr.msra.gmra.mrb[16].mxu0 %v4934_v27  ;;  %v3904_v16 = vpack.c.bf16 %v1449_v14, %v1445_v13  ;;  %v1489_v5 = vld [vmem:[%s7231_s3 + $0x2b0] sm:$0xff]  ;;  %v3796_v13 = vpack.c.bf16 %v1487_v2, %v1483_v1  ;;  %v1498_v14 = vld [vmem:[%s7231_s3 + $0x2f8] sm:$0xff] }
  0xa0   : > { %1138 = vmatmul.mubr.f32.vlgmr.msra.gmra.mrb[16].mxu1 %v4934_v27  ;;  %3238 = vmatprep.mubr.msk.f32.mxu0 %vm709_vm0, %v4943_v31  ;;  %v1420_v27 = vld [vmem:[%s7231_s3 + $0x88] sm:$0xff]  ;;  %v3924_v15 = vpack.c.bf16 %v1489_v5, %v1485_v4  ;;  %v1525_v2 = vld [vmem:[%s7231_s3 + $0x3d0] sm:$0xff] }
  0xa1   : > { %3246 = vmatprep.mubr.msk.f32.mxu1 %vm709_vm0, %v4943_v31  ;;  %3757 = vmatpush1.bf16.msra.mxu0 %v3756_v22  ;;  %v1424_v31 = vld [vmem:[%s7231_s3 + $0xa8] sm:$0xff]  ;;  %v1451_v22 = vld [vmem:[%s7231_s3 + $0x180] sm:$0xff] }
  0xa2   : > { %3885 = vmatpush1.bf16.msra.mxu1 %v3884_v24  ;;  %3759 = vmatprep.subr.bf16.mxu0 %v3758_v26  ;;  %v1455_v24 = vld [vmem:[%s7231_s3 + $0x1a0] sm:$0xff]  ;;  %v1453_v26 = vld [vmem:[%s7231_s3 + $0x190] sm:$0xff]  ;;  %v1532_v5 = vld [vmem:[%s7231_s3 + $0x408] sm:$0xff] }
  0xa3   : > { %1031 = vmatmul.mubr.f32.gmra.mrb[18].mxu0 %v4978_v45  ;;  %3887 = vmatprep.subr.bf16.mxu1 %v3886_v30  ;;  %v3780_v28 = vpack.c.bf16 %v1455_v24, %v1451_v22  ;;  %v1460_v30 = vld [vmem:[%s7231_s3 + $0x1c8] sm:$0xff]  ;;  %v3908_v33 = vpack.c.bf16 %v1457_v29, %v1453_v26  ;;  %v1502_v26 = vld [vmem:[%s7231_s3 + $0x318] sm:$0xff] }
  0xa4   : > { %1144 = vmatmul.mubr.f32.gmra.mrb[18].mxu1 %v4978_v45  ;;  %3239 = vmatprep.mubr.msk.f32.mxu0 %vm709_vm0, %v5010_v59  ;;  %v1422_v45 = vld [vmem:[%s7231_s3 + $0x98] sm:$0xff]  ;;  %v1500_v22 = vld [vmem:[%s7231_s3 + $0x308] sm:$0xff] }
  0xa5   : > { %3247 = vmatprep.mubr.msk.f32.mxu1 %vm709_vm0, %v5010_v59  ;;  %3761 = vmatpush1.bf16.msra.mxu0 %v3760_v34  ;;  %v3762_v59 = vpack.c.bf16 %v1424_v31, %v1420_v27  ;;  %v3782_v34 = vpack.c.bf16 %v1464_v32, %v1460_v30  ;;  %v1466_v27 = vld [vmem:[%s7231_s3 + $0x1f8] sm:$0xff]  ;;  %v1459_v31 = vld [vmem:[%s7231_s3 + $0x1c0] sm:$0xff]  ;;  %v1504_v24 = vld [vmem:[%s7231_s3 + $0x328] sm:$0xff] }
  0xa6   : > { %3889 = vmatpush1.bf16.msra.mxu1 %v3888_v35  ;;  %v1462_v35 = vld [vmem:[%s7231_s3 + $0x1d8] sm:$0xff]  ;;  %v3802_v32 = vpack.c.bf16 %v1504_v24, %v1500_v22  ;;  %v5755_v24 = vld [vmem:[%s7230_s2] sm:$0xff] }
  0xa7   : > { %1037 = vmatmul.mubr.f32.gmra.mrb[20].mxu0 %v5014_v61  ;;  %3763 = vmatprep.subr.bf16.mxu0 %v3762_v59  ;;  %v1463_v59 = vld [vmem:[%s7231_s3 + $0x1e0] sm:$0xff]  ;;  %v1506_v29 = vld [vmem:[%s7231_s3 + $0x338] sm:$0xff] }
  0xa8   : > { %1150 = vmatmul.mubr.f32.gmra.mrb[20].mxu1 %v5014_v61  ;;  %3240 = vmatprep.mubr.msk.f32.mxu0 %vm709_vm0, %v5046_v9  ;;  %v1426_v61 = vld [vmem:[%s7231_s3 + $0xb8] sm:$0xff] }
  0xa9   : > { %3248 = vmatprep.mubr.msk.f32.mxu1 %vm709_vm0, %v5046_v9  ;;  %v1419_v9 = vld [vmem:[%s7231_s3 + $0x80] sm:$0xff]  ;;  %v5750_v22 = vld [vmem:[%s7239_s11 + $0x18] sm:$0xff] }
  0xab   : > { %1043 = vmatmul.mubr.f32.gmra.mrb[22].mxu0 %v5050_v11 }
  0xac   : > { %1156 = vmatmul.mubr.f32.gmra.mrb[22].mxu1 %v5050_v11  ;;  %3241 = vmatprep.mubr.msk.f32.mxu0 %vm709_vm0, %v5082_v23  ;;  %v1423_v11 = vld [vmem:[%s7231_s3 + $0xa0] sm:$0xff] }
  0xad   : > { %3249 = vmatprep.mubr.msk.f32.mxu1 %vm709_vm0, %v5082_v23  ;;  %v3890_v23 = vpack.c.bf16 %v1426_v61, %v1422_v45  ;;  %v3910_v45 = vpack.c.bf16 %v1466_v27, %v1462_v35  ;;  %v1461_v61 = vld [vmem:[%s7231_s3 + $0x1d0] sm:$0xff]  ;;  %v3930_v27 = vpack.c.bf16 %v1506_v29, %v1502_v26 }
  0xae   : > { %v1501_v35 = vld [vmem:[%s7231_s3 + $0x310] sm:$0xff] }
  0xaf   : > { %1049 = vmatmul.mubr.f32.gmra.mrb[24].mxu0 %v5086_v25  ;;  %3891 = vmatprep.subr.bf16.mxu1 %v3890_v23  ;;  %v1472_v23 = vld [vmem:[%s7231_s3 + $0x228] sm:$0xff] }
  0xb0   : > { %1162 = vmatmul.mubr.f32.gmra.mrb[24].mxu1 %v5086_v25  ;;  %3242 = vmatprep.mubr.msk.f32.mxu0 %vm709_vm0, %v5118_v39  ;;  %v3764_v25 = vpack.c.bf16 %v1423_v11, %v1419_v9  ;;  %v1465_v9 = vld [vmem:[%s7231_s3 + $0x1f0] sm:$0xff]  ;;  %v1468_v11 = vld [vmem:[%s7231_s3 + $0x208] sm:$0xff] }
  0xb1   : > { %3250 = vmatprep.mubr.msk.f32.mxu1 %vm709_vm0, %v5118_v39  ;;  %v1421_v39 = vld [vmem:[%s7231_s3 + $0x90] sm:$0xff] }
  0xb2   : > { %3765 = vmatpush1.bf16.msra.mxu0 %v3764_v25  ;;  %v1470_v25 = vld [vmem:[%s7231_s3 + $0x218] sm:$0xff] }
  0xb3   : > { %1055 = vmatmul.mubr.f32.gmra.mrb[26].mxu0 %v5122_v41 }
  0xb4   : > { %1168 = vmatmul.mubr.f32.gmra.mrb[26].mxu1 %v5122_v41  ;;  %3243 = vmatprep.mubr.msk.f32.mxu0 %vm709_vm0, %v5154_v55  ;;  %v1425_v41 = vld [vmem:[%s7231_s3 + $0xb0] sm:$0xff] }
  0xb5   : > { %3251 = vmatprep.mubr.msk.f32.mxu1 %vm709_vm0, %v5154_v55  ;;  %v3892_v55 = vpack.c.bf16 %v1425_v41, %v1421_v39  ;;  %v3784_v39 = vpack.c.bf16 %v1463_v59, %v1459_v31  ;;  %v1474_v41 = vld [vmem:[%s7231_s3 + $0x238] sm:$0xff]  ;;  %v1505_v31 = vld [vmem:[%s7231_s3 + $0x330] sm:$0xff]  ;;  %v1512_v59 = vld [vmem:[%s7231_s3 + $0x368] sm:$0xff] }
  0xb7   : > { %1061 = vmatmul.mubr.f32.gmra.mrb[28].mxu0 %v5158_v57  ;;  %3893 = vmatpush1.bf16.msra.mxu1 %v3892_v55  ;;  %v3912_v55 = vpack.c.bf16 %v1465_v9, %v1461_v61  ;;  %v1510_v61 = vld [vmem:[%s7231_s3 + $0x358] sm:$0xff] }
  0xb8   : > { %1174 = vmatmul.mubr.f32.gmra.mrb[28].mxu1 %v5158_v57  ;;  %3244 = vmatprep.mubr.msk.f32.mxu0 %vm709_vm0, %v5190_v7  ;;  %v1428_v57 = vld [vmem:[%s7231_s3 + $0xc8] sm:$0xff]  ;;  %v1514_v9 = vld [vmem:[%s7231_s3 + $0x378] sm:$0xff] }
  0xb9   : > { %3252 = vmatprep.mubr.msk.f32.mxu1 %vm709_vm0, %v5190_v7  ;;  %v1432_v7 = vld [vmem:[%s7231_s3 + $0xe8] sm:$0xff] }
  0xba   : > { %v3766_v36 = vpack.c.bf16 %v1432_v7, %v1428_v57  ;;  %v3786_v57 = vpack.c.bf16 %v1472_v23, %v1468_v11  ;;  %v1467_v7 = vld [vmem:[%s7231_s3 + $0x200] sm:$0xff]  ;;  %v3932_v23 = vpack.c.bf16 %v1505_v31, %v1501_v35 }
  0xbb   : > { %1067 = vmatmul.mubr.f32.gmra.mrb[30].mxu0 %v5194_v10 }
  0xbc   : > { %1180 = vmatmul.mubr.f32.gmra.mrb[30].mxu1 %v5194_v10  ;;  %v1430_v10 = vld [vmem:[%s7231_s3 + $0xd8] sm:$0xff]  ;;  %3767 = vmatprep.subr.bf16.mxu0 %v3766_v36  ;;  %v3914_v36 = vpack.c.bf16 %v1474_v41, %v1470_v25  ;;  %v1511_v41 = vld [vmem:[%s7231_s3 + $0x360] sm:$0xff] }
  0xbd   : > { %v3894_v42 = vpack.c.bf16 %v1434_v37, %v1430_v10  ;;  %3769 = vmatpush1.bf16.msra.mxu0 %v3768_v43  ;;  %v1471_v10 = vld [vmem:[%s7231_s3 + $0x220] sm:$0xff]  ;;  %v1469_v37 = vld [vmem:[%s7231_s3 + $0x210] sm:$0xff]  ;;  %v1478_v43 = vld [vmem:[%s7231_s3 + $0x258] sm:$0xff] }
  0xbe   : > { %3771 = vmatprep.subr.bf16.mxu0 %v3770_v51  ;;  %v3788_v44 = vpack.c.bf16 %v1471_v10, %v1467_v7  ;;  %v3918_v51 = vpack.c.bf16 %v1482_v46, %v1478_v43  ;;  %v1513_v7 = vld [vmem:[%s7231_s3 + $0x370] sm:$0xff]  ;;  %v1515_v46 = vld [vmem:[%s7231_s3 + $0x380] sm:$0xff] }
  0xbf   : > { %3895 = vmatprep.subr.bf16.mxu1 %v3894_v42  ;;  %v1480_v42 = vld [vmem:[%s7231_s3 + $0x268] sm:$0xff] }
  0xc0   : > { %3897 = vmatpush1.bf16.msra.mxu1 %v3896_v48  ;;  %v3916_v48 = vpack.c.bf16 %v1473_v38, %v1469_v37  ;;  %v3790_v47 = vpack.c.bf16 %v1480_v42, %v1476_v40  ;;  %v4432_v37 = vmov 0.0   ;;  %v1516_v38 = vld [vmem:[%s7231_s3 + $0x388] sm:$0xff]  ;;  %v1518_v42 = vld [vmem:[%s7231_s3 + $0x398] sm:$0xff] }
  0xc1   : > { %3899 = vmatprep.subr.bf16.mxu1 %v3898_v56  ;;  %3773 = vmatpush1.bf16.msra.mxu0 %v3772_v58  ;;  %v1488_v56 = vld [vmem:[%s7231_s3 + $0x2a8] sm:$0xff]  ;;  %v1486_v58 = vld [vmem:[%s7231_s3 + $0x298] sm:$0xff]  ;;  %1315 = vst [vmem:[#allocation2 + $0x88] sm:$0xff] %v4432_v37  ;;  %1314 = vst [vmem:[#allocation2 + $0x80] sm:$0xff] %v4432_v37 }
  0xc2   : > { %3775 = vmatprep.subr.bf16.mxu0 %v3774_v3  ;;  %v3794_v0 = vpack.c.bf16 %v1488_v56, %v1484_v54  ;;  %v3922_v3 = vpack.c.bf16 %v1490_v62, %v1486_v58  ;;  %v1520_v40 = vld [vmem:[%s7231_s3 + $0x3a8] sm:$0xff]  ;;  %v1526_v56 = vld [vmem:[%s7231_s3 + $0x3d8] sm:$0xff]  ;;  %v1523_v62 = vld [vmem:[%s7231_s3 + $0x3c0] sm:$0xff] }
  0xc3   : > { %v3810_v43 = vpack.c.bf16 %v1520_v40, %v1516_v38  ;;  %v1528_v54 = vld [vmem:[%s7231_s3 + $0x3e8] sm:$0xff]  ;;  %v5801_v38 = vld [vmem:[%s7239_s11 + $0x30] sm:$0xff] }
  0xc4   : > { %3901 = vmatpush1.bf16.msra.mxu1 %v3900_v63  ;;  %v3920_v63 = vpack.c.bf16 %v1481_v53, %v1477_v52  ;;  %v1524_v53 = vld [vmem:[%s7231_s3 + $0x3c8] sm:$0xff] }
  0xc5   : > { %3903 = vmatprep.subr.bf16.mxu1 %v3902_v8  ;;  %3777 = vmatpush1.bf16.msra.mxu0 %v3776_v12  ;;  %v1496_v8 = vld [vmem:[%s7231_s3 + $0x2e8] sm:$0xff]  ;;  %v1494_v12 = vld [vmem:[%s7231_s3 + $0x2d8] sm:$0xff]  ;;  %v3814_v58 = vpack.c.bf16 %v1528_v54, %v1524_v53 }
  0xc6   : > { %3779 = vmatprep.subr.bf16.mxu0 %v3778_v20  ;;  %v3926_v19 = vpack.c.bf16 %v1498_v14, %v1494_v12  ;;  %v1493_v20 = vld [vmem:[%s7231_s3 + $0x2d0] sm:$0xff] }
  0xc8   : > { %3905 = vmatpush1.bf16.msra.mxu1 %v3904_v16  ;;  %v3798_v16 = vpack.c.bf16 %v1496_v8, %v1492_v6  ;;  %v1536_v6 = vld [vmem:[%s7231_s3 + $0x428] sm:$0xff]  ;;  %v1534_v8 = vld [vmem:[%s7231_s3 + $0x418] sm:$0xff] }
  0xc9   : > { %3907 = vmatprep.subr.bf16.mxu1 %v3906_v21  ;;  %3781 = vmatpush1.bf16.msra.mxu0 %v3780_v28  ;;  %v1497_v21 = vld [vmem:[%s7231_s3 + $0x2f0] sm:$0xff]  ;;  %v3800_v28 = vpack.c.bf16 %v1495_v18, %v1491_v17  ;;  %v3818_v12 = vpack.c.bf16 %v1536_v6, %v1532_v5  ;;  %v669_v17 = vlaneseq  ;;  %v4434_v18 = vmov 0  }
  0xca   : > { %3783 = vmatprep.subr.bf16.mxu0 %v3782_v34  ;;  %v3928_v30 = vpack.c.bf16 %v1497_v21, %v1493_v20  ;;  %v1503_v34 = vld [vmem:[%s7231_s3 + $0x320] sm:$0xff]  ;;  %v5743_v20 = vld [vmem:[%s7239_s11 + $0x10] sm:$0xff] }
  0xcc   : > { %3909 = vmatpush1.bf16.msra.mxu1 %v3908_v33  ;;  %v1499_v33 = vld [vmem:[%s7231_s3 + $0x300] sm:$0xff] }
  0xcd   : > { %3911 = vmatprep.subr.bf16.mxu1 %v3910_v45  ;;  %3785 = vmatpush1.bf16.msra.mxu0 %v3784_v39  ;;  %v1508_v45 = vld [vmem:[%s7231_s3 + $0x348] sm:$0xff]  ;;  %v3804_v11 = vpack.c.bf16 %v1503_v34, %v1499_v33  ;;  %v1507_v39 = vld [vmem:[%s7231_s3 + $0x340] sm:$0xff] }
  0xce   : > { %3787 = vmatprep.subr.bf16.mxu0 %v3786_v57  ;;  %v3806_v25 = vpack.c.bf16 %v1512_v59, %v1508_v45  ;;  %v1509_v57 = vld [vmem:[%s7231_s3 + $0x350] sm:$0xff]  ;;  %v3808_v10 = vpack.c.bf16 %v1511_v41, %v1507_v39 }
  0xd0   : > { %3913 = vmatpush1.bf16.msra.mxu1 %v3912_v55  ;;  %v3934_v55 = vpack.c.bf16 %v1514_v9, %v1510_v61  ;;  %v5791_v61 = vld [vmem:[%s7239_s11 + $0x28] sm:$0xff] }
  0xd1   : > { %3915 = vmatprep.subr.bf16.mxu1 %v3914_v36  ;;  %3789 = vmatpush1.bf16.msra.mxu0 %v3788_v44  ;;  %v3936_v36 = vpack.c.bf16 %v1513_v7, %v1509_v57  ;;  %v1522_v44 = vld [vmem:[%s7231_s3 + $0x3b8] sm:$0xff] }
  0xd2   : > { %3791 = vmatprep.subr.bf16.mxu0 %v3790_v47  ;;  %v3938_v47 = vpack.c.bf16 %v1522_v44, %v1518_v42 }
  0xd4   : > { %3917 = vmatpush1.bf16.msra.mxu1 %v3916_v48  ;;  %v1519_v48 = vld [vmem:[%s7231_s3 + $0x3a0] sm:$0xff] }
  0xd5   : > { %3919 = vmatprep.subr.bf16.mxu1 %v3918_v51  ;;  %3793 = vmatpush1.bf16.msra.mxu0 %v3792_v60  ;;  %v3812_v49 = vpack.c.bf16 %v1519_v48, %v1515_v46  ;;  %v1521_v51 = vld [vmem:[%s7231_s3 + $0x3b0] sm:$0xff]  ;;  %v1530_v60 = vld [vmem:[%s7231_s3 + $0x3f8] sm:$0xff] }
  0xd6   : > { %3795 = vmatprep.subr.bf16.mxu0 %v3794_v0  ;;  %v3940_v52 = vpack.c.bf16 %v1521_v51, %v1517_v50  ;;  %v3942_v0 = vpack.c.bf16 %v1530_v60, %v1526_v56  ;;  %v5813_v60 = vld [vmem:[%s7239_s11 + $0x38] sm:$0xff] }
  0xd8   : > { %3921 = vmatpush1.bf16.msra.mxu1 %v3920_v63  ;;  %v1527_v63 = vld [vmem:[%s7231_s3 + $0x3e0] sm:$0xff] }
  0xd9   : > { %3923 = vmatprep.subr.bf16.mxu1 %v3922_v3  ;;  %3797 = vmatpush1.bf16.msra.mxu0 %v3796_v13  ;;  %v3816_v1 = vpack.c.bf16 %v1527_v63, %v1523_v62  ;;  %v1529_v3 = vld [vmem:[%s7231_s3 + $0x3f0] sm:$0xff]  ;;  %v1538_v13 = vld [vmem:[%s7231_s3 + $0x438] sm:$0xff] }
  0xda   : > { %3799 = vmatprep.subr.bf16.mxu0 %v3798_v16  ;;  %v3944_v4 = vpack.c.bf16 %v1529_v3, %v1525_v2  ;;  %v3946_v14 = vpack.c.bf16 %v1538_v13, %v1534_v8  ;;  %v5733_v16 = vld [vmem:[%s7239_s11 + $0x8] sm:$0xff] }
  0xdc   : > { %3925 = vmatpush1.bf16.msra.mxu1 %v3924_v15  ;;  %v4433_v15 = vmov 1  }
  0xdd   : > { %3927 = vmatprep.subr.bf16.mxu1 %v3926_v19  ;;  %3801 = vmatpush1.bf16.msra.mxu0 %v3800_v28  ;;  %v5738_v19 = vshrl.u32 %v669_v17, 7 }
  0xde   : > { %3803 = vmatprep.subr.bf16.mxu0 %v3802_v32  ;;  %4293 = vset.pattern.permute.xlu1 %v4433_v15  ;;  %v5769_v32 = vld [vmem:[%s7239_s11 + $0x20] sm:$0xff] }
  0xdf   : > { %4291 = vset.pattern.permute.xlu0 %v4433_v15  ;;  %2250 = vperm.xlu1 %4293, %v5733_v16   ;;  %v7251_v21 = vsub.s32 0, %v5738_v19  ;;  %v7250_v26 = vsub.s32 2, %v5738_v19  ;;  %v7249_v28 = vsub.s32 1, %v5738_v19  ;;  %v7248_v29 = vsub.s32 3, %v5738_v19 }
  0xe0   : > { %3929 = vmatpush1.bf16.msra.mxu1 %v3928_v30 }
  0xe1   : > { %3931 = vmatprep.subr.bf16.mxu1 %v3930_v27  ;;  %3805 = vmatpush1.bf16.msra.mxu0 %v3804_v11  ;;  %v5764_v30 = vrot.slane %v5755_v24, %v7251_v21  ;;  %v5774_v33 = vrot.slane %v5755_v24, %v7250_v26  ;;  %v5779_v34 = vrot.slane %v5755_v24, %v7249_v28  ;;  %v6049_v26 = vld [vmem:[%s7231_s3 + $0x4b0] sm:$0xff] }
  0xe2   : > { %3807 = vmatprep.subr.bf16.mxu0 %v3806_v25  ;;  %v5784_v35 = vrot.slane %v5755_v24, %v7248_v29  ;;  %v6036_v29 = vld [vmem:[%s7231_s3 + $0x4a0] sm:$0xff] }
  0xe3   : > { %4294 = vset.pattern.permute.xlu1 %v4434_v18 }
  0xe4   : > { %3933 = vmatpush1.bf16.msra.mxu1 %v3932_v23  ;;  %2204 = vperm.xlu1 %4294, %v5733_v16  }
  0xe5   : > { %3935 = vmatprep.subr.bf16.mxu1 %v3934_v55  ;;  %3809 = vmatpush1.bf16.msra.mxu0 %v3808_v10 }
  0xe6   : > { %3811 = vmatprep.subr.bf16.mxu0 %v3810_v43 }
  0xe8   : > { %3937 = vmatpush1.bf16.msra.mxu1 %v3936_v36  ;;  %4295 = vset.pattern.permute.xlu1 %v4433_v15 }
  0xe9   : > { %3939 = vmatprep.subr.bf16.mxu1 %v3938_v47  ;;  %3813 = vmatpush1.bf16.msra.mxu0 %v3812_v49 }
  0xea   : > { %3815 = vmatprep.subr.bf16.mxu0 %v3814_v58  ;;  %2254 = vperm.xlu1 %4295, %v5743_v20  }
  0xec   : > { %3941 = vmatpush1.bf16.msra.mxu1 %v3940_v52 }
  0xed   : > { %3943 = vmatprep.subr.bf16.mxu1 %v3942_v0  ;;  %3817 = vmatpush1.bf16.msra.mxu0 %v3816_v1 }
  0xee   : > { %3819 = vmatprep.subr.bf16.mxu0 %v3818_v12  ;;  %2258 = vperm.xlu1 %4295, %v5750_v22  }
  0xf0   : > { %3945 = vmatpush1.bf16.msra.mxu1 %v3944_v4 }
  0xf1   : > { %3947 = vmatprep.subr.bf16.mxu1 %v3946_v14 }
  0xf2   : > { %2262 = vperm.xlu1 %4295, %v5769_v32  }
  0xf6   : > { %2266 = vperm.xlu1 %4295, %v5791_v61  }
  0xfa   : > { %2270 = vperm.xlu1 %4295, %v5801_v38  }
  0xfe   : > { %2274 = vperm.xlu1 %4295, %v5813_v60  }
 0x142   : > { %v800_v27 = vpop.f32.mrb[0].mxu0 }
 0x143   : > { %v801_v31 = vadd.f32 %v800_v27, %v5764_v30  ;;  %v913_v45 = vpop.f32.mrb[0].mxu1  ;;  %v802_v59 = vpop.f32.mrb[1].mxu0 }
 0x144   : > { %v914_v9 = vadd.f32 %v913_v45, %v5774_v33  ;;  %v803_v11 = vadd.f32 %v802_v59, %v5779_v34  ;;  %v915_v23 = vpop.f32.mrb[1].mxu1 }
 0x145   : > { %v1186_v25 = vmax.f32 %v801_v31, 0.0  ;;  %v916_v39 = vadd.f32 %v915_v23, %v5784_v35 }
 0x146   : > { %v1188_v41 = vmax.f32 %v914_v9, 0.0  ;;  %v1187_v55 = vmax.f32 %v803_v11, 0.0  ;;  %v806_v57 = vpop.f32.mrb[2].mxu0 }
 0x147   : > { %v1189_v7 = vmax.f32 %v916_v39, 0.0  ;;  %v807_v10 = vadd.f32 %v806_v57, %v5764_v30  ;;  %v919_v36 = vpop.f32.mrb[2].mxu1  ;;  %v808_v37 = vpop.f32.mrb[3].mxu0  ;;  %v5830_v57 = vld [vmem:[%s7239_s11] sm:$0xff] }
 0x148   : > { %v1250_v40 = vmax.f32 %v1186_v25, %v1187_v55  ;;  %v920_v42 = vadd.f32 %v919_v36, %v5774_v33  ;;  %v809_v43 = vadd.f32 %v808_v37, %v5779_v34  ;;  %v921_v44 = vpop.f32.mrb[3].mxu1  ;;  %v7260_v55 = vmov 3   ;;  %2246 = vperm.xlu0 %4291, %v5830_v57  }
 0x149   : > { %v1258_v46 = vmax.f32 %v1188_v41, %v1189_v7  ;;  %v1194_v48 = vmax.f32 %v807_v10, 0.0  ;;  %v922_v47 = vadd.f32 %v921_v44, %v5784_v35  ;;  %4296 = vset.pattern.permute.xlu1 %v7260_v55 }
 0x14a   : > { %v1196_v49 = vmax.f32 %v920_v42, 0.0  ;;  %v1195_v50 = vmax.f32 %v809_v43, 0.0  ;;  %v812_v51 = vpop.f32.mrb[4].mxu0  ;;  %2326 = vperm.xlu1 %4296, %v5830_v57  }
 0x14b   : > { %v5807_v52 = vmax.f32 %v1250_v40, %v1258_v46  ;;  %v1197_v53 = vmax.f32 %v922_v47, 0.0  ;;  %v813_v54 = vadd.f32 %v812_v51, %v5764_v30  ;;  %v925_v56 = vpop.f32.mrb[4].mxu1  ;;  %v814_v58 = vpop.f32.mrb[5].mxu0 }
 0x14c   : > { %v1251_v62 = vmax.f32 %v1194_v48, %v1195_v50  ;;  %v926_v63 = vadd.f32 %v925_v56, %v5774_v33  ;;  %v815_v0 = vadd.f32 %v814_v58, %v5779_v34  ;;  %v927_v1 = vpop.f32.mrb[5].mxu1  ;;  %4292 = vset.pattern.permute.xlu0 %v4434_v18 }
 0x14d   : > { %1298 = vst [vmem:[#allocation2] sm:$0xff] %v5807_v52  ;;  %v1259_v2 = vmax.f32 %v1196_v49, %v1197_v53  ;;  %v1202_v3 = vmax.f32 %v813_v54, 0.0  ;;  %v928_v4 = vadd.f32 %v927_v1, %v5784_v35  ;;  %2199 = vperm.xlu0 %4292, %v5830_v57  }
 0x14e   : > { %v1204_v5 = vmax.f32 %v926_v63, 0.0  ;;  %v1203_v6 = vmax.f32 %v815_v0, 0.0  ;;  %v818_v8 = vpop.f32.mrb[6].mxu0 }
 0x14f   : > { %v1205_v12 = vmax.f32 %v928_v4, 0.0  ;;  %v819_v13 = vadd.f32 %v818_v8, %v5764_v30  ;;  %v931_v14 = vpop.f32.mrb[6].mxu1  ;;  %v820_v15 = vpop.f32.mrb[7].mxu0  ;;  %v5821_v17 = vmax.f32 %v1251_v62, %v1259_v2  ;;  %v7258_v2 = vmov 5  }
 0x150   : > { %v1252_v27 = vmax.f32 %v1202_v3, %v1203_v6  ;;  %v932_v31 = vadd.f32 %v931_v14, %v5774_v33  ;;  %v821_v45 = vadd.f32 %v820_v15, %v5779_v34  ;;  %v933_v59 = vpop.f32.mrb[7].mxu1  ;;  %4298 = vset.pattern.permute.xlu1 %v7258_v2 }
 0x151   : > { %v1260_v9 = vmax.f32 %v1204_v5, %v1205_v12  ;;  %v1210_v11 = vmax.f32 %v819_v13, 0.0  ;;  %v934_v23 = vadd.f32 %v933_v59, %v5784_v35  ;;  %v7253_v50 = vrot.slane %v5821_v17, 1  ;;  %2406 = vperm.xlu1 %4298, %v5830_v57   ;;  %2209 = vperm.xlu0 %4292, %v5743_v20  }
 0x152   : > { %v1212_v25 = vmax.f32 %v932_v31, 0.0  ;;  %v1211_v39 = vmax.f32 %v821_v45, 0.0  ;;  %v824_v41 = vpop.f32.mrb[8].mxu0 }
 0x153   : > { %v1213_v7 = vmax.f32 %v934_v23, 0.0  ;;  %v825_v10 = vadd.f32 %v824_v41, %v5764_v30  ;;  %v937_v36 = vpop.f32.mrb[8].mxu1  ;;  %v826_v37 = vpop.f32.mrb[9].mxu0  ;;  %v5833_v40 = vmax.f32 %v1252_v27, %v1260_v9 }
 0x154   : > { %v1253_v42 = vmax.f32 %v1210_v11, %v1211_v39  ;;  %v938_v43 = vadd.f32 %v937_v36, %v5774_v33  ;;  %v827_v44 = vadd.f32 %v826_v37, %v5779_v34  ;;  %v939_v46 = vpop.f32.mrb[9].mxu1  ;;  %v7256_v36 = vmov 4  }
 0x155   : > { %v1261_v48 = vmax.f32 %v1212_v25, %v1213_v7  ;;  %v1218_v47 = vmax.f32 %v825_v10, 0.0  ;;  %v940_v49 = vadd.f32 %v939_v46, %v5784_v35  ;;  %v1359_v56 = vrot.slane %v5833_v40, 1  ;;  %4299 = vset.pattern.permute.xlu1 %v7256_v36  ;;  %2214 = vperm.xlu0 %4292, %v5750_v22  }
 0x156   : > { %v1220_v51 = vmax.f32 %v938_v43, 0.0  ;;  %v1219_v53 = vmax.f32 %v827_v44, 0.0  ;;  %v830_v54 = vpop.f32.mrb[10].mxu0  ;;  %2366 = vperm.xlu1 %4299, %v5830_v57  }
 0x157   : > { %v1221_v58 = vmax.f32 %v940_v49, 0.0  ;;  %v831_v62 = vadd.f32 %v830_v54, %v5764_v30  ;;  %v943_v63 = vpop.f32.mrb[10].mxu1  ;;  %v832_v0 = vpop.f32.mrb[11].mxu0  ;;  %v5843_v1 = vmax.f32 %v1253_v42, %v1261_v48  ;;  %v5852_v8 = vsel %vm1352_vm1, %v7253_v50, %v1359_v56 }
 0x158   : > { %v1254_v3 = vmax.f32 %v1218_v47, %v1219_v53  ;;  %v944_v4 = vadd.f32 %v943_v63, %v5774_v33  ;;  %v833_v5 = vadd.f32 %v832_v0, %v5779_v34  ;;  %v945_v6 = vpop.f32.mrb[11].mxu1 }
 0x159   : > { %v1262_v12 = vmax.f32 %v1220_v51, %v1221_v58  ;;  %v1226_v13 = vmax.f32 %v831_v62, 0.0  ;;  %v946_v14 = vadd.f32 %v945_v6, %v5784_v35  ;;  %v1363_v15 = vrot.slane %v5843_v1, 1  ;;  %2219 = vperm.xlu0 %4292, %v5769_v32  }
 0x15a   : > { %v1228_v18 = vmax.f32 %v944_v4, 0.0  ;;  %v1227_v27 = vmax.f32 %v833_v5, 0.0  ;;  %v836_v31 = vpop.f32.mrb[12].mxu0  ;;  %v695_v32 = vsub.s32 6, %v5738_v19 }
 0x15b   : > { %v1229_v45 = vmax.f32 %v946_v14, 0.0  ;;  %v837_v59 = vadd.f32 %v836_v31, %v5764_v30  ;;  %v949_v9 = vpop.f32.mrb[12].mxu1  ;;  %v838_v11 = vpop.f32.mrb[13].mxu0  ;;  %v5859_v23 = vmax.f32 %v1254_v3, %v1262_v12  ;;  %v5862_v25 = vsel %vm1352_vm1, %v1359_v56, %v1363_v15 }
 0x15c   : > { %v1255_v39 = vmax.f32 %v1226_v13, %v1227_v27  ;;  %v950_v41 = vadd.f32 %v949_v9, %v5774_v33  ;;  %v839_v7 = vadd.f32 %v838_v11, %v5779_v34  ;;  %v951_v10 = vpop.f32.mrb[13].mxu1  ;;  %v687_v9 = vsub.s32 4, %v5738_v19 }
 0x15d   : > { %v1263_v37 = vmax.f32 %v1228_v18, %v1229_v45  ;;  %v1234_v42 = vmax.f32 %v837_v59, 0.0  ;;  %v952_v43 = vadd.f32 %v951_v10, %v5784_v35  ;;  %v1367_v44 = vrot.slane %v5859_v23, 1  ;;  %2224 = vperm.xlu0 %4292, %v5791_v61  }
 0x15e   : > { %v1236_v46 = vmax.f32 %v950_v41, 0.0  ;;  %v1235_v48 = vmax.f32 %v839_v7, 0.0  ;;  %v842_v47 = vpop.f32.mrb[14].mxu0  ;;  %v699_v41 = vsub.s32 7, %v5738_v19  ;;  %v5913_v61 = vrot.slane %v5755_v24, %v687_v9 }
 0x15f   : > { %v1237_v49 = vmax.f32 %v952_v43, 0.0  ;;  %v843_v51 = vadd.f32 %v842_v47, %v5764_v30  ;;  %v955_v53 = vpop.f32.mrb[14].mxu1  ;;  %v844_v54 = vpop.f32.mrb[15].mxu0  ;;  %v5872_v56 = vmax.f32 %v1255_v39, %v1263_v37  ;;  %v5875_v58 = vsel %vm1352_vm1, %v1363_v15, %v1367_v44  ;;  %v5935_v43 = vld [vmem:[%s7231_s3 + $0x420] sm:$0xff]  ;;  %v5951_v47 = vld [vmem:[%s7231_s3 + $0x448] sm:$0xff] }
 0x160   : > { %v1256_v62 = vmax.f32 %v1234_v42, %v1235_v48  ;;  %v956_v63 = vadd.f32 %v955_v53, %v5774_v33  ;;  %v845_v0 = vadd.f32 %v844_v54, %v5779_v34  ;;  %v957_v3 = vpop.f32.mrb[15].mxu1  ;;  %v7254_v30 = vmov 2   ;;  %v5941_v48 = vld [vmem:[%s7231_s3 + $0x410] sm:$0xff]  ;;  %v5958_v54 = vld [vmem:[%s7231_s3 + $0x468] sm:$0xff] }
 0x161   : > { %v1264_v4 = vmax.f32 %v1236_v46, %v1237_v49  ;;  %v1242_v5 = vmax.f32 %v843_v51, 0.0  ;;  %v958_v6 = vadd.f32 %v957_v3, %v5784_v35  ;;  %v1371_v12 = vrot.slane %v5872_v56, 1  ;;  %4301 = vset.pattern.permute.xlu1 %v7254_v30  ;;  %2229 = vperm.xlu0 %4292, %v5801_v38   ;;  %v5930_v38 = vld [vmem:[%s7231_s3 + $0x400] sm:$0xff] }
 0x162   : > { %v1244_v13 = vmax.f32 %v956_v63, 0.0  ;;  %v1243_v14 = vmax.f32 %v845_v0, 0.0  ;;  %2290 = vperm.xlu1 %4301, %v5733_v16   ;;  %v691_v39 = vsub.s32 5, %v5738_v19  ;;  %v5916_v7 = vrot.slane %v5755_v24, %v695_v32  ;;  %v5968_v63 = vld [vmem:[%s7231_s3 + $0x478] sm:$0xff] }
 0x163   : > { %v1245_v15 = vmax.f32 %v958_v6, 0.0  ;;  %v5884_v33 = vmax.f32 %v1256_v62, %v1264_v4  ;;  %v5887_v34 = vsel %vm1352_vm1, %v1367_v44, %v1371_v12  ;;  %v5923_v37 = vrot.slane %v5755_v24, %v699_v41  ;;  %v5963_v62 = vld [vmem:[%s7231_s3 + $0x458] sm:$0xff]  ;;  %v5974_v4 = vld [vmem:[%s7231_s3 + $0x440] sm:$0xff] }
 0x164   : > { %v1257_v18 = vmax.f32 %v1242_v5, %v1243_v14  ;;  %v5919_v10 = vrot.slane %v5755_v24, %v691_v39  ;;  %v5979_v5 = vld [vmem:[%s7231_s3 + $0x460] sm:$0xff]  ;;  %v3820_v14 = vpack.c.bf16 %v5935_v43, %v5930_v38 }
 0x165   : > { %v1265_v27 = vmax.f32 %v1244_v13, %v1245_v15  ;;  %v1375_v35 = vrot.slane %v5884_v33, 1  ;;  %2234 = vperm.xlu0 %4292, %v5813_v60   ;;  %v5946_v60 = vld [vmem:[%s7231_s3 + $0x430] sm:$0xff]  ;;  %v6149_v38 = vld [vmem:[%s7231_s3 + $0x500] sm:$0xff] }
 0x166   : > { %4302 = vset.pattern.permute.xlu1 %v7258_v2  ;;  %v6154_v43 = vld [vmem:[%s7231_s3 + $0x520] sm:$0xff] }
 0x167   : > { %v5892_v31 = vmax.f32 %v1257_v18, %v1265_v27  ;;  %v5895_v45 = vsel %vm1352_vm1, %v1371_v12, %v1375_v35  ;;  %2410 = vperm.xlu1 %4302, %v5733_v16   ;;  %v5990_v18 = vld [vmem:[%s7231_s3 + $0x450] sm:$0xff] }
 0x168   : > { %v5995_v27 = vld [vmem:[%s7231_s3 + $0x470] sm:$0xff] }
 0x169   : > { %v7252_v59 = vrot.slane %v5892_v31, 1  ;;  %4297 = vset.pattern.permute.xlu0 %v7254_v30 }
 0x16a   : > { %2286 = vperm.xlu0 %4297, %v5830_v57   ;;  %v6022_v57 = vld [vmem:[%s7231_s3 + $0x4b8] sm:$0xff] }
 0x16b   : > { %v5904_v11 = vsel %vm1352_vm1, %v1375_v35, %v7252_v59  ;;  %4303 = vset.pattern.permute.xlu1 %v7260_v55  ;;  %v6000_v35 = vld [vmem:[%s7231_s3 + $0x488] sm:$0xff] }
 0x16c   : > { %2334 = vperm.xlu1 %4303, %v5743_v20  }
 0x16e   : > { %4300 = vset.pattern.permute.xlu0 %v7260_v55 }
 0x16f   : > { %2330 = vperm.xlu0 %4300, %v5733_v16  }
 0x170   : > { %4304 = vset.pattern.permute.xlu1 %v7254_v30 }
 0x171   : > { %2294 = vperm.xlu1 %4304, %v5743_v20  }
 0x172   : > { %v1026_v42 = vpop.f32.mrb[16].mxu0 }
 0x173   : > { %v1027_v44 = vadd.f32 %v1026_v42, %v5913_v61  ;;  %v1139_v46 = vpop.f32.mrb[16].mxu1  ;;  %v1028_v24 = vpop.f32.mrb[17].mxu0 }
 0x174   : > { %v1140_v49 = vadd.f32 %v1139_v46, %v5916_v7  ;;  %v1029_v51 = vadd.f32 %v1028_v24, %v5919_v10  ;;  %v1141_v53 = vpop.f32.mrb[17].mxu1  ;;  %v6012_v46 = vld [vmem:[%s7231_s3 + $0x4a8] sm:$0xff] }
 0x175   : > { %v1190_v0 = vmax.f32 %v1027_v44, 0.0  ;;  %v1142_v3 = vadd.f32 %v1141_v53, %v5923_v37  ;;  %4305 = vset.pattern.permute.xlu1 %v7256_v36  ;;  %v6099_v44 = vld [vmem:[%s7231_s3 + $0x4d0] sm:$0xff] }
 0x176   : > { %v1192_v6 = vmax.f32 %v1140_v49, 0.0  ;;  %v1191_v12 = vmax.f32 %v1029_v51, 0.0  ;;  %v1032_v13 = vpop.f32.mrb[18].mxu0  ;;  %2374 = vperm.xlu1 %4305, %v5743_v20   ;;  %v6017_v20 = vld [vmem:[%s7231_s3 + $0x498] sm:$0xff] }
 0x177   : > { %v1193_v9 = vmax.f32 %v1142_v3, 0.0  ;;  %v1033_v32 = vadd.f32 %v1032_v13, %v5913_v61  ;;  %v1145_v39 = vpop.f32.mrb[18].mxu1  ;;  %v1034_v41 = vpop.f32.mrb[19].mxu0  ;;  %v6031_v13 = vld [vmem:[%s7231_s3 + $0x480] sm:$0xff] }
 0x178   : > { %v1274_v24 = vmax.f32 %v1190_v0, %v1191_v12  ;;  %v1146_v49 = vadd.f32 %v1145_v39, %v5916_v7  ;;  %v1035_v51 = vadd.f32 %v1034_v41, %v5919_v10  ;;  %v1147_v53 = vpop.f32.mrb[19].mxu1  ;;  %v6044_v41 = vld [vmem:[%s7231_s3 + $0x490] sm:$0xff]  ;;  %v6078_v39 = vld [vmem:[%s7231_s3 + $0x4f8] sm:$0xff]  ;;  %v6083_v3 = vld [vmem:[%s7231_s3 + $0x4c0] sm:$0xff] }
 0x179   : > { %v1282_v28 = vmax.f32 %v1192_v6, %v1193_v9  ;;  %v1198_v0 = vmax.f32 %v1033_v32, 0.0  ;;  %v1148_v12 = vadd.f32 %v1147_v53, %v5923_v37  ;;  %v6058_v32 = vld [vmem:[%s7231_s3 + $0x4c8] sm:$0xff] }
 0x17a   : > { %v1200_v21 = vmax.f32 %v1146_v49, 0.0  ;;  %v1199_v59 = vmax.f32 %v1035_v51, 0.0  ;;  %v1038_v50 = vpop.f32.mrb[20].mxu0  ;;  %v6063_v53 = vld [vmem:[%s7231_s3 + $0x4e8] sm:$0xff]  ;;  %v6068_v49 = vld [vmem:[%s7231_s3 + $0x4d8] sm:$0xff]  ;;  %4306 = vset.pattern.permute.xlu1 %v7260_v55 }
 0x17b   : > { %v1201_v51 = vmax.f32 %v1148_v12, 0.0  ;;  %v1039_v30 = vadd.f32 %v1038_v50, %v5913_v61  ;;  %v1151_v36 = vpop.f32.mrb[20].mxu1  ;;  %v1040_v2 = vpop.f32.mrb[21].mxu0  ;;  %v1290_v9 = vmax.f32 %v1274_v24, %v1282_v28  ;;  %v6088_v50 = vld [vmem:[%s7231_s3 + $0x4e0] sm:$0xff]  ;;  %2338 = vperm.xlu1 %4306, %v5750_v22   ;;  %v6104_v22 = vld [vmem:[%s7231_s3 + $0x4f0] sm:$0xff] }
 0x17c   : > { %v1275_v28 = vmax.f32 %v1198_v0, %v1199_v59  ;;  %v1152_v24 = vadd.f32 %v1151_v36, %v5916_v7  ;;  %v1041_v12 = vadd.f32 %v1040_v2, %v5919_v10  ;;  %v1153_v55 = vpop.f32.mrb[21].mxu1 }
 0x17d   : > { %v1283_v16 = vmax.f32 %v1200_v21, %v1201_v51  ;;  %v1206_v59 = vmax.f32 %v1039_v30, 0.0  ;;  %v1154_v36 = vadd.f32 %v1153_v55, %v5923_v37  ;;  %1299 = vst [vmem:[#allocation2 + $0x8] sm:$0xff] %v1290_v9  ;;  %1745 = vmatprep.mubr.f32.mxu0 %v1290_v9  ;;  %1971 = vmatprep.mubr.f32.mxu1 %v1290_v9  ;;  %v6118_v55 = vld [vmem:[%s7231_s3 + $0x508] sm:$0xff] }
 0x17e   : > { %v1208_v0 = vmax.f32 %v1152_v24, 0.0  ;;  %v1207_v6 = vmax.f32 %v1041_v12, 0.0  ;;  %1746 = vmatmul.mubr.f32.vlgmr.msra.gmra.mrb[32].mxu0 %v5807_v52  ;;  %1972 = vmatmul.mubr.f32.vlgmr.msra.gmra.mrb[32].mxu1 %v5807_v52  ;;  %v1044_v42 = vpop.f32.mrb[22].mxu0  ;;  %v6123_v30 = vld [vmem:[%s7231_s3 + $0x528] sm:$0xff]  ;;  %v6128_v52 = vld [vmem:[%s7231_s3 + $0x518] sm:$0xff]  ;;  %v7276_v51 = vpack.c.bf16 %v5946_v60, %v5941_v48 }
 0x17f   : > { %v1209_v9 = vmax.f32 %v1154_v36, 0.0  ;;  %3821 = vmatpush1.bf16.msra.mxu0 %v3820_v14  ;;  %v1045_v24 = vadd.f32 %v1044_v42, %v5913_v61  ;;  %v1157_v12 = vpop.f32.mrb[22].mxu1  ;;  %v1046_v21 = vpop.f32.mrb[23].mxu0  ;;  %v6137_v15 = vmax.f32 %v1275_v28, %v1283_v16  ;;  %v6144_v36 = vld [vmem:[%s7231_s3 + $0x538] sm:$0xff]  ;;  %v7277_v28 = vpack.c.bf16 %v5958_v54, %v5951_v47 }
 0x180   : > { %3949 = vmatpush1.bf16.msra.mxu1 %v7276_v51  ;;  %v1276_v48 = vmax.f32 %v1206_v59, %v1207_v6  ;;  %v1158_v60 = vadd.f32 %v1157_v12, %v5916_v7  ;;  %v1047_v14 = vadd.f32 %v1046_v21, %v5919_v10  ;;  %v1159_v42 = vpop.f32.mrb[23].mxu1  ;;  %v7278_v16 = vpack.c.bf16 %v5968_v63, %v5963_v62  ;;  %v6167_v51 = vld [vmem:[%s7231_s3 + $0x510] sm:$0xff] }
 0x181   : > { %3823 = vmatprep.subr.bf16.mxu0 %v7277_v28  ;;  %v6172_v6 = vld [vmem:[%s7231_s3 + $0x530] sm:$0xff]  ;;  %v1284_v59 = vmax.f32 %v1208_v0, %v1209_v9  ;;  %v1214_v21 = vmax.f32 %v1045_v24, 0.0  ;;  %v1160_v12 = vadd.f32 %v1159_v42, %v5923_v37  ;;  %1751 = vmatprep.mubr.f32.mxu0 %v6137_v15  ;;  %v6188_v24 = vld [vmem:[%s7231_s3 + $0x548] sm:$0xff]  ;;  %v7279_v42 = vpack.c.bf16 %v5979_v5, %v5974_v4  ;;  %v6214_v4 = vld [vmem:[%s7231_s3 + $0x578] sm:$0xff] }
 0x182   : > { %3951 = vmatprep.subr.bf16.mxu1 %v7278_v16  ;;  %1977 = vmatprep.mubr.f32.mxu1 %v6137_v15  ;;  %v1216_v54 = vmax.f32 %v1158_v60, 0.0  ;;  %v1215_v62 = vmax.f32 %v1047_v14, 0.0  ;;  %v1050_v63 = vpop.f32.mrb[24].mxu0  ;;  %v6193_v60 = vld [vmem:[%s7231_s3 + $0x568] sm:$0xff]  ;;  %v7280_v28 = vpack.c.bf16 %v5995_v27, %v5990_v18 }
 0x183   : > { %1752 = vmatmul.mubr.f32.gmra.mrb[34].mxu0 %v5821_v17  ;;  %1978 = vmatmul.mubr.f32.gmra.mrb[34].mxu1 %v5821_v17  ;;  %v1217_v14 = vmax.f32 %v1160_v12, 0.0  ;;  %v1051_v16 = vadd.f32 %v1050_v63, %v5913_v61  ;;  %v1163_v9 = vpop.f32.mrb[24].mxu1  ;;  %v1052_v0 = vpop.f32.mrb[25].mxu0  ;;  %v6202_v47 = vmax.f32 %v1276_v48, %v1284_v59  ;;  %v6209_v12 = vld [vmem:[%s7231_s3 + $0x558] sm:$0xff]  ;;  %v7281_v59 = vpack.c.bf16 %v6012_v46, %v6000_v35 }
 0x184   : > { %3825 = vmatpush1.bf16.msra.mxu0 %v7279_v42  ;;  %3953 = vmatpush1.bf16.msra.mxu1 %v7280_v28  ;;  %v1277_v5 = vmax.f32 %v1214_v21, %v1215_v62  ;;  %v1164_v18 = vadd.f32 %v1163_v9, %v5916_v7  ;;  %v1053_v27 = vadd.f32 %v1052_v0, %v5919_v10  ;;  %v1165_v48 = vpop.f32.mrb[25].mxu1 }
 0x185   : > { %3827 = vmatprep.subr.bf16.mxu0 %v7281_v59  ;;  %v7282_v63 = vpack.c.bf16 %v6022_v57, %v6017_v20  ;;  %v1285_v42 = vmax.f32 %v1216_v54, %v1217_v14  ;;  %v1222_v28 = vmax.f32 %v1051_v16, 0.0  ;;  %v1166_v2 = vadd.f32 %v1165_v48, %v5923_v37  ;;  %1757 = vmatprep.mubr.f32.mxu0 %v6202_v47  ;;  %v6265_v59 = vld [vmem:[%s7231_s3 + $0x550] sm:$0xff] }
 0x186   : > { %1983 = vmatprep.mubr.f32.mxu1 %v6202_v47  ;;  %v3838_v21 = vpack.c.bf16 %v6193_v60, %v6188_v24  ;;  %v1224_v62 = vmax.f32 %v1164_v18, 0.0  ;;  %v1223_v0 = vmax.f32 %v1053_v27, 0.0  ;;  %v1056_v35 = vpop.f32.mrb[26].mxu0  ;;  %v3966_v46 = vpack.c.bf16 %v6214_v4, %v6209_v12  ;;  %v6246_v27 = vld [vmem:[%s7231_s3 + $0x540] sm:$0xff]  ;;  %v1590_v60 = vld [vmem:[%s7231_s3 + $0x5d8] sm:$0xff] }
 0x187   : > { %3955 = vmatprep.subr.bf16.mxu1 %v7282_v63  ;;  %1758 = vmatmul.mubr.f32.gmra.mrb[36].mxu0 %v5833_v40  ;;  %v1361_v20 = vrot.slane %v6202_v47, 1  ;;  %v1225_v57 = vmax.f32 %v1166_v2, 0.0  ;;  %v7283_v54 = vpack.c.bf16 %v6036_v29, %v6031_v13  ;;  %v7284_v9 = vpack.c.bf16 %v6049_v26, %v6044_v41  ;;  %v1169_v16 = vpop.f32.mrb[26].mxu1  ;;  %v1058_v18 = vpop.f32.mrb[27].mxu0  ;;  %v6251_v29 = vld [vmem:[%s7231_s3 + $0x560] sm:$0xff]  ;;  %v6270_v63 = vld [vmem:[%s7231_s3 + $0x570] sm:$0xff] }
 0x188   : > { %1984 = vmatmul.mubr.f32.gmra.mrb[36].mxu1 %v5833_v40  ;;  %v1057_v14 = vadd.f32 %v1056_v35, %v5913_v61  ;;  %v6241_v40 = vmax.f32 %v1277_v5, %v1285_v42  ;;  %v1357_v13 = vrot.slane %v6137_v15, 1  ;;  %v1278_v26 = vmax.f32 %v1222_v28, %v1223_v0  ;;  %v1171_v47 = vpop.f32.mrb[27].mxu1  ;;  %v1594_v12 = vld [vmem:[%s7231_s3 + $0x5f8] sm:$0xff] }
 0x189   : > { %3829 = vmatpush1.bf16.msra.mxu0 %v7283_v54  ;;  %3957 = vmatpush1.bf16.msra.mxu1 %v7284_v9  ;;  %v1170_v41 = vadd.f32 %v1169_v16, %v5916_v7  ;;  %v1059_v2 = vadd.f32 %v1058_v18, %v5919_v10  ;;  %v7285_v5 = vpack.c.bf16 %v6063_v53, %v6058_v32 }
 0x18a   : > { %v7286_v48 = vpack.c.bf16 %v6078_v39, %v6068_v49  ;;  %v1286_v42 = vmax.f32 %v1224_v62, %v1225_v57  ;;  %v1230_v28 = vmax.f32 %v1057_v14, 0.0  ;;  %v1172_v0 = vadd.f32 %v1171_v47, %v5923_v37  ;;  %1763 = vmatprep.mubr.f32.mxu0 %v6241_v40  ;;  %1989 = vmatprep.mubr.f32.mxu1 %v6241_v40  ;;  %v1062_v49 = vpop.f32.mrb[28].mxu0 }
 0x18b   : > { %3831 = vmatprep.subr.bf16.mxu0 %v7285_v5  ;;  %v6278_v39 = vsel %vm1352_vm1, %v1357_v13, %v1361_v20  ;;  %v1232_v32 = vmax.f32 %v1170_v41, 0.0  ;;  %v1231_v53 = vmax.f32 %v1059_v2, 0.0  ;;  %1764 = vmatmul.mubr.f32.gmra.mrb[38].mxu0 %v5843_v1  ;;  %v3840_v62 = vpack.c.bf16 %v6251_v29, %v6246_v27  ;;  %v1175_v16 = vpop.f32.mrb[28].mxu1  ;;  %v1064_v18 = vpop.f32.mrb[29].mxu0  ;;  %v1582_v5 = vld [vmem:[%s7231_s3 + $0x598] sm:$0xff]  ;;  %v1589_v27 = vld [vmem:[%s7231_s3 + $0x5d0] sm:$0xff] }
 0x18c   : > { %3959 = vmatprep.subr.bf16.mxu1 %v7286_v48  ;;  %1990 = vmatmul.mubr.f32.gmra.mrb[38].mxu1 %v5843_v1  ;;  %v1365_v35 = vrot.slane %v6241_v40, 1  ;;  %v1233_v57 = vmax.f32 %v1172_v0, 0.0  ;;  %v7287_v54 = vpack.c.bf16 %v6088_v50, %v6083_v3  ;;  %v7288_v9 = vpack.c.bf16 %v6104_v22, %v6099_v44  ;;  %v6299_v40 = vld [vmem:[%s7231_s3 + $0x588] sm:$0xff]  ;;  %v1586_v48 = vld [vmem:[%s7231_s3 + $0x5b8] sm:$0xff]  ;;  %v1593_v29 = vld [vmem:[%s7231_s3 + $0x5f0] sm:$0xff] }
 0x18d   : > { %v1063_v14 = vadd.f32 %v1062_v49, %v5913_v61  ;;  %v6292_v1 = vmax.f32 %v1278_v26, %v1286_v42  ;;  %v3968_v41 = vpack.c.bf16 %v6270_v63, %v6265_v59  ;;  %v6304_v3 = vld [vmem:[%s7231_s3 + $0x5a8] sm:$0xff]  ;;  %v1279_v44 = vmax.f32 %v1230_v28, %v1231_v53  ;;  %v1177_v26 = vpop.f32.mrb[29].mxu1 }
 0x18e   : > { %3833 = vmatpush1.bf16.msra.mxu0 %v7287_v54  ;;  %3961 = vmatpush1.bf16.msra.mxu1 %v7288_v9  ;;  %v1176_v50 = vadd.f32 %v1175_v16, %v5916_v7  ;;  %v1065_v22 = vadd.f32 %v1064_v18, %v5919_v10  ;;  %v7289_v2 = vpack.c.bf16 %v6123_v30, %v6118_v55  ;;  %v1585_v18 = vld [vmem:[%s7231_s3 + $0x5b0] sm:$0xff] }
 0x18f   : > { %v7290_v47 = vpack.c.bf16 %v6144_v36, %v6128_v52  ;;  %v1287_v59 = vmax.f32 %v1232_v32, %v1233_v57  ;;  %v1238_v63 = vmax.f32 %v1063_v14, 0.0  ;;  %v1178_v42 = vadd.f32 %v1177_v26, %v5923_v37  ;;  %1769 = vmatprep.mubr.f32.mxu0 %v6292_v1  ;;  %1995 = vmatprep.mubr.f32.mxu1 %v6292_v1  ;;  %v1068_v36 = vpop.f32.mrb[30].mxu0  ;;  %v1181_v57 = vpop.f32.mrb[30].mxu1  ;;  %v1579_v14 = vld [vmem:[%s7231_s3 + $0x580] sm:$0xff] }
 0x190   : > { %3835 = vmatprep.subr.bf16.mxu0 %v7289_v2  ;;  %v6324_v55 = vsel %vm1352_vm1, %v1361_v20, %v1365_v35  ;;  %v1240_v30 = vmax.f32 %v1176_v50, 0.0  ;;  %v1239_v52 = vmax.f32 %v1065_v22, 0.0  ;;  %1770 = vmatmul.mubr.f32.gmra.mrb[40].mxu0 %v5859_v23  ;;  %v3842_v28 = vpack.c.bf16 %v6304_v3, %v6299_v40  ;;  %v1070_v54 = vpop.f32.mrb[31].mxu0  ;;  %v1183_v16 = vpop.f32.mrb[31].mxu1 }
 0x191   : > { %3963 = vmatprep.subr.bf16.mxu1 %v7290_v47  ;;  %1996 = vmatmul.mubr.f32.gmra.mrb[40].mxu1 %v5859_v23  ;;  %v1369_v0 = vrot.slane %v6292_v1, 1  ;;  %v1241_v32 = vmax.f32 %v1178_v42, 0.0  ;;  %v7291_v53 = vpack.c.bf16 %v6154_v43, %v6149_v38  ;;  %v7292_v20 = vpack.c.bf16 %v6172_v6, %v6167_v51  ;;  %v1583_v38 = vld [vmem:[%s7231_s3 + $0x5a0] sm:$0xff]  ;;  %v1581_v43 = vld [vmem:[%s7231_s3 + $0x590] sm:$0xff]  ;;  %v1588_v1 = vld [vmem:[%s7231_s3 + $0x5c8] sm:$0xff] }
 0x192   : > { %v1069_v49 = vadd.f32 %v1068_v36, %v5913_v61  ;;  %v6338_v23 = vmax.f32 %v1279_v44, %v1287_v59  ;;  %v3970_v9 = vpack.c.bf16 %v1586_v48, %v1582_v5  ;;  %v1280_v51 = vmax.f32 %v1238_v63, %v1239_v52  ;;  %v1596_v48 = vld [vmem:[%s7231_s3 + $0x608] sm:$0xff]  ;;  %v1602_v52 = vld [vmem:[%s7231_s3 + $0x638] sm:$0xff] }
 0x193   : > { %3837 = vmatpush1.bf16.msra.mxu0 %v7291_v53  ;;  %3965 = vmatpush1.bf16.msra.mxu1 %v7292_v20  ;;  %v1182_v61 = vadd.f32 %v1181_v57, %v5916_v7  ;;  %v1071_v6 = vadd.f32 %v1070_v54, %v5919_v10  ;;  %v1592_v7 = vld [vmem:[%s7231_s3 + $0x5e8] sm:$0xff]  ;;  %v1288_v10 = vmax.f32 %v1240_v30, %v1241_v32  ;;  %v1598_v30 = vld [vmem:[%s7231_s3 + $0x618] sm:$0xff]  ;;  %v1599_v32 = vld [vmem:[%s7231_s3 + $0x620] sm:$0xff] }
 0x194   : > { %3839 = vmatprep.subr.bf16.mxu0 %v3838_v21  ;;  %3967 = vmatprep.subr.bf16.mxu1 %v3966_v46  ;;  %v1246_v40 = vmax.f32 %v1069_v49, 0.0  ;;  %v1184_v24 = vadd.f32 %v1183_v16, %v5923_v37  ;;  %v6376_v4 = vsel %vm1352_vm1, %v1365_v35, %v1369_v0  ;;  %v3844_v37 = vpack.c.bf16 %v1583_v38, %v1579_v14  ;;  %v1587_v35 = vld [vmem:[%s7231_s3 + $0x5c0] sm:$0xff]  ;;  %v1600_v42 = vld [vmem:[%s7231_s3 + $0x628] sm:$0xff]  ;;  %v1597_v20 = vld [vmem:[%s7231_s3 + $0x610] sm:$0xff] }
 0x195   : > { %1775 = vmatprep.mubr.f32.mxu0 %v6338_v23  ;;  %2001 = vmatprep.mubr.f32.mxu1 %v6338_v23  ;;  %v1248_v21 = vmax.f32 %v1182_v61, 0.0  ;;  %v1247_v46 = vmax.f32 %v1071_v6, 0.0  ;;  %v1373_v3 = vrot.slane %v6338_v23, 1  ;;  %v1296_v50 = vmax.f32 %v1280_v51, %v1288_v10  ;;  %v1601_v49 = vld [vmem:[%s7231_s3 + $0x630] sm:$0xff]  ;;  %v1604_v57 = vld [vmem:[%s7231_s3 + $0x648] sm:$0xff]  ;;  %v1606_v14 = vld [vmem:[%s7231_s3 + $0x658] sm:$0xff] }
 0x196   : > { %1776 = vmatmul.mubr.f32.gmra.mrb[42].mxu0 %v5872_v56  ;;  %2002 = vmatmul.mubr.f32.gmra.mrb[42].mxu1 %v5872_v56  ;;  %v1249_v44 = vmax.f32 %v1184_v24, 0.0  ;;  %v3972_v22 = vpack.c.bf16 %v1585_v18, %v1581_v43  ;;  %v3846_v26 = vpack.c.bf16 %v1592_v7, %v1588_v1  ;;  %v1591_v56 = vld [vmem:[%s7231_s3 + $0x5e0] sm:$0xff]  ;;  %v3974_v47 = vpack.c.bf16 %v1594_v12, %v1590_v60  ;;  %v1610_v38 = vld [vmem:[%s7231_s3 + $0x678] sm:$0xff]  ;;  %v1609_v10 = vld [vmem:[%s7231_s3 + $0x670] sm:$0xff] }
 0x197   : > { %3841 = vmatpush1.bf16.msra.mxu0 %v3840_v62  ;;  %3969 = vmatpush1.bf16.msra.mxu1 %v3968_v41  ;;  %v1281_v2 = vmax.f32 %v1246_v40, %v1247_v46  ;;  %v1317_v62 = vld [vmem:[#allocation2 + $0x8] sm:$0xfe]  ;;  %v6397_v41 = vsel %vm1352_vm1, %v1369_v0, %v1373_v3  ;;  %v1377_v59 = vrot.slane %v1296_v50, 1  ;;  %v3848_v63 = vpack.c.bf16 %v1591_v56, %v1587_v35  ;;  %v1603_v16 = vld [vmem:[%s7231_s3 + $0x640] sm:$0xff]  ;;  %v1614_v60 = vld [vmem:[%s7231_s3 + $0x698] sm:$0xff] }
 0x198   : > { %3843 = vmatprep.subr.bf16.mxu0 %v3842_v28  ;;  %3971 = vmatprep.subr.bf16.mxu1 %v3970_v9  ;;  %v1289_v5 = vmax.f32 %v1248_v21, %v1249_v44  ;;  %v3976_v28 = vpack.c.bf16 %v1593_v29, %v1589_v27  ;;  %v1356_v0 = vrot.slane %v1317_v62, 1  ;;  %v3850_v54 = vpack.c.bf16 %v1600_v42, %v1596_v48  ;;  %v1608_v9 = vld [vmem:[%s7231_s3 + $0x668] sm:$0xff]  ;;  %v1607_v18 = vld [vmem:[%s7231_s3 + $0x660] sm:$0xff]  ;;  %v1618_v12 = vld [vmem:[%s7231_s3 + $0x6b8] sm:$0xff] }
 0x199   : > { %1781 = vmatprep.mubr.f32.mxu0 %v1296_v50  ;;  %2007 = vmatprep.mubr.f32.mxu1 %v1296_v50  ;;  %v6422_v53 = vsel %vm1352_vm1, %v1373_v3, %v1377_v59  ;;  %v3978_v23 = vpack.c.bf16 %v1602_v52, %v1598_v30  ;;  %v3980_v6 = vpack.c.bf16 %v1601_v49, %v1597_v20  ;;  %v1612_v40 = vld [vmem:[%s7231_s3 + $0x688] sm:$0xff]  ;;  %v7293_v21 = vmov 5   ;;  %v6483_v46 = vld [vmem:[%s7239_s11 + $0x20] sm:$0xff]  ;;  %v1613_v35 = vld [vmem:[%s7231_s3 + $0x690] sm:$0xff] }
 0x19a   : > { %1782 = vmatmul.mubr.f32.gmra.mrb[44].mxu0 %v5884_v33  ;;  %2008 = vmatmul.mubr.f32.gmra.mrb[44].mxu1 %v5884_v33  ;;  %v6413_v36 = vmax.f32 %v1281_v2, %v1289_v5  ;;  %v1595_v33 = vld [vmem:[%s7231_s3 + $0x600] sm:$0xff]  ;;  %v1358_v61 = vsel %vm1352_vm1, %v1356_v0, %v1357_v13  ;;  %v3854_v7 = vpack.c.bf16 %v1608_v9, %v1604_v57  ;;  %v1605_v13 = vld [vmem:[%s7231_s3 + $0x650] sm:$0xff]  ;;  %v1616_v24 = vld [vmem:[%s7231_s3 + $0x6a8] sm:$0xff]  ;;  %v7294_v5 = vmov 4  }
 0x19b   : > { %3845 = vmatpush1.bf16.msra.mxu0 %v3844_v37  ;;  %3973 = vmatpush1.bf16.msra.mxu1 %v3972_v22  ;;  %v3852_v51 = vpack.c.bf16 %v1599_v32, %v1595_v33  ;;  %v3982_v15 = vpack.c.bf16 %v1610_v38, %v1606_v14  ;;  %v3856_v37 = vpack.c.bf16 %v1607_v18, %v1603_v16  ;;  %v1611_v44 = vld [vmem:[%s7231_s3 + $0x680] sm:$0xff]  ;;  %v1617_v56 = vld [vmem:[%s7231_s3 + $0x6b0] sm:$0xff]  ;;  %v1620_v2 = vld [vmem:[%s7231_s3 + $0x6c8] sm:$0xff] }
 0x19c   : > { %3847 = vmatprep.subr.bf16.mxu0 %v3846_v26  ;;  %3975 = vmatprep.subr.bf16.mxu1 %v3974_v47  ;;  %v1381_v43 = vrot.slane %v6413_v36, 1  ;;  %v3984_v3 = vpack.c.bf16 %v1609_v10, %v1605_v13  ;;  %v1615_v50 = vld [vmem:[%s7231_s3 + $0x6a0] sm:$0xff]  ;;  %v3858_v22 = vpack.c.bf16 %v1616_v24, %v1612_v40  ;;  %v3986_v26 = vpack.c.bf16 %v1618_v12, %v1614_v60  ;;  %v1624_v47 = vld [vmem:[%s7231_s3 + $0x6e8] sm:$0xff]  ;;  %v1622_v27 = vld [vmem:[%s7231_s3 + $0x6d8] sm:$0xff] }
 0x19d   : > { %1787 = vmatprep.mubr.f32.mxu0 %v6413_v36  ;;  %2013 = vmatprep.mubr.f32.mxu1 %v6413_v36  ;;  %v1626_v29 = vld [vmem:[%s7231_s3 + $0x6f8] sm:$0xff]  ;;  %v3860_v48 = vpack.c.bf16 %v1615_v50, %v1611_v44  ;;  %v1623_v42 = vld [vmem:[%s7231_s3 + $0x6e0] sm:$0xff]  ;;  %v3862_v30 = vpack.c.bf16 %v1624_v47, %v1620_v2  ;;  %v1625_v0 = vld [vmem:[%s7231_s3 + $0x6f0] sm:$0xff]  ;;  %v7295_v13 = vmov 2  }
 0x19e   : > { %1788 = vmatmul.mubr.f32.gmra.mrb[46].mxu0 %v5892_v31  ;;  %2014 = vmatmul.mubr.f32.gmra.mrb[46].mxu1 %v5892_v31  ;;  %v6459_v1 = vsel %vm1352_vm1, %v1377_v59, %v1381_v43  ;;  %v6513_v62 = vld [vmem:[%s7239_s11 + $0x18] sm:$0xff]  ;;  %v3988_v59 = vpack.c.bf16 %v1617_v56, %v1613_v35  ;;  %v3990_v52 = vpack.c.bf16 %v1626_v29, %v1622_v27  ;;  %v1628_v33 = vld [vmem:[%s7231_s3 + $0x708] sm:$0xff]  ;;  %v1627_v9 = vld [vmem:[%s7231_s3 + $0x700] sm:$0xff] }
 0x19f   : > { %3849 = vmatpush1.bf16.msra.mxu0 %v3848_v63  ;;  %3977 = vmatpush1.bf16.msra.mxu1 %v3976_v28  ;;  %v1619_v63 = vld [vmem:[%s7231_s3 + $0x6c0] sm:$0xff]  ;;  %v1621_v28 = vld [vmem:[%s7231_s3 + $0x6d0] sm:$0xff]  ;;  %v1632_v32 = vld [vmem:[%s7231_s3 + $0x728] sm:$0xff] }
 0x1a0   : > { %1858 = vmatprep.mubr.f32.mxu0 %v1358_v61  ;;  %2084 = vmatprep.mubr.f32.mxu1 %v1358_v61  ;;  %v1630_v20 = vld [vmem:[%s7231_s3 + $0x718] sm:$0xff]  ;;  %v4327_v57 = vld [vmem:[%s7239_s11 + $0x8] sm:$0xff]  ;;  %v1631_v14 = vld [vmem:[%s7231_s3 + $0x720] sm:$0xff]  ;;  %v3866_v38 = vpack.c.bf16 %v1632_v32, %v1628_v33 }
 0x1a1   : > { %3851 = vmatprep.subr.bf16.mxu0 %v3850_v54  ;;  %3979 = vmatprep.subr.bf16.mxu1 %v3978_v23  ;;  %v1634_v49 = vld [vmem:[%s7231_s3 + $0x738] sm:$0xff]  ;;  %v3864_v54 = vpack.c.bf16 %v1623_v42, %v1619_v63  ;;  %v3992_v23 = vpack.c.bf16 %v1625_v0, %v1621_v28  ;;  %v1629_v61 = vld [vmem:[%s7231_s3 + $0x710] sm:$0xff]  ;;  %v1636_v16 = vld [vmem:[%s7231_s3 + $0x748] sm:$0xff]  ;;  %v3868_v10 = vpack.c.bf16 %v1631_v14, %v1627_v9 }
 0x1a2   : > { %4307 = vset.pattern.permute.xlu1 %v7293_v21  ;;  %2342 = vperm.xlu0 %4300, %v6483_v46   ;;  %v1640_v18 = vld [vmem:[%s7231_s3 + $0x768] sm:$0xff]  ;;  %v1635_v24 = vld [vmem:[%s7231_s3 + $0x740] sm:$0xff]  ;;  %v1641_v44 = vld [vmem:[%s7231_s3 + $0x770] sm:$0xff] }
 0x1a3   : > { %3853 = vmatpush1.bf16.msra.mxu0 %v3852_v51  ;;  %3981 = vmatpush1.bf16.msra.mxu1 %v3980_v6  ;;  %v3994_v51 = vpack.c.bf16 %v1634_v49, %v1630_v20  ;;  %v1633_v6 = vld [vmem:[%s7231_s3 + $0x730] sm:$0xff]  ;;  %v1639_v60 = vld [vmem:[%s7231_s3 + $0x760] sm:$0xff]  ;;  %v3870_v12 = vpack.c.bf16 %v1640_v18, %v1636_v16  ;;  %v1644_v50 = vld [vmem:[%s7231_s3 + $0x788] sm:$0xff]  ;;  %v7296_v16 = vmov 3  }
 0x1a4   : > { %3855 = vmatprep.subr.bf16.mxu0 %v3854_v7  ;;  %3983 = vmatprep.subr.bf16.mxu1 %v3982_v15  ;;  %v1638_v7 = vld [vmem:[%s7231_s3 + $0x758] sm:$0xff]  ;;  %v3996_v40 = vpack.c.bf16 %v1633_v6, %v1629_v61  ;;  %v4328_v56 = vld [vmem:[%s7239_s11 + $0x10] sm:$0xff]  ;;  %v3872_v2 = vpack.c.bf16 %v1639_v60, %v1635_v24  ;;  %v1643_v27 = vld [vmem:[%s7231_s3 + $0x780] sm:$0xff] }
 0x1a5   : > { %2418 = vperm.xlu1 %4307, %v6513_v62   ;;  %v1642_v15 = vld [vmem:[%s7231_s3 + $0x778] sm:$0xff]  ;;  %v1647_v29 = vld [vmem:[%s7231_s3 + $0x7a0] sm:$0xff]  ;;  %v1645_v63 = vld [vmem:[%s7231_s3 + $0x790] sm:$0xff] }
 0x1a6   : > { %4309 = vset.pattern.permute.xlu0 %v7294_v5  ;;  %v1650_v35 = vld [vmem:[%s7231_s3 + $0x7b8] sm:$0xff]  ;;  %v1649_v42 = vld [vmem:[%s7231_s3 + $0x7b0] sm:$0xff]  ;;  %v6630_v33 = vld [vmem:[%s7239_s11 + $0x28] sm:$0xff]  ;;  %v3876_v32 = vpack.c.bf16 %v1647_v29, %v1643_v27 }
 0x1a7   : > { %3857 = vmatpush1.bf16.msra.mxu0 %v3856_v37  ;;  %3985 = vmatpush1.bf16.msra.mxu1 %v3984_v3  ;;  %v3998_v37 = vpack.c.bf16 %v1642_v15, %v1638_v7  ;;  %v1637_v3 = vld [vmem:[%s7231_s3 + $0x750] sm:$0xff]  ;;  %v1654_v28 = vld [vmem:[%s7231_s3 + $0x7d8] sm:$0xff]  ;;  %v4004_v20 = vpack.c.bf16 %v1649_v42, %v1645_v63  ;;  %v1651_v49 = vld [vmem:[%s7231_s3 + $0x7c0] sm:$0xff] }
 0x1a8   : > { %3859 = vmatprep.subr.bf16.mxu0 %v3858_v22  ;;  %3987 = vmatprep.subr.bf16.mxu1 %v3986_v26  ;;  %v1648_v22 = vld [vmem:[%s7231_s3 + $0x7a8] sm:$0xff]  ;;  %v1646_v26 = vld [vmem:[%s7231_s3 + $0x798] sm:$0xff]  ;;  %v4000_v47 = vpack.c.bf16 %v1641_v44, %v1637_v3  ;;  %v1657_v9 = vld [vmem:[%s7231_s3 + $0x7f0] sm:$0xff]  ;;  %v7297_v44 = vrot.slane %v5821_v17, 1 }
 0x1a9   : > { %4308 = vset.pattern.permute.xlu1 %v7294_v5  ;;  %2370 = vperm.xlu0 %4309, %v4327_v57   ;;  %v1658_v0 = vld [vmem:[%s7231_s3 + $0x7f8] sm:$0xff]  ;;  %v1655_v57 = vld [vmem:[%s7231_s3 + $0x7e0] sm:$0xff]  ;;  %v2461_v14 = vld [vmem:[#allocation3 + $0x80] sm:$0xff] }
 0x1aa   : > { %2378 = vperm.xlu1 %4308, %v6513_v62   ;;  %v2494_v61 = vld [vmem:[#allocation3 + $0x188] sm:$0xff]  ;;  %v1316_v6 = vld [vmem:[#allocation2] sm:$0xfe]  ;;  %v3880_v18 = vpack.c.bf16 %v1655_v57, %v1651_v49  ;;  %v2445_v24 = vld [vmem:[#allocation3] sm:$0xff] }
 0x1ab   : > { %3861 = vmatpush1.bf16.msra.mxu0 %v3860_v48  ;;  %3989 = vmatpush1.bf16.msra.mxu1 %v3988_v59  ;;  %v3874_v48 = vpack.c.bf16 %v1648_v22, %v1644_v50  ;;  %v4002_v59 = vpack.c.bf16 %v1650_v35, %v1646_v26  ;;  %v2446_v60 = vld [vmem:[#allocation3 + $0x8] sm:$0xff]  ;;  %v6656_v22 = vld [vmem:[%s7239_s11 + $0x30] sm:$0xff]  ;;  %v2463_v26 = vld [vmem:[#allocation3 + $0x90] sm:$0xff] }
 0x1ac   : > { %3863 = vmatprep.subr.bf16.mxu0 %v3862_v30  ;;  %3991 = vmatprep.subr.bf16.mxu1 %v3990_v52  ;;  %v1652_v30 = vld [vmem:[%s7231_s3 + $0x7c8] sm:$0xff]  ;;  %v4012_v3 = vpack.c.bf16 %v2446_v60, %v2445_v24  ;;  %v2447_v27 = vld [vmem:[#allocation3 + $0x10] sm:$0xff]  ;;  %v2454_v60 = vld [vmem:[#allocation3 + $0x48] sm:$0xff] }
 0x1ad   : > { %2382 = vperm.xlu0 %4309, %v6483_v46   ;;  %v1656_v52 = vld [vmem:[%s7231_s3 + $0x7e8] sm:$0xff]  ;;  %v2467_v49 = vld [vmem:[#allocation3 + $0xb0] sm:$0xff] }
 0x1ae   : > { %4310 = vset.pattern.permute.xlu1 %v7295_v13  ;;  %v2464_v35 = vld [vmem:[#allocation3 + $0x98] sm:$0xff] }
 0x1af   : > { %3865 = vmatpush1.bf16.msra.mxu0 %v3864_v54  ;;  %3993 = vmatpush1.bf16.msra.mxu1 %v3992_v23  ;;  %v4006_v54 = vpack.c.bf16 %v1658_v0, %v1654_v28  ;;  %v1653_v23 = vld [vmem:[%s7231_s3 + $0x7d0] sm:$0xff]  ;;  %v4014_v17 = vpack.c.bf16 %v2464_v35, %v2463_v26  ;;  %v2448_v29 = vld [vmem:[#allocation3 + $0x18] sm:$0xff]  ;;  %v2498_v28 = vld [vmem:[#allocation3 + $0x1a8] sm:$0xff] }
 0x1b0   : > { %3867 = vmatprep.subr.bf16.mxu0 %v3866_v38  ;;  %3995 = vmatprep.subr.bf16.mxu1 %v3994_v51  ;;  %v2462_v38 = vld [vmem:[#allocation3 + $0x88] sm:$0xff]  ;;  %v2493_v51 = vld [vmem:[#allocation3 + $0x180] sm:$0xff]  ;;  %v4008_v7 = vpack.c.bf16 %v1657_v9, %v1653_v23  ;;  %v4016_v63 = vpack.c.bf16 %v2448_v29, %v2447_v27  ;;  %v2468_v57 = vld [vmem:[#allocation3 + $0xb8] sm:$0xff] }
 0x1b1   : > { %2302 = vperm.xlu1 %4310, %v6483_v46   ;;  %4312 = vset.pattern.permute.xlu0 %v7293_v21  ;;  %v4010_v15 = vpack.c.bf16 %v2462_v38, %v2461_v14  ;;  %v2450_v0 = vld [vmem:[#allocation3 + $0x28] sm:$0xff]  ;;  %v4022_v9 = vpack.c.bf16 %v2468_v57, %v2467_v49  ;;  %v2451_v38 = vld [vmem:[#allocation3 + $0x30] sm:$0xff]  ;;  %v2472_v36 = vld [vmem:[#allocation3 + $0xd8] sm:$0xff] }
 0x1b2   : > { %2414 = vperm.xlu0 %4312, %v4328_v56   ;;  %v2495_v56 = vld [vmem:[#allocation3 + $0x190] sm:$0xff]  ;;  %v2456_v35 = vld [vmem:[#allocation3 + $0x58] sm:$0xff]  ;;  %v2474_v29 = vld [vmem:[#allocation3 + $0xe8] sm:$0xff] }
 0x1b3   : > { %3869 = vmatpush1.bf16.msra.mxu0 %v3868_v10  ;;  %3997 = vmatpush1.bf16.msra.mxu1 %v3996_v40  ;;  %v4042_v10 = vpack.c.bf16 %v2494_v61, %v2493_v51  ;;  %v1353_v40 = vrot.slane %v1316_v6, 1  ;;  %v2452_v51 = vld [vmem:[#allocation3 + $0x38] sm:$0xff]  ;;  %v2469_v6 = vld [vmem:[#allocation3 + $0xc0] sm:$0xff]  ;;  %v2455_v26 = vld [vmem:[#allocation3 + $0x50] sm:$0xff] }
 0x1b4   : > { %3871 = vmatprep.subr.bf16.mxu0 %v3870_v12  ;;  %3999 = vmatprep.subr.bf16.mxu1 %v3998_v37  ;;  %v2477_v12 = vld [vmem:[#allocation3 + $0x100] sm:$0xff]  ;;  %v2478_v37 = vld [vmem:[#allocation3 + $0x108] sm:$0xff]  ;;  %v2459_v49 = vld [vmem:[#allocation3 + $0x70] sm:$0xff] }
 0x1b5   : > { %4311 = vset.pattern.permute.xlu1 %v7293_v21  ;;  %v1355_v50 = vsel %vm1352_vm1, %v1353_v40, %v7297_v44  ;;  %v7298_v44 = vrot.slane %v5892_v31, 1  ;;  %v2471_v31 = vld [vmem:[#allocation3 + $0xd0] sm:$0xff]  ;;  %v2460_v57 = vld [vmem:[#allocation3 + $0x78] sm:$0xff] }
 0x1b6   : > { %2422 = vperm.xlu1 %4311, %v6483_v46   ;;  %2426 = vperm.xlu0 %4312, %v6630_v33   ;;  %v3878_v46 = vpack.c.bf16 %v1656_v52, %v1652_v30  ;;  %v2497_v52 = vld [vmem:[#allocation3 + $0x1a0] sm:$0xff] }
 0x1b7   : > { %3873 = vmatpush1.bf16.msra.mxu0 %v3872_v2  ;;  %4001 = vmatpush1.bf16.msra.mxu1 %v4000_v47  ;;  %v2496_v2 = vld [vmem:[#allocation3 + $0x198] sm:$0xff] }
 0x1b8   : > { %3875 = vmatprep.subr.bf16.mxu0 %v3874_v48  ;;  %4003 = vmatprep.subr.bf16.mxu1 %v4002_v59  ;;  %v4046_v47 = vpack.c.bf16 %v2496_v2, %v2495_v56  ;;  %v2465_v48 = vld [vmem:[#allocation3 + $0xa0] sm:$0xff]  ;;  %v2466_v59 = vld [vmem:[#allocation3 + $0xa8] sm:$0xff]  ;;  %v4032_v56 = vpack.c.bf16 %v2456_v35, %v2455_v26  ;;  %v2487_v2 = vld [vmem:[#allocation3 + $0x150] sm:$0xff] }
 0x1b9   : > { %v4018_v30 = vpack.c.bf16 %v2466_v59, %v2465_v48  ;;  %v2457_v48 = vld [vmem:[#allocation3 + $0x60] sm:$0xff]  ;;  %v2458_v59 = vld [vmem:[#allocation3 + $0x68] sm:$0xff] }
 0x1ba   : > { %4313 = vset.pattern.permute.xlu1 %v7296_v16  ;;  %4315 = vset.pattern.permute.xlu0 %v7295_v13 }
 0x1bb   : > { %3877 = vmatpush1.bf16.msra.mxu0 %v3876_v32  ;;  %4005 = vmatpush1.bf16.msra.mxu1 %v4004_v20  ;;  %v2482_v20 = vld [vmem:[#allocation3 + $0x128] sm:$0xff] }
 0x1bc   : > { %3879 = vmatprep.subr.bf16.mxu0 %v3878_v46  ;;  %4007 = vmatprep.subr.bf16.mxu1 %v4006_v54  ;;  %v2500_v46 = vld [vmem:[#allocation3 + $0x1b8] sm:$0xff]  ;;  %v1332_v54 = vld [vmem:[#allocation2 + $0x80] sm:$0x1] }
 0x1bd   : > { %2346 = vperm.xlu1 %4313, %v6630_v33   ;;  %2298 = vperm.xlu0 %4315, %v6513_v62   ;;  %v4044_v62 = vpack.c.bf16 %v2478_v37, %v2477_v12  ;;  %v2485_v12 = vld [vmem:[#allocation3 + $0x140] sm:$0xff]  ;;  %v2486_v37 = vld [vmem:[#allocation3 + $0x148] sm:$0xff] }
 0x1bf   : > { %3881 = vmatpush1.bf16.msra.mxu0 %v3880_v18  ;;  %4009 = vmatpush1.bf16.msra.mxu1 %v4008_v7  ;;  %v4024_v18 = vpack.c.bf16 %v2452_v51, %v2451_v38  ;;  %v2501_v7 = vld [vmem:[#allocation3 + $0x1c0] sm:$0xff]  ;;  %v2526_v38 = vld [vmem:[#allocation3 + $0x288] sm:$0xff] }
 0x1c0   : > { %4011 = vmatprep.subr.bf16.mxu0 %v4010_v15  ;;  %4043 = vmatprep.subr.bf16.mxu1 %v4042_v10  ;;  %v2502_v15 = vld [vmem:[#allocation3 + $0x1c8] sm:$0xff]  ;;  %v1383_v10 = vrot.slane %v1332_v54, 1  ;;  %v2492_v54 = vld [vmem:[#allocation3 + $0x178] sm:$0xff] }
 0x1c1   : > { %4314 = vset.pattern.permute.xlu1 %v7295_v13  ;;  %2310 = vperm.xlu0 %4315, %v6656_v22  }
 0x1c2   : > { %1859 = vmatmul.mubr.f32.vlgmr.msra.gmra.mrb[32].mxu0 %v1355_v50  ;;  %2085 = vmatmul.mubr.f32.vlgmr.msra.gmra.mrb[32].mxu1 %v1355_v50  ;;  %v1384_v50 = vsel %vm1352_vm1, %v7298_v44, %v1383_v10 }
 0x1c3   : > { %1864 = vmatprep.mubr.f32.mxu0 %v6278_v39  ;;  %2090 = vmatprep.mubr.f32.mxu1 %v6278_v39  ;;  %v6671_v39 = vld [vmem:[%s7239_s11 + $0x38] sm:$0xff] }
 0x1c4   : > { %2306 = vperm.xlu1 %4314, %v6630_v33   ;;  %4013 = vmatpush3.bf16.msra.mxu0 %v4012_v3  ;;  %v4058_v3 = vpack.c.bf16 %v2502_v15, %v2501_v7 }
 0x1c5   : > { %4320 = vset.pattern.permute.xlu0 %v7296_v16  ;;  %4045 = vmatpush3.bf16.msra.mxu1 %v4044_v62  ;;  %v2504_v62 = vld [vmem:[#allocation3 + $0x1d8] sm:$0xff] }
 0x1c6   : > { %1865 = vmatmul.mubr.f32.gmra.mrb[34].mxu0 %v5852_v8  ;;  %2091 = vmatmul.mubr.f32.gmra.mrb[34].mxu1 %v5852_v8  ;;  %v2479_v8 = vld [vmem:[#allocation3 + $0x110] sm:$0xff] }
 0x1c7   : > { %1870 = vmatprep.mubr.f32.mxu0 %v6324_v55  ;;  %2096 = vmatprep.mubr.f32.mxu1 %v6324_v55  ;;  %v2480_v55 = vld [vmem:[#allocation3 + $0x118] sm:$0xff]  ;;  %v6732_v15 = vpop.permute.xlu0 %2246 }
 0x1c8   : > { %4316 = vset.pattern.permute.xlu1 %v7294_v5  ;;  %2354 = vperm.xlu0 %4320, %v6671_v39   ;;  %v4048_v42 = vpack.c.bf16 %v2480_v55, %v2479_v8  ;;  %v2506_v55 = vld [vmem:[#allocation3 + $0x1e8] sm:$0xff] }
 0x1c9   : > { %2386 = vperm.xlu1 %4316, %v6630_v33   ;;  %4015 = vmatprep.subr.bf16.mxu0 %v4014_v17  ;;  %v2481_v33 = vld [vmem:[#allocation3 + $0x120] sm:$0xff] }
 0x1ca   : > { %1871 = vmatmul.mubr.f32.gmra.mrb[36].mxu0 %v5862_v25  ;;  %2097 = vmatmul.mubr.f32.gmra.mrb[36].mxu1 %v5862_v25  ;;  %v2449_v25 = vld [vmem:[#allocation3 + $0x20] sm:$0xff]  ;;  %v4052_v23 = vpack.c.bf16 %v2482_v20, %v2481_v33  ;;  %v2508_v20 = vld [vmem:[#allocation3 + $0x1f8] sm:$0xff] }
 0x1cb   : > { %1876 = vmatprep.mubr.f32.mxu0 %v6376_v4  ;;  %2102 = vmatprep.mubr.f32.mxu1 %v6376_v4  ;;  %v4050_v4 = vpack.c.bf16 %v2498_v28, %v2497_v52  ;;  %v4020_v32 = vpack.c.bf16 %v2450_v0, %v2449_v25  ;;  %v2490_v52 = vld [vmem:[#allocation3 + $0x168] sm:$0xff]  ;;  %v2475_v25 = vld [vmem:[#allocation3 + $0xf0] sm:$0xff]  ;;  %v2476_v0 = vld [vmem:[#allocation3 + $0xf8] sm:$0xff] }
 0x1cc   : > { %4323 = vset.pattern.permute.xlu0 %v7294_v5  ;;  %4047 = vmatprep.subr.bf16.mxu1 %v4046_v47  ;;  %v2488_v47 = vld [vmem:[#allocation3 + $0x158] sm:$0xff] }
 0x1cd   : > { %4317 = vset.pattern.permute.xlu1 %v7296_v16  ;;  %2394 = vperm.xlu0 %4323, %v6671_v39   ;;  %v2470_v16 = vld [vmem:[#allocation3 + $0xc8] sm:$0xff]  ;;  %v4064_v27 = vpack.c.bf16 %v2488_v47, %v2487_v2  ;;  %v1659_v2 = vld [vmem:[%s7232_s4] sm:$0xf]  ;;  %v7312_v47 = vsub.s32 0, %v5738_v19 }
 0x1ce   : > { %1877 = vmatmul.mubr.f32.gmra.mrb[38].mxu0 %v5875_v58  ;;  %2103 = vmatmul.mubr.f32.gmra.mrb[38].mxu1 %v5875_v58  ;;  %v2499_v58 = vld [vmem:[#allocation3 + $0x1b0] sm:$0xff]  ;;  %v4026_v24 = vpack.c.bf16 %v2470_v16, %v2469_v6 }
 0x1cf   : > { %1882 = vmatprep.mubr.f32.mxu0 %v6397_v41  ;;  %2108 = vmatprep.mubr.f32.mxu1 %v6397_v41  ;;  %v1333_v41 = vld [vmem:[#allocation2 + $0x88] sm:$0x1]  ;;  %v4054_v14 = vpack.c.bf16 %v2500_v46, %v2499_v58  ;;  %v4040_v46 = vpack.c.bf16 %v2460_v57, %v2459_v49  ;;  %v6811_v57 = vld [vmem:[#allocation3 + $0x210] sm:$0xff] }
 0x1d0   : > { %2350 = vperm.xlu1 %4317, %v6656_v22   ;;  %4017 = vmatpush3.bf16.msra.mxu0 %v4016_v63  ;;  %v1385_v61 = vrot.slane %v1333_v41, 1  ;;  %v2491_v41 = vld [vmem:[#allocation3 + $0x170] sm:$0xff] }
 0x1d1   : > { %4049 = vmatpush3.bf16.msra.mxu1 %v4048_v42  ;;  %4019 = vmatprep.subr.bf16.mxu0 %v4018_v30  ;;  %v4036_v42 = vpack.c.bf16 %v2458_v59, %v2457_v48  ;;  %v2489_v30 = vld [vmem:[#allocation3 + $0x160] sm:$0xff]  ;;  %v7317_v59 = vsub.s32 3, %v5738_v19 }
 0x1d2   : > { %1883 = vmatmul.mubr.f32.gmra.mrb[40].mxu0 %v5887_v34  ;;  %2109 = vmatmul.mubr.f32.gmra.mrb[40].mxu1 %v5887_v34  ;;  %v2483_v34 = vld [vmem:[#allocation3 + $0x130] sm:$0xff]  ;;  %v4068_v28 = vpack.c.bf16 %v2490_v52, %v2489_v30 }
 0x1d3   : > { %1888 = vmatprep.mubr.f32.mxu0 %v6422_v53  ;;  %2114 = vmatprep.mubr.f32.mxu1 %v6422_v53  ;;  %v2484_v53 = vld [vmem:[#allocation3 + $0x138] sm:$0xff] }
 0x1d4   : > { %4318 = vset.pattern.permute.xlu1 %v7293_v21  ;;  %4051 = vmatprep.subr.bf16.mxu1 %v4050_v4  ;;  %v4056_v40 = vpack.c.bf16 %v2484_v53, %v2483_v34  ;;  %v2507_v4 = vld [vmem:[#allocation3 + $0x1f0] sm:$0xff] }
 0x1d5   : > { %2430 = vperm.xlu1 %4318, %v6656_v22   ;;  %4021 = vmatpush3.bf16.msra.mxu0 %v4020_v32  ;;  %v4038_v32 = vpack.c.bf16 %v2476_v0, %v2475_v25  ;;  %v4070_v58 = vpack.c.bf16 %v2508_v20, %v2507_v4  ;;  %v6805_v25 = vld [vmem:[#allocation3 + $0x290] sm:$0xff]  ;;  %v6807_v0 = vld [vmem:[#allocation3 + $0x298] sm:$0xff] }
 0x1d6   : > { %1889 = vmatmul.mubr.f32.gmra.mrb[42].mxu0 %v5895_v45  ;;  %2115 = vmatmul.mubr.f32.gmra.mrb[42].mxu1 %v5895_v45  ;;  %v2453_v45 = vld [vmem:[#allocation3 + $0x40] sm:$0xff] }
 0x1d7   : > { %1894 = vmatprep.mubr.f32.mxu0 %v6459_v1  ;;  %2120 = vmatprep.mubr.f32.mxu1 %v6459_v1  ;;  %v1386_v1 = vsel %vm1352_vm1, %v1381_v43, %v1385_v61  ;;  %v2503_v43 = vld [vmem:[#allocation3 + $0x1d0] sm:$0xff] }
 0x1d8   : > { %4053 = vmatpush3.bf16.msra.mxu1 %v4052_v23  ;;  %4023 = vmatprep.subr.bf16.mxu0 %v4022_v9  ;;  %v4062_v17 = vpack.c.bf16 %v2504_v62, %v2503_v43  ;;  %v4072_v23 = vpack.c.bf16 %v2492_v54, %v2491_v41  ;;  %v6819_v54 = vld [vmem:[#allocation3 + $0x2a8] sm:$0xff] }
 0x1d9   : > { %4319 = vset.pattern.permute.xlu1 %v7294_v5  ;;  %4055 = vmatprep.subr.bf16.mxu1 %v4054_v14  ;;  %v4028_v5 = vpack.c.bf16 %v2454_v60, %v2453_v45  ;;  %v2525_v14 = vld [vmem:[#allocation3 + $0x280] sm:$0xff] }
 0x1da   : > { %1895 = vmatmul.mubr.f32.gmra.mrb[44].mxu0 %v5904_v11  ;;  %2121 = vmatmul.mubr.f32.gmra.mrb[44].mxu1 %v5904_v11  ;;  %v4060_v11 = vpack.c.bf16 %v2486_v37, %v2485_v12  ;;  %v4074_v51 = vpack.c.bf16 %v2526_v38, %v2525_v14  ;;  %v6823_v14 = vld [vmem:[#allocation3 + $0x228] sm:$0xff] }
 0x1db   : > { %1900 = vmatprep.mubr.f32.mxu0 %v1386_v1  ;;  %2126 = vmatprep.mubr.f32.mxu1 %v1386_v1 }
 0x1dc   : > { %2390 = vperm.xlu1 %4319, %v6656_v22   ;;  %4025 = vmatpush3.bf16.msra.mxu0 %v4024_v18  ;;  %v4030_v22 = vpack.c.bf16 %v2472_v36, %v2471_v31 }
 0x1dd   : > { %4057 = vmatpush3.bf16.msra.mxu1 %v4056_v40  ;;  %4027 = vmatprep.subr.bf16.mxu0 %v4026_v24  ;;  %v6736_v40 = vpop.permute.xlu0 %2199 }
 0x1de   : > { %1901 = vmatmul.mubr.f32.gmra.mrb[46].mxu0 %v1384_v50  ;;  %2127 = vmatmul.mubr.f32.gmra.mrb[46].mxu1 %v1384_v50 }
 0x1df   : > { %4059 = vmatprep.subr.bf16.mxu1 %v4058_v3  ;;  %4324 = vset.pattern.permute.xlu0 %v7293_v21 }
 0x1e0   : > { %4321 = vset.pattern.permute.xlu1 %v7295_v13  ;;  %4029 = vmatpush3.bf16.msra.mxu0 %v4028_v5  ;;  %v6712_v13 = vpop.permute.xlu1 %2250 }
 0x1e1   : > { %2314 = vperm.xlu1 %4321, %v6671_v39   ;;  %4061 = vmatpush3.bf16.msra.mxu1 %v4060_v11  ;;  %v6740_v45 = vpop.permute.xlu0 %2209 }
 0x1e2   : > { %4031 = vmatprep.subr.bf16.mxu0 %v4030_v22  ;;  %4063 = vmatprep.subr.bf16.mxu1 %v4062_v17 }
 0x1e4   : > { %4033 = vmatpush3.bf16.msra.mxu0 %v4032_v56  ;;  %v6714_v33 = vpop.permute.xlu1 %2204 }
 0x1e5   : > { %4322 = vset.pattern.permute.xlu1 %v7293_v21  ;;  %v2473_v21 = vld [vmem:[#allocation3 + $0xe0] sm:$0xff]  ;;  %4065 = vmatpush3.bf16.msra.mxu1 %v4064_v27  ;;  %v6744_v1 = vpop.permute.xlu0 %2214  ;;  %v6783_v27 = vrot.slane %v1659_v2, %v7312_v47 }
 0x1e6   : > { %2434 = vperm.xlu1 %4322, %v6671_v39   ;;  %v2505_v39 = vld [vmem:[#allocation3 + $0x1e0] sm:$0xff]  ;;  %v4034_v8 = vpack.c.bf16 %v2474_v29, %v2473_v21  ;;  %v7313_v21 = vsub.s32 2, %v5738_v19 }
 0x1e7   : > { %v4066_v63 = vpack.c.bf16 %v2506_v55, %v2505_v39  ;;  %v7316_v55 = vsub.s32 1, %v5738_v19  ;;  %v6813_v19 = vld [vmem:[#allocation3 + $0x218] sm:$0xff] }
 0x1e8   : > { %4035 = vmatprep.subr.bf16.mxu0 %v4034_v8  ;;  %v6716_v9 = vpop.permute.xlu1 %2254  ;;  %v6787_v29 = vrot.slane %v1659_v2, %v7313_v21 }
 0x1e9   : > { %4067 = vmatprep.subr.bf16.mxu1 %v4066_v63  ;;  %4037 = vmatpush3.bf16.msra.mxu0 %v4036_v42  ;;  %v6748_v37 = vpop.permute.xlu0 %2219  ;;  %v6795_v48 = vrot.slane %v1659_v2, %v7316_v55  ;;  %v6799_v63 = vrot.slane %v1659_v2, %v7317_v59  ;;  %v6801_v42 = vld [vmem:[#allocation3 + $0x200] sm:$0xff]  ;;  %v6831_v55 = vld [vmem:[#allocation3 + $0x2b0] sm:$0xff]  ;;  %v6833_v59 = vld [vmem:[#allocation3 + $0x2b8] sm:$0xff] }
 0x1ea   : > { %4069 = vmatpush3.bf16.msra.mxu1 %v4068_v28  ;;  %4039 = vmatprep.subr.bf16.mxu0 %v4038_v32  ;;  %v6803_v28 = vld [vmem:[#allocation3 + $0x208] sm:$0xff] }
 0x1eb   : > { %4071 = vmatprep.subr.bf16.mxu1 %v4070_v58  ;;  %v6815_v58 = vld [vmem:[#allocation3 + $0x2a0] sm:$0xff] }
 0x1ec   : > { %v6718_v34 = vpop.permute.xlu1 %2258 }
 0x1ed   : > { %4041 = vmatpush3.bf16.msra.mxu0 %v4040_v46  ;;  %v6752_v5 = vpop.permute.xlu0 %2224 }
 0x1ee   : > { %4073 = vmatpush3.bf16.msra.mxu1 %v4072_v23  ;;  %4075 = vmatprep.subr.bf16.mxu0 %v4074_v51  ;;  %7304 = vst [vmem:[#allocation17_spill] sm:$0xff] %v6752_v5  ;;  %v6821_v23 = vld [vmem:[#allocation3 + $0x220] sm:$0xff] }
 0x1f0   : > { %v6720_v61 = vpop.permute.xlu1 %2262 }
 0x1f1   : > { %v6756_v50 = vpop.permute.xlu0 %2229 }
 0x1f2   : > { %7306 = vst [vmem:[#allocation19_spill] sm:$0xff] %v6756_v50 }
 0x1f4   : > { %v6722_v53 = vpop.permute.xlu1 %2266 }
 0x1f5   : > { %v6760_v31 = vpop.permute.xlu0 %2234 }
 0x1f6   : > { %7307 = vst [vmem:[#allocation20_spill] sm:$0xff] %v6760_v31  ;;  %v6859_v31 = vld [vmem:[#allocation3 + $0x2d0] sm:$0xff] }
 0x1f8   : > { %v6724_v6 = vpop.permute.xlu1 %2270 }
 0x1f9   : > { %7299 = vst [vmem:[#allocation12_spill] sm:$0xff] %v6724_v6  ;;  %v6764_v43 = vpop.permute.xlu0 %2286 }
 0x1fc   : > { %v6726_v16 = vpop.permute.xlu1 %2274 }
 0x1fd   : > { %7300 = vst [vmem:[#allocation13_spill] sm:$0xff] %v6726_v16  ;;  %v6768_v62 = vpop.permute.xlu0 %2330 }
 0x200   : > { %v6728_v18 = vpop.permute.xlu1 %2326 }
 0x204   : > { %v6730_v7 = vpop.permute.xlu1 %2406 }
 0x205   : > { %7301 = vst [vmem:[#allocation14_spill] sm:$0xff] %v6730_v7  ;;  %v6857_v7 = vld [vmem:[#allocation3 + $0x248] sm:$0xff] }
 0x208   : > { %v6734_v10 = vpop.permute.xlu1 %2366 }
 0x209   : > { %7302 = vst [vmem:[#allocation15_spill] sm:$0xff] %v6734_v10 }
 0x20c   : > { %v6738_v24 = vpop.permute.xlu1 %2290 }
 0x210   : > { %v6742_v60 = vpop.permute.xlu1 %2410 }
 0x211   : > { %7303 = vst [vmem:[#allocation16_spill] sm:$0xff] %v6742_v60 }
 0x214   : > { %v6746_v12 = vpop.permute.xlu1 %2334 }
 0x218   : > { %v6750_v3 = vpop.permute.xlu1 %2294 }
 0x21c   : > { %v6754_v44 = vpop.permute.xlu1 %2374 }
 0x21d   : > { %7305 = vst [vmem:[#allocation18_spill] sm:$0xff] %v6754_v44 }
 0x220   : > { %v6758_v11 = vpop.permute.xlu1 %2338 }
 0x221   : > { %v6772_v35 = vpop.permute.xlu0 %2342 }
 0x224   : > { %v6762_v36 = vpop.permute.xlu1 %2418 }
 0x225   : > { %7308 = vst [vmem:[#allocation21_spill] sm:$0xff] %v6762_v36 }
 0x228   : > { %v6776_v56 = vpop.permute.xlu0 %2370 }
 0x229   : > { %v6766_v22 = vpop.permute.xlu1 %2378  ;;  %7311 = vst [vmem:[#allocation24_spill] sm:$0xff] %v6776_v56 }
 0x22a   : > { %7309 = vst [vmem:[#allocation22_spill] sm:$0xff] %v6766_v22 }
 0x22c   : > { %v6791_v8 = vpop.permute.xlu0 %2382 }
 0x22d   : > { %7315 = vst [vmem:[#allocation26_spill] sm:$0xff] %v6791_v8  ;;  %v6849_v8 = vld [vmem:[#allocation3 + $0x2c0] sm:$0xff] }
 0x230   : > { %v6770_v26 = vpop.permute.xlu1 %2302 }
 0x231   : > { %v6827_v47 = vpop.permute.xlu0 %2414 }
 0x232   : > { %7319 = vst [vmem:[#allocation28_spill] sm:$0xff] %v6827_v47  ;;  %v6851_v47 = vld [vmem:[#allocation3 + $0x2c8] sm:$0xff] }
 0x235   : > { %v6774_v17 = vpop.permute.xlu1 %2422  ;;  %v6885_v60 = vpop.permute.xlu0 %2426 }
 0x236   : > { %7310 = vst [vmem:[#allocation23_spill] sm:$0xff] %v6774_v17  ;;  %v6841_v17 = vld [vmem:[#allocation3 + $0x238] sm:$0xff] }
 0x23c   : > { %v6789_v39 = vpop.permute.xlu1 %2346 }
 0x23d   : > { %7314 = vst [vmem:[#allocation25_spill] sm:$0xff] %v6789_v39 }
 0x243   : > { %v6825_v2 = vpop.permute.xlu1 %2306 }
 0x244   : > { %7318 = vst [vmem:[#allocation27_spill] sm:$0xff] %v6825_v2 }
 0x248   : > { %v6883_v39 = vpop.permute.xlu1 %2386 }
 0x295   : > { %v1860_v30 = vpop.f32.mrb[32].mxu0  ;;  %v2086_v52 = vpop.f32.mrb[32].mxu1 }
 0x296   : > { %v4166_v4 = vadd.f32 %v1860_v30, %v6783_v27  ;;  %v4182_v32 = vadd.f32 %v2086_v52, %v6787_v29  ;;  %v1862_v20 = vpop.f32.mrb[33].mxu0  ;;  %v2088_v49 = vpop.f32.mrb[33].mxu1 }
 0x297   : > { %v4167_v46 = vadd.f32 %v1862_v20, %v6795_v48  ;;  %v4183_v41 = vadd.f32 %v2088_v49, %v6799_v63 }
 0x298   : > { %v2133_v38 = vmax.f32 %v4166_v4, 0.0  ;;  %v2135_v51 = vmax.f32 %v4182_v32, 0.0  ;;  %v6839_v32 = vld [vmem:[#allocation3 + $0x230] sm:$0xff]  ;;  %v6853_v4 = vld [vmem:[#allocation3 + $0x240] sm:$0xff] }
 0x299   : > { %v2134_v30 = vmax.f32 %v4167_v46, 0.0  ;;  %v2136_v52 = vmax.f32 %v4183_v41, 0.0  ;;  %v1866_v20 = vpop.f32.mrb[34].mxu0  ;;  %v2092_v49 = vpop.f32.mrb[34].mxu1  ;;  %7320 = vst [vmem:[#allocation29_spill] sm:$0xff] %v6853_v4  ;;  %v6861_v46 = vld [vmem:[#allocation3 + $0x2d8] sm:$0xff] }
 0x29a   : > { %v4168_v21 = vadd.f32 %v1866_v20, %v6783_v27  ;;  %v4184_v22 = vadd.f32 %v2092_v49, %v6787_v29  ;;  %v1868_v36 = vpop.f32.mrb[35].mxu0  ;;  %v2094_v44 = vpop.f32.mrb[35].mxu1 }
 0x29b   : > { %v2165_v56 = vmax.f32 %v2133_v38, %v2134_v30  ;;  %v2173_v10 = vmax.f32 %v2135_v51, %v2136_v52  ;;  %v4169_v20 = vadd.f32 %v1868_v36, %v6795_v48  ;;  %v4185_v49 = vadd.f32 %v2094_v44, %v6799_v63 }
 0x29c   : > { %v2137_v16 = vmax.f32 %v4168_v21, 0.0  ;;  %v2139_v41 = vmax.f32 %v4184_v22, 0.0 }
 0x29d   : > { %v6867_v38 = vmax.f32 %v2165_v56, %v2173_v10  ;;  %v2138_v51 = vmax.f32 %v4169_v20, 0.0  ;;  %v2140_v36 = vmax.f32 %v4185_v49, 0.0  ;;  %v1872_v30 = vpop.f32.mrb[36].mxu0  ;;  %v2098_v44 = vpop.f32.mrb[36].mxu1 }
 0x29e   : > { %v4170_v6 = vadd.f32 %v1872_v30, %v6783_v27  ;;  %v4186_v21 = vadd.f32 %v2098_v44, %v6787_v29  ;;  %v1874_v22 = vpop.f32.mrb[37].mxu0  ;;  %v2100_v2 = vpop.f32.mrb[37].mxu1 }
 0x29f   : > { %v2166_v56 = vmax.f32 %v2137_v16, %v2138_v51  ;;  %v2174_v20 = vmax.f32 %v2139_v41, %v2140_v36  ;;  %v4171_v49 = vadd.f32 %v1874_v22, %v6795_v48  ;;  %v4187_v50 = vadd.f32 %v2100_v2, %v6799_v63 }
 0x2a0   : > { %v2141_v5 = vmax.f32 %v4170_v6, 0.0  ;;  %v2143_v52 = vmax.f32 %v4186_v21, 0.0  ;;  %v2277_v30 = vmul.f32 %v6732_v15, %v6867_v38  ;;  %v2357_v44 = vmul.f32 %v6728_v18, %v6867_v38 }
 0x2a1   : > { %v6887_v4 = vmax.f32 %v2166_v56, %v2174_v20  ;;  %v2142_v16 = vmax.f32 %v4171_v49, 0.0  ;;  %v2144_v41 = vmax.f32 %v4187_v50, 0.0  ;;  %v1878_v51 = vpop.f32.mrb[38].mxu0  ;;  %v2104_v36 = vpop.f32.mrb[38].mxu1  ;;  %v2237_v6 = vmul.f32 %v6736_v40, %v6867_v38 }
 0x2a2   : > { %v4172_v2 = vadd.f32 %v1878_v51, %v6783_v27  ;;  %v4188_v15 = vadd.f32 %v2104_v36, %v6787_v29  ;;  %2605 = vmatprep.mubr.f32.mxu0 %v2277_v30  ;;  %2710 = vmatprep.mubr.f32.mxu1 %v2357_v44  ;;  %v1880_v18 = vpop.f32.mrb[39].mxu0  ;;  %v2106_v21 = vpop.f32.mrb[39].mxu1  ;;  %v2317_v22 = vmul.f32 %v6764_v43, %v6867_v38 }
 0x2a3   : > { %v2167_v56 = vmax.f32 %v2141_v5, %v2142_v16  ;;  %v2175_v20 = vmax.f32 %v2143_v52, %v2144_v41  ;;  %v4173_v50 = vadd.f32 %v1880_v18, %v6795_v48  ;;  %v4189_v49 = vadd.f32 %v2106_v21, %v6799_v63  ;;  %2606 = vmatmul.mubr.f32.vlgmr.msra.gmra.mrb[48].mxu0 %v2237_v6  ;;  %v6904_v5 = vld [vmem:[#allocation3 + $0x250] sm:$0xff]  ;;  %v6906_v52 = vld [vmem:[#allocation3 + $0x258] sm:$0xff] }
 0x2a4   : > { %v2145_v10 = vmax.f32 %v4172_v2, 0.0  ;;  %v2147_v40 = vmax.f32 %v4188_v15, 0.0  ;;  %2711 = vmatmul.mubr.f32.vlgmr.msra.gmra.mrb[48].mxu1 %v2317_v22  ;;  %v7321_v51 = vpack.c.bf16 %v6803_v28, %v6801_v42  ;;  %v2278_v30 = vmul.f32 %v6712_v13, %v6887_v4 }
 0x2a5   : > { %v2358_v43 = vmul.f32 %v6768_v62, %v6887_v4  ;;  %v6908_v44 = vmax.f32 %v2167_v56, %v2175_v20  ;;  %v2146_v16 = vmax.f32 %v4173_v50, 0.0  ;;  %v2148_v41 = vmax.f32 %v4189_v49, 0.0  ;;  %v1884_v36 = vpop.f32.mrb[40].mxu0  ;;  %v2110_v6 = vpop.f32.mrb[40].mxu1 }
 0x2a6   : > { %4077 = vmatpush3.bf16.msra.mxu0 %v7321_v51  ;;  %v2238_v42 = vmul.f32 %v6714_v33, %v6887_v4  ;;  %v7322_v28 = vpack.c.bf16 %v6807_v0, %v6805_v25  ;;  %v4174_v13 = vadd.f32 %v1884_v36, %v6783_v27  ;;  %v4190_v62 = vadd.f32 %v2110_v6, %v6787_v29  ;;  %v1886_v2 = vpop.f32.mrb[41].mxu0  ;;  %v2112_v15 = vpop.f32.mrb[41].mxu1 }
 0x2a7   : > { %2610 = vmatprep.mubr.f32.mxu0 %v2278_v30  ;;  %2715 = vmatprep.mubr.f32.mxu1 %v2358_v43  ;;  %v2318_v18 = vmul.f32 %v6738_v24, %v6887_v4  ;;  %v2168_v21 = vmax.f32 %v2145_v10, %v2146_v16  ;;  %v2176_v22 = vmax.f32 %v2147_v40, %v2148_v41  ;;  %v6928_v10 = vpop.permute.xlu1 %2350  ;;  %v2299_v49 = vpop.permute.xlu0 %2298 }
 0x2a8   : > { %4079 = vmatprep.subr.bf16.mxu0 %v7322_v28  ;;  %v4175_v56 = vadd.f32 %v1886_v2, %v6795_v48  ;;  %2611 = vmatmul.mubr.f32.gmra.mrb[50].mxu0 %v2238_v42  ;;  %v4096_v33 = vpack.c.bf16 %v6906_v52, %v6904_v5  ;;  %v2149_v25 = vmax.f32 %v4174_v13, 0.0  ;;  %v2151_v0 = vmax.f32 %v4190_v62, 0.0  ;;  %v7339_v5 = vld [vmem:[#allocation20_spill] sm:$0xff] }
 0x2a9   : > { %v4191_v20 = vadd.f32 %v2112_v15, %v6799_v63  ;;  %2716 = vmatmul.mubr.f32.gmra.mrb[50].mxu1 %v2318_v18  ;;  %v7323_v50 = vpack.c.bf16 %v6813_v19, %v6811_v57  ;;  %v2279_v24 = vmul.f32 %v6716_v9, %v6908_v44  ;;  %v6930_v40 = vmax.f32 %v2168_v21, %v2176_v22  ;;  %v1890_v30 = vpop.f32.mrb[42].mxu0  ;;  %v2116_v43 = vpop.f32.mrb[42].mxu1 }
 0x2aa   : > { %v2150_v51 = vmax.f32 %v4175_v56, 0.0  ;;  %v2359_v16 = vmul.f32 %v6746_v12, %v6908_v44  ;;  %v2239_v41 = vmul.f32 %v6740_v45, %v6908_v44  ;;  %v7324_v57 = vpack.c.bf16 %v6819_v54, %v6815_v58  ;;  %v1892_v6 = vpop.f32.mrb[43].mxu0  ;;  %v2118_v42 = vpop.f32.mrb[43].mxu1 }
 0x2ab   : > { %4081 = vmatpush3.bf16.msra.mxu0 %v7323_v50  ;;  %v2152_v19 = vmax.f32 %v4191_v20, 0.0  ;;  %v4176_v9 = vadd.f32 %v1890_v30, %v6783_v27  ;;  %v4192_v36 = vadd.f32 %v2116_v43, %v6787_v29  ;;  %2615 = vmatprep.mubr.f32.mxu0 %v2279_v24  ;;  %v2319_v28 = vmul.f32 %v6750_v3, %v6908_v44 }
 0x2ac   : > { %4083 = vmatprep.subr.bf16.mxu0 %v7324_v57  ;;  %v2169_v13 = vmax.f32 %v2149_v25, %v2150_v51  ;;  %2720 = vmatprep.mubr.f32.mxu1 %v2359_v16  ;;  %v2320_v12 = vmul.f32 %v2299_v49, %v6930_v40  ;;  %v4177_v45 = vadd.f32 %v1892_v6, %v6795_v48 }
 0x2ad   : > { %v4193_v58 = vadd.f32 %v2118_v42, %v6799_v63  ;;  %v2177_v54 = vmax.f32 %v2151_v0, %v2152_v19  ;;  %v2153_v62 = vmax.f32 %v4176_v9, 0.0  ;;  %v2155_v2 = vmax.f32 %v4192_v36, 0.0  ;;  %2616 = vmatmul.mubr.f32.gmra.mrb[52].mxu0 %v2239_v41  ;;  %2721 = vmatmul.mubr.f32.gmra.mrb[52].mxu1 %v2319_v28  ;;  %v1896_v22 = vpop.f32.mrb[44].mxu0  ;;  %v2122_v56 = vpop.f32.mrb[44].mxu1 }
 0x2ae   : > { %v2280_v15 = vmul.f32 %v6718_v34, %v6930_v40  ;;  %v2154_v18 = vmax.f32 %v4177_v45, 0.0  ;;  %v7325_v3 = vpack.c.bf16 %v6823_v14, %v6821_v23  ;;  %v2360_v25 = vmul.f32 %v6758_v11, %v6930_v40  ;;  %v1898_v24 = vpop.f32.mrb[45].mxu0  ;;  %v2124_v49 = vpop.f32.mrb[45].mxu1 }
 0x2af   : > { %v2156_v21 = vmax.f32 %v4193_v58, 0.0  ;;  %v2240_v0 = vmul.f32 %v6744_v1, %v6930_v40  ;;  %v6955_v20 = vmax.f32 %v2169_v13, %v2177_v54  ;;  %v4178_v50 = vadd.f32 %v1896_v22, %v6783_v27  ;;  %v6962_v11 = vpop.permute.xlu1 %2430  ;;  %v7332_v22 = vld [vmem:[#allocation17_spill] sm:$0xff] }
 0x2b0   : > { %4085 = vmatpush3.bf16.msra.mxu0 %v7325_v3  ;;  %v4194_v34 = vadd.f32 %v2122_v56, %v6787_v29  ;;  %2620 = vmatprep.mubr.f32.mxu0 %v2280_v15  ;;  %v7326_v23 = vpack.c.bf16 %v6833_v59, %v6831_v55  ;;  %v2170_v14 = vmax.f32 %v2153_v62, %v2154_v18  ;;  %v2537_v15 = vld [vmem:[#allocation3 + $0x2e0] sm:$0xff]  ;;  %v2538_v18 = vld [vmem:[#allocation3 + $0x2e8] sm:$0xff] }
 0x2b1   : > { %v2178_v51 = vmax.f32 %v2155_v2, %v2156_v21  ;;  %2725 = vmatprep.mubr.f32.mxu1 %v2360_v25  ;;  %v4179_v1 = vadd.f32 %v1898_v24, %v6795_v48  ;;  %v4195_v30 = vadd.f32 %v2124_v49, %v6799_v63  ;;  %v2157_v43 = vmax.f32 %v4178_v50, 0.0  ;;  %2621 = vmatmul.mubr.f32.gmra.mrb[54].mxu0 %v2240_v0  ;;  %v1902_v36 = vpop.f32.mrb[46].mxu0  ;;  %v2128_v6 = vpop.f32.mrb[46].mxu1  ;;  %v2521_v0 = vld [vmem:[#allocation3 + $0x260] sm:$0xff]  ;;  %v2522_v50 = vld [vmem:[#allocation3 + $0x268] sm:$0xff] }
 0x2b2   : > { %4087 = vmatprep.subr.bf16.mxu0 %v7326_v23  ;;  %v2159_v16 = vmax.f32 %v4194_v34, 0.0  ;;  %2726 = vmatmul.mubr.f32.gmra.mrb[54].mxu1 %v2320_v12  ;;  %v2281_v41 = vmul.f32 %v6720_v61, %v6955_v20  ;;  %v2361_v55 = vmul.f32 %v6772_v35, %v6955_v20  ;;  %v7327_v9 = vpack.c.bf16 %v6841_v17, %v6839_v32  ;;  %v1904_v35 = vpop.f32.mrb[47].mxu0  ;;  %v2130_v13 = vpop.f32.mrb[47].mxu1 }
 0x2b3   : > { %v6970_v59 = vmax.f32 %v2170_v14, %v2178_v51  ;;  %v2158_v57 = vmax.f32 %v4179_v1, 0.0  ;;  %v2160_v19 = vmax.f32 %v4195_v30, 0.0  ;;  %v2241_v42 = vmul.f32 %v6748_v37, %v6955_v20  ;;  %v2539_v14 = vld [vmem:[#allocation3 + $0x2f0] sm:$0xff]  ;;  %v2540_v51 = vld [vmem:[#allocation3 + $0x2f8] sm:$0xff] }
 0x2b4   : > { %4089 = vmatpush3.bf16.msra.mxu0 %v7327_v9  ;;  %v4180_v28 = vadd.f32 %v1902_v36, %v6783_v27  ;;  %v4196_v61 = vadd.f32 %v2128_v6, %v6787_v29  ;;  %2625 = vmatprep.mubr.f32.mxu0 %v2281_v41  ;;  %v2321_v12 = vmul.f32 %v6770_v26, %v6955_v20  ;;  %v2311_v29 = vpop.permute.xlu0 %2310  ;;  %v7329_v26 = vld [vmem:[#allocation25_spill] sm:$0xff]  ;;  %v7335_v1 = vld [vmem:[#allocation12_spill] sm:$0xff] }
 0x2b5   : > { %2730 = vmatprep.mubr.f32.mxu1 %v2361_v55  ;;  %v2171_v45 = vmax.f32 %v2157_v43, %v2158_v57  ;;  %v2179_v58 = vmax.f32 %v2159_v16, %v2160_v19  ;;  %v4181_v17 = vadd.f32 %v1904_v35, %v6795_v48  ;;  %v4197_v32 = vadd.f32 %v2130_v13, %v6799_v63  ;;  %v6992_v63 = vpop.permute.xlu1 %2390  ;;  %v7336_v16 = vld [vmem:[#allocation19_spill] sm:$0xff]  ;;  %v2523_v36 = vld [vmem:[#allocation3 + $0x270] sm:$0xff]  ;;  %v2524_v6 = vld [vmem:[#allocation3 + $0x278] sm:$0xff] }
 0x2b6   : > { %v7328_v37 = vpack.c.bf16 %v6851_v47, %v6849_v8  ;;  %v2161_v27 = vmax.f32 %v4180_v28, 0.0  ;;  %v2163_v54 = vmax.f32 %v4196_v61, 0.0  ;;  %2626 = vmatmul.mubr.f32.gmra.mrb[56].mxu0 %v2241_v42  ;;  %2731 = vmatmul.mubr.f32.gmra.mrb[56].mxu1 %v2321_v12  ;;  %v2282_v62 = vmul.f32 %v6722_v53, %v6970_v59  ;;  %v7330_v47 = vld [vmem:[#allocation29_spill] sm:$0xff]  ;;  %v7333_v53 = vld [vmem:[#allocation27_spill] sm:$0xff]  ;;  %v7340_v13 = vld [vmem:[#allocation14_spill] sm:$0xff] }
 0x2b7   : > { %v2362_v2 = vmul.f32 %v7329_v26, %v6970_v59  ;;  %v6990_v48 = vmax.f32 %v2171_v45, %v2179_v58  ;;  %v2162_v21 = vmax.f32 %v4181_v17, 0.0  ;;  %v2164_v8 = vmax.f32 %v4197_v32, 0.0  ;;  %v7338_v61 = vld [vmem:[#allocation13_spill] sm:$0xff]  ;;  %v7341_v45 = vld [vmem:[#allocation15_spill] sm:$0xff]  ;;  %v7342_v17 = vld [vmem:[#allocation24_spill] sm:$0xff] }
 0x2b8   : > { %4091 = vmatprep.subr.bf16.mxu0 %v7328_v37  ;;  %v7331_v3 = vpack.c.bf16 %v6857_v7, %v7330_v47  ;;  %v2242_v56 = vmul.f32 %v7332_v22, %v6970_v59  ;;  %2630 = vmatprep.mubr.f32.mxu0 %v2282_v62  ;;  %v2322_v25 = vmul.f32 %v7333_v53, %v6970_v59  ;;  %v2355_v19 = vpop.permute.xlu0 %2354  ;;  %v7343_v37 = vld [vmem:[#allocation28_spill] sm:$0xff]  ;;  %v7345_v62 = vld [vmem:[#allocation21_spill] sm:$0xff]  ;;  %v2941_v53 = vld [vmem:[%s7235_s7 + $0x18] sm:$0xff] }
 0x2b9   : > { %2735 = vmatprep.mubr.f32.mxu1 %v2362_v2  ;;  %v2323_v34 = vmul.f32 %v2311_v29, %v6990_v48  ;;  %v2172_v24 = vmax.f32 %v2161_v27, %v2162_v21  ;;  %v2180_v49 = vmax.f32 %v2163_v54, %v2164_v8  ;;  %v7334_v23 = vpack.c.bf16 %v6861_v46, %v6859_v31  ;;  %v7337_v46 = vld [vmem:[#allocation16_spill] sm:$0xff]  ;;  %v2315_v42 = vpop.permute.xlu1 %2314  ;;  %v7344_v54 = vld [vmem:[#allocation18_spill] sm:$0xff] }
 0x2ba   : > { %4093 = vmatpush3.bf16.msra.mxu0 %v7331_v3  ;;  %v4098_v7 = vpack.c.bf16 %v2538_v18, %v2537_v15  ;;  %2736 = vmatmul.mubr.f32.gmra.mrb[58].mxu1 %v2322_v25  ;;  %v2283_v30 = vmul.f32 %v7335_v1, %v6990_v48  ;;  %v2363_v43 = vmul.f32 %v6928_v10, %v6990_v48  ;;  %v7347_v15 = vld [vmem:[#allocation23_spill] sm:$0xff]  ;;  %v2948_v1 = vld [vmem:[%s7235_s7 + $0x50] sm:$0xff] }
 0x2bb   : > { %4095 = vmatprep.subr.bf16.mxu0 %v7334_v23  ;;  %2631 = vmatmul.mubr.f32.gmra.mrb[58].mxu0 %v2242_v56  ;;  %v2243_v41 = vmul.f32 %v7336_v16, %v6990_v48  ;;  %v2188_v55 = vmax.f32 %v2172_v24, %v2180_v49  ;;  %v4100_v31 = vpack.c.bf16 %v2522_v50, %v2521_v0  ;;  %v2942_v0 = vld [vmem:[%s7235_s7 + $0x20] sm:$0xff]  ;;  %v2943_v50 = vld [vmem:[%s7235_s7 + $0x28] sm:$0xff]  ;;  %v2944_v24 = vld [vmem:[%s7235_s7 + $0x30] sm:$0xff] }
 0x2bc   : > { %v2438_v57 = vmul.f32 %v7337_v46, %v6887_v4  ;;  %2635 = vmatprep.mubr.f32.mxu0 %v2283_v30  ;;  %2740 = vmatprep.mubr.f32.mxu1 %v2363_v43  ;;  %v4102_v9 = vpack.c.bf16 %v2540_v51, %v2539_v14  ;;  %v2437_v12 = vmul.f32 %v7340_v13, %v6867_v38  ;;  %v2395_v56 = vpop.permute.xlu0 %2394  ;;  %v2945_v49 = vld [vmem:[%s7235_s7 + $0x38] sm:$0xff]  ;;  %v2947_v14 = vld [vmem:[%s7235_s7 + $0x48] sm:$0xff]  ;;  %v2950_v16 = vld [vmem:[%s7235_s7 + $0x60] sm:$0xff] }
 0x2bd   : > { %v2364_v10 = vmul.f32 %v2355_v19, %v2188_v55  ;;  %v2324_v28 = vmul.f32 %v2315_v42, %v2188_v55  ;;  %v2284_v35 = vmul.f32 %v7338_v61, %v2188_v55  ;;  %v2244_v52 = vmul.f32 %v7339_v5, %v2188_v55  ;;  %v2949_v30 = vld [vmem:[%s7235_s7 + $0x58] sm:$0xff] }
 0x2be   : > { %4097 = vmatpush3.bf16.msra.mxu0 %v4096_v33  ;;  %2741 = vmatmul.mubr.f32.gmra.mrb[60].mxu1 %v2323_v34  ;;  %v4104_v33 = vpack.c.bf16 %v2524_v6, %v2523_v36  ;;  %v2397_v58 = vmul.f32 %v7341_v45, %v6867_v38  ;;  %v2398_v32 = vmul.f32 %v7342_v17, %v6887_v4  ;;  %v7346_v38 = vld [vmem:[#allocation22_spill] sm:$0xff] }
 0x2bf   : > { %4099 = vmatprep.subr.bf16.mxu0 %v4098_v7  ;;  %2636 = vmatmul.mubr.f32.gmra.mrb[60].mxu0 %v2243_v41  ;;  %v2439_v27 = vmul.f32 %v7343_v37, %v6908_v44  ;;  %v2399_v29 = vmul.f32 %v7344_v54, %v6908_v44  ;;  %v2440_v26 = vmul.f32 %v7345_v62, %v6930_v40  ;;  %v7348_v4 = vld [vmem:[#allocation26_spill] sm:$0xff]  ;;  %v2946_v7 = vld [vmem:[%s7235_s7 + $0x40] sm:$0xff]  ;;  %v2951_v41 = vld [vmem:[%s7235_s7 + $0x68] sm:$0xff] }
 0x2c0   : > { %2745 = vmatprep.mubr.f32.mxu1 %v2364_v10  ;;  %2640 = vmatprep.mubr.f32.mxu0 %v2284_v35  ;;  %v2400_v2 = vmul.f32 %v7346_v38, %v6930_v40  ;;  %v2441_v18 = vmul.f32 %v7347_v15, %v6955_v20  ;;  %v2401_v21 = vmul.f32 %v7348_v4, %v6955_v20  ;;  %v2435_v40 = vpop.permute.xlu1 %2434 }
 0x2c1   : > { %v2442_v8 = vmul.f32 %v6885_v60, %v6970_v59  ;;  %v2402_v44 = vmul.f32 %v6883_v39, %v6970_v59  ;;  %v2443_v47 = vmul.f32 %v6962_v11, %v6990_v48  ;;  %v2403_v3 = vmul.f32 %v6992_v63, %v6990_v48  ;;  %v7046_v39 = vld [vmem:[#allocation2 + $0x88] sm:$0xff]  ;;  %v2938_v11 = vld [vmem:[%s7235_s7] sm:$0xff]  ;;  %v2940_v48 = vld [vmem:[%s7235_s7 + $0x10] sm:$0xff] }
 0x2c2   : > { %4101 = vmatpush3.bf16.msra.mxu0 %v4100_v31  ;;  %2746 = vmatmul.mubr.f32.gmra.mrb[62].mxu1 %v2324_v28  ;;  %v2444_v22 = vmul.f32 %v2435_v40, %v2188_v55  ;;  %v2404_v20 = vmul.f32 %v2395_v56, %v2188_v55  ;;  %v4439_v60 = vmov 0.0|0.0   ;;  %v2939_v59 = vld [vmem:[%s7235_s7 + $0x8] sm:$0xff]  ;;  %v4122_v25 = vpack.c.bf16 %v2941_v53, %v2940_v48 }
 0x2c3   : > { %4103 = vmatprep.subr.bf16.mxu0 %v4102_v9  ;;  %2641 = vmatmul.mubr.f32.gmra.mrb[62].mxu0 %v2244_v52  ;;  %v4119_v63 = vpack.c.bf16 %v2939_v59, %v2938_v11  ;;  %v4125_v34 = vpack.c.bf16 %v2943_v50, %v2942_v0  ;;  %v4128_v23 = vpack.c.bf16 %v2945_v49, %v2944_v24 }
 0x2c4   : > { %2815 = vmatprep.mubr.f32.mxu0 %v2437_v12  ;;  %4106 = vmatprep.subr.bf16.mxu1 %v4439_v60  ;;  %v4131_v51 = vpack.c.bf16 %v2947_v14, %v2946_v7  ;;  %v4134_v43 = vpack.c.bf16 %v2949_v30, %v2948_v1  ;;  %v4137_v55 = vpack.c.bf16 %v2951_v41, %v2950_v16 }
 0x2c5   : > { %3489 = vmatprep.mubr.msk.f32.mxu1 %vm4440_vm2, %v7046_v39 }
 0x2c6   : > { %4105 = vmatpush3.bf16.msra.mxu0 %v4104_v33 }
 0x2c7   : > { %4118 = vmatprep.subr.bf16.mxu0 %v4439_v60 }
 0x2c9   : > { %2816 = vmatmul.mubr.f32.vlgmr.msra.gmra.mrb[64].mxu0 %v2397_v58 }
 0x2ca   : > { %2820 = vmatprep.mubr.f32.mxu0 %v2438_v57  ;;  %4120 = vmatpush3.bf16.msra.mxu0 %v4119_v63 }
 0x2cb   : > { %4121 = vmatprep.subr.bf16.mxu0 %v4439_v60 }
 0x2cd   : > { %2821 = vmatmul.mubr.f32.gmra.mrb[66].mxu0 %v2398_v32 }
 0x2ce   : > { %2825 = vmatprep.mubr.f32.mxu0 %v2439_v27  ;;  %4123 = vmatpush3.bf16.msra.mxu0 %v4122_v25 }
 0x2cf   : > { %4124 = vmatprep.subr.bf16.mxu0 %v4439_v60 }
 0x2d1   : > { %2826 = vmatmul.mubr.f32.gmra.mrb[68].mxu0 %v2399_v29 }
 0x2d2   : > { %2830 = vmatprep.mubr.f32.mxu0 %v2440_v26  ;;  %4126 = vmatpush3.bf16.msra.mxu0 %v4125_v34 }
 0x2d3   : > { %4127 = vmatprep.subr.bf16.mxu0 %v4439_v60 }
 0x2d5   : > { %2831 = vmatmul.mubr.f32.gmra.mrb[70].mxu0 %v2400_v2 }
 0x2d6   : > { %2835 = vmatprep.mubr.f32.mxu0 %v2441_v18  ;;  %4129 = vmatpush3.bf16.msra.mxu0 %v4128_v23 }
 0x2d7   : > { %4130 = vmatprep.subr.bf16.mxu0 %v4439_v60 }
 0x2d9   : > { %2836 = vmatmul.mubr.f32.gmra.mrb[72].mxu0 %v2401_v21 }
 0x2da   : > { %2840 = vmatprep.mubr.f32.mxu0 %v2442_v8  ;;  %4132 = vmatpush3.bf16.msra.mxu0 %v4131_v51 }
 0x2db   : > { %4133 = vmatprep.subr.bf16.mxu0 %v4439_v60 }
 0x2dd   : > { %2841 = vmatmul.mubr.f32.gmra.mrb[74].mxu0 %v2402_v44 }
 0x2de   : > { %2845 = vmatprep.mubr.f32.mxu0 %v2443_v47  ;;  %4135 = vmatpush3.bf16.msra.mxu0 %v4134_v43 }
 0x2df   : > { %4136 = vmatprep.subr.bf16.mxu0 %v4439_v60 }
 0x2e1   : > { %2846 = vmatmul.mubr.f32.gmra.mrb[76].mxu0 %v2403_v3 }
 0x2e2   : > { %2850 = vmatprep.mubr.f32.mxu0 %v2444_v22  ;;  %4138 = vmatpush3.bf16.msra.mxu0 %v4137_v55 }
 0x2e3   : > { %4139 = vmatprep.subr.bf16.mxu0 %v4439_v60 }
 0x2e5   : > { %2851 = vmatmul.mubr.f32.gmra.mrb[78].mxu0 %v2404_v20 }
 0x2e6   : > { %3524 = vmatprep.mubr.msk.f32.mxu0 %vm4440_vm2, %v7046_v39 }
 0x376   : > { %v3294_v31 = vpop.f32.mrb[48].mxu0 }
 0x377   : > { %v3350_v46 = vpop.f32.mrb[48].mxu1  ;;  %v3295_v57 = vpop.f32.mrb[49].mxu0 }
 0x378   : > { %v3296_v19 = vadd.f32 %v3295_v57, %v3294_v31  ;;  %v3351_v9 = vpop.f32.mrb[49].mxu1 }
 0x379   : > { %v3352_v36 = vadd.f32 %v3351_v9, %v3350_v46 }
 0x37b   : > { %v3297_v6 = vpop.f32.mrb[50].mxu0  ;;  %v2713_v42 = vadd.f32 %v3352_v36, %v3296_v19 }
 0x37c   : > { %v3353_v10 = vpop.f32.mrb[50].mxu1  ;;  %v3298_v28 = vpop.f32.mrb[51].mxu0 }
 0x37d   : > { %v3299_v61 = vadd.f32 %v3298_v28, %v3297_v6  ;;  %v3354_v35 = vpop.f32.mrb[51].mxu1 }
 0x37e   : > { %v3355_v5 = vadd.f32 %v3354_v35, %v3353_v10 }
 0x380   : > { %v2718_v52 = vadd.f32 %v3355_v5, %v3299_v61  ;;  %v3300_v33 = vpop.f32.mrb[52].mxu0  ;;  %v3356_v13 = vpop.f32.mrb[52].mxu1 }
 0x381   : > { %v3301_v12 = vpop.f32.mrb[53].mxu0  ;;  %v3357_v45 = vpop.f32.mrb[53].mxu1 }
 0x382   : > { %v3302_v58 = vadd.f32 %v3301_v12, %v3300_v33  ;;  %v3358_v17 = vadd.f32 %v3357_v45, %v3356_v13 }
 0x384   : > { %v2723_v32 = vadd.f32 %v3358_v17, %v3302_v58  ;;  %v3303_v37 = vpop.f32.mrb[54].mxu0 }
 0x385   : > { %v3359_v27 = vpop.f32.mrb[54].mxu1  ;;  %v3304_v54 = vpop.f32.mrb[55].mxu0 }
 0x386   : > { %v3360_v29 = vpop.f32.mrb[55].mxu1  ;;  %v3305_v62 = vadd.f32 %v3304_v54, %v3303_v37 }
 0x387   : > { %v3361_v26 = vadd.f32 %v3360_v29, %v3359_v27 }
 0x389   : > { %v2728_v38 = vadd.f32 %v3361_v26, %v3305_v62  ;;  %v3306_v2 = vpop.f32.mrb[56].mxu0  ;;  %v3362_v15 = vpop.f32.mrb[56].mxu1 }
 0x38a   : > { %v3307_v18 = vpop.f32.mrb[57].mxu0  ;;  %v3363_v4 = vpop.f32.mrb[57].mxu1 }
 0x38b   : > { %v3308_v21 = vadd.f32 %v3307_v18, %v3306_v2  ;;  %v3364_v8 = vadd.f32 %v3363_v4, %v3362_v15  ;;  %v2856_v18 = vld [vmem:[%s7240_s12] sm:$0xff]  ;;  %v2952_v4 = vld [vmem:[%s7235_s7 + $0x70] sm:$0xff] }
 0x38d   : > { %v2733_v44 = vadd.f32 %v3364_v8, %v3308_v21  ;;  %v3365_v40 = vpop.f32.mrb[58].mxu1  ;;  %v2953_v21 = vld [vmem:[%s7235_s7 + $0x78] sm:$0xff] }
 0x38e   : > { %v3309_v47 = vpop.f32.mrb[58].mxu0  ;;  %v3366_v22 = vpop.f32.mrb[59].mxu1  ;;  %v4140_v8 = vpack.c.bf16 %v2953_v21, %v2952_v4 }
 0x38f   : > { %v3310_v3 = vpop.f32.mrb[59].mxu0  ;;  %v3367_v20 = vadd.f32 %v3366_v22, %v3365_v40 }
 0x390   : > { %v3311_v56 = vadd.f32 %v3310_v3, %v3309_v47  ;;  %v3033_v47 = vld [vmem:[%s7237_s9 + $0x8] sm:$0xff]  ;;  %4141 = vmatpush3.bf16.msra.mxu0 %v4140_v8  ;;  %v3035_v3 = vld [vmem:[%s7237_s9 + $0x18] sm:$0xff] }
 0x391   : > { %v3368_v48 = vpop.f32.mrb[60].mxu1 }
 0x392   : > { %v2738_v11 = vadd.f32 %v3367_v20, %v3311_v56  ;;  %v3312_v59 = vpop.f32.mrb[60].mxu0  ;;  %v3369_v53 = vpop.f32.mrb[61].mxu1  ;;  %v3036_v56 = vld [vmem:[%s7237_s9 + $0x20] sm:$0xff]  ;;  %v3037_v20 = vld [vmem:[%s7237_s9 + $0x28] sm:$0xff] }
 0x393   : > { %v3313_v63 = vpop.f32.mrb[61].mxu0  ;;  %v3370_v0 = vadd.f32 %v3369_v53, %v3368_v48  ;;  %v3039_v48 = vld [vmem:[%s7237_s9 + $0x38] sm:$0xff]  ;;  %v3040_v53 = vld [vmem:[%s7237_s9 + $0x40] sm:$0xff] }
 0x394   : > { %v3314_v25 = vadd.f32 %v3313_v63, %v3312_v59  ;;  %v3038_v59 = vld [vmem:[%s7237_s9 + $0x30] sm:$0xff] }
 0x395   : > { %v3371_v24 = vpop.f32.mrb[62].mxu1  ;;  %v4152_v63 = vpack.c.bf16 %v3039_v48, %v3038_v59 }
 0x396   : > { %v2743_v50 = vadd.f32 %v3370_v0, %v3314_v25  ;;  %v3315_v34 = vpop.f32.mrb[62].mxu0  ;;  %v3372_v23 = vpop.f32.mrb[63].mxu1  ;;  %v3041_v25 = vld [vmem:[%s7237_s9 + $0x48] sm:$0xff] }
 0x397   : > { %v3316_v49 = vpop.f32.mrb[63].mxu0  ;;  %v3373_v14 = vadd.f32 %v3372_v23, %v3371_v24  ;;  %v4155_v0 = vpack.c.bf16 %v3041_v25, %v3040_v53  ;;  %v3045_v23 = vld [vmem:[%s7237_s9 + $0x68] sm:$0xff] }
 0x398   : > { %v3317_v7 = vadd.f32 %v3316_v49, %v3315_v34  ;;  %v3043_v34 = vld [vmem:[%s7237_s9 + $0x58] sm:$0xff]  ;;  %v3044_v49 = vld [vmem:[%s7237_s9 + $0x60] sm:$0xff] }
 0x39a   : > { %v2748_v51 = vadd.f32 %v3373_v14, %v3317_v7  ;;  %v4161_v7 = vpack.c.bf16 %v3045_v23, %v3044_v49  ;;  %v3253_v14 = vld [vmem:[%s7234_s6] ss:$0 sm:$0xff] }
 0x39c   : > { %v3406_v1 = vpop.f32.mrb[64].mxu0 }
 0x39d   : > { %v3407_v30 = vpop.f32.mrb[65].mxu0 }
 0x39e   : > { %v3408_v43 = vadd.f32 %v3407_v30, %v3406_v1 }
 0x3a0   : > { %v2818_v16 = vadd.f32 %v3408_v43, %v2713_v42  ;;  %v3409_v41 = vpop.f32.mrb[66].mxu0 }
 0x3a1   : > { %v3410_v55 = vpop.f32.mrb[67].mxu0 }
 0x3a2   : > { %v3411_v31 = vadd.f32 %v3410_v55, %v3409_v41  ;;  %v3047_v41 = vld [vmem:[%s7237_s9 + $0x78] sm:$0xff]  ;;  %v3255_v55 = vld [vmem:[%s7236_s8] ss:$0 sm:$0xff] }
 0x3a4   : > { %v2823_v46 = vadd.f32 %v3411_v31, %v2718_v52  ;;  %v3412_v57 = vpop.f32.mrb[68].mxu0 }
 0x3a5   : > { %v3413_v19 = vpop.f32.mrb[69].mxu0 }
 0x3a6   : > { %v4107_v9 = vpack.c.bf16 %v2823_v46, %v2818_v16  ;;  %v3414_v36 = vadd.f32 %v3413_v19, %v3412_v57  ;;  %v3046_v16 = vld [vmem:[%s7237_s9 + $0x70] sm:$0xff] }
 0x3a8   : > { %v2828_v6 = vadd.f32 %v3414_v36, %v2723_v32  ;;  %v3415_v10 = vpop.f32.mrb[70].mxu0  ;;  %4108 = vmatpush3.bf16.msra.mxu1 %v4107_v9  ;;  %v3256_v9 = vld [vmem:[%s7238_s10] ss:$0 sm:$0xff] }
 0x3a9   : > { %v3416_v28 = vpop.f32.mrb[71].mxu0  ;;  %4109 = vmatprep.subr.bf16.mxu1 %v4439_v60 }
 0x3aa   : > { %v3417_v61 = vadd.f32 %v3416_v28, %v3415_v10 }
 0x3ac   : > { %v2833_v35 = vadd.f32 %v3417_v61, %v2728_v38  ;;  %v3418_v5 = vpop.f32.mrb[72].mxu0 }
 0x3ad   : > { %v3419_v33 = vpop.f32.mrb[73].mxu0 }
 0x3ae   : > { %v4110_v13 = vpack.c.bf16 %v2833_v35, %v2828_v6  ;;  %v3420_v42 = vadd.f32 %v3419_v33, %v3418_v5 }
 0x3b0   : > { %v2838_v12 = vadd.f32 %v3420_v42, %v2733_v44  ;;  %v3421_v45 = vpop.f32.mrb[74].mxu0  ;;  %4111 = vmatpush3.bf16.msra.mxu1 %v4110_v13  ;;  %v3032_v44 = vld [vmem:[%s7237_s9] sm:$0xff] }
 0x3b1   : > { %v3422_v52 = vpop.f32.mrb[75].mxu0  ;;  %4112 = vmatprep.subr.bf16.mxu1 %v4439_v60  ;;  %v4143_v40 = vpack.c.bf16 %v3033_v47, %v3032_v44 }
 0x3b2   : > { %v3423_v58 = vadd.f32 %v3422_v52, %v3421_v45 }
 0x3b4   : > { %v2843_v17 = vadd.f32 %v3423_v58, %v2738_v11  ;;  %v3424_v32 = vpop.f32.mrb[76].mxu0  ;;  %v4149_v11 = vpack.c.bf16 %v3037_v20, %v3036_v56 }
 0x3b5   : > { %v3425_v37 = vpop.f32.mrb[77].mxu0 }
 0x3b6   : > { %v4113_v27 = vpack.c.bf16 %v2843_v17, %v2838_v12  ;;  %v3426_v54 = vadd.f32 %v3425_v37, %v3424_v32 }
 0x3b8   : > { %v2848_v29 = vadd.f32 %v3426_v54, %v2743_v50  ;;  %v3427_v62 = vpop.f32.mrb[78].mxu0  ;;  %4114 = vmatpush3.bf16.msra.mxu1 %v4113_v27  ;;  %v3042_v50 = vld [vmem:[%s7237_s9 + $0x50] sm:$0xff] }
 0x3b9   : > { %v3428_v26 = vpop.f32.mrb[79].mxu0  ;;  %4115 = vmatprep.subr.bf16.mxu1 %v4439_v60  ;;  %v4158_v24 = vpack.c.bf16 %v3043_v34, %v3042_v50 }
 0x3ba   : > { %v3429_v38 = vadd.f32 %v3428_v26, %v3427_v62 }
 0x3bc   : > { %v2853_v2 = vadd.f32 %v3429_v38, %v2748_v51 }
 0x3be   : > { %v4116_v15 = vpack.c.bf16 %v2853_v2, %v2848_v29 }
 0x3c0   : > { %4117 = vmatpush3.bf16.msra.mxu1 %v4116_v15 }
 0x3c1   : > { %4142 = vmatprep.subr.bf16.mxu1 %v4439_v60 }
 0x3c3   : > { %3490 = vmatmul.mubr.msk.f32.vlgmr.msra.gmra.mrb[64].mxu1 %vm709_vm0, %v2856_v18 }
 0x3c4   : > { %3559 = vmatprep.mubr.msk.f32.mxu1 %vm4440_vm2, %v7046_v39  ;;  %v3034_v39 = vld [vmem:[%s7237_s9 + $0x10] sm:$0xff]  ;;  %4144 = vmatpush3.bf16.msra.mxu1 %v4143_v40 }
 0x3c5   : > { %v4146_v22 = vpack.c.bf16 %v3035_v3, %v3034_v39  ;;  %4145 = vmatprep.subr.bf16.mxu1 %v4439_v60 }
 0x3c8   : > { %4147 = vmatpush3.bf16.msra.mxu1 %v4146_v22 }
 0x3c9   : > { %4148 = vmatprep.subr.bf16.mxu1 %v4439_v60 }
 0x3cc   : > { %4150 = vmatpush3.bf16.msra.mxu1 %v4149_v11 }
 0x3cd   : > { %4151 = vmatprep.subr.bf16.mxu1 %v4439_v60 }
 0x3d0   : > { %4153 = vmatpush3.bf16.msra.mxu1 %v4152_v63 }
 0x3d1   : > { %4154 = vmatprep.subr.bf16.mxu1 %v4439_v60 }
 0x3d4   : > { %4156 = vmatpush3.bf16.msra.mxu1 %v4155_v0 }
 0x3d5   : > { %4157 = vmatprep.subr.bf16.mxu1 %v4439_v60 }
 0x3d8   : > { %4159 = vmatpush3.bf16.msra.mxu1 %v4158_v24 }
 0x3d9   : > { %4160 = vmatprep.subr.bf16.mxu1 %v4439_v60 }
 0x3dc   : > { %4162 = vmatpush3.bf16.msra.mxu1 %v4161_v7 }
 0x3dd   : > { %4163 = vmatprep.subr.bf16.mxu1 %v4439_v60  ;;  %v4164_v60 = vpack.c.bf16 %v3047_v41, %v3046_v16 }
 0x3e0   : > { %4165 = vmatpush3.bf16.msra.mxu1 %v4164_v60 }
 0x496   : > { %v2933_v51 = vpop.f32.mrb[64].mxu1 }
 0x497   : > { %v2934_v1 = vadd.f32 %v3253_v14, %v2933_v51  ;;  %v3491_v30 = vpop.f32.mrb[65].mxu1 }
 0x499   : > { %v2937_v43 = vmax.f32 %v2934_v1, 0.0 }
 0x49b   : > { %3525 = vmatmul.mubr.f32.vlgmr.msra.gmra.mrb[80].mxu0 %v2937_v43 }
 0x56e   : > { %v3027_v31 = vpop.f32.mrb[80].mxu0 }
 0x56f   : > { %v3028_v46 = vadd.f32 %v3255_v55, %v3027_v31  ;;  %v3526_v57 = vpop.f32.mrb[81].mxu0 }
 0x571   : > { %v3031_v19 = vmax.f32 %v3028_v46, 0.0 }
 0x573   : > { %3560 = vmatmul.mubr.f32.vlgmr.msra.gmra.mrb[66].mxu1 %v3031_v19 }
 0x646   : > { %v3121_v36 = vpop.f32.mrb[66].mxu1 }
 0x647   : > { %v3122_v6 = vadd.f32 %v3256_v9, %v3121_v36  ;;  %v3561_v10 = vpop.f32.mrb[67].mxu1 }
 0x649   : > { %3125 = vst [vmem:[%s451_s22] sm:$0xff] %v3122_v6 }
 0x64a   : > { %4374 = shalt.err (!%p4371_p7)
}
 0x64b   : > { %s4375_s5 = scalar_lea.hbm %s7186_s16, 128  ;;  %s4379_s22 = scalar_lea.hbm %s7241_s13, 256 }
 0x64c   : > { %p4376_p8 = scmp.ne.s32.totalorder %s7186_s16, %s4375_s5  ;;  %p4380_p1 = scmp.lt.u32.totalorder %s7186_s16, %s7241_s13 }
 0x64d   : > { %p4381_p0 = scmp.lt.u32.totalorder %s4379_s22, %s4375_s5  ;;  %p4383_p6 = scmp.lt.u32.totalorder %s4375_s5, %s7186_s16 }
 0x64e   : > { %p4377_p11 = pnand %p4376_p8, %p7349_p9 }
 0x64f   : > { %p4382_p5 = por %p4381_p0, %p4380_p1 }
 0x650   : > { %p4378_p13 = pneg %p4377_p11 }
 0x651   : > { %p4384_p10 = por %p4383_p6, %p4382_p5 }
 0x653   : > { %p4385_p12 = pnand %p4384_p10, %p4378_p13 }
 0x655   : > { %4388 = shalt.err (!%p4385_p12)
}
 0x656   : > { %4234 = dma.vmem_to_hbm [thread:$0]  (%p7349_p9), %s7188_s15, 128, %s7186_s16, %s3127_s14  }
 0x657 PF: > { %p4246_p2 = scmp.ge.s32.totalorder %s4427_s28, 2  ;;  %s3152_s27 = sand.u32 1, %s4415_s25  }
 0x658   : > { %p7350_p3 = scmp.ne.s32.totalorder %s7268_s19, 0  ;;  %s3153_s29 = scalar_lea.sflag [#allocation5], %s3152_s27 }
 0x65a   : > { %p4241_p4 = pnand %p4246_p2, %p7350_p3 }
 0x65c   : > { %4410 = dma.done.wait (!%p4241_p4), %s3153_s29, 128  }
 0x65d   : > { %4412 = vsyncadd (!%p4241_p4), %s3153_s29, 4294967168  ;;  %s7351_s28 = sld [smem:[#allocation10_spill]]  ;;  %s7352_s21 = sld [smem:[#allocation9_spill]] }
 0x65e   : > { %s7353_s27 = sld [smem:[#allocation11_spill]]  ;;  %s7354_s25 = smov %s4419_s26 }
 0x663   : > { %p24_p7 = scmp.ge.s32.totalorder %s7351_s28, 4   ;;  %s7355_s26 = smov %s7352_s21 }
 0x665   :  { %26 = sbr.rel (!%p24_p7) target bundleno = 6 (0x6), region = 112 }
 0x66c   :  { %3158 = vsyncpa [#allocation4], 1 }
 0x66d   :  { %3160 = vsyncpa [#allocation4 + $0x1], 1 }
 0x66e   :  { %3161 = vsyncpa [#allocation5], 1 }
 0x66f   :  { %3163 = vsyncpa [#allocation5 + $0x1], 1 }

</bundles_post_ra>
